<compile_context>
chip_gen: v7x
topology: tpu7x:2x2x1
jax: 0.10.0
libtpu: 0.0.40
codegen_flags: <defaults>
</compile_context>

<pallas_src>
from functools import partial

import jax
import jax.numpy as jnp
from jax.experimental import pallas as pl
from jax.experimental.pallas import tpu as pltpu

LANE = 128          # pad output channels to a full vreg lane width
BN_EPS = 1e-5

ENC_CHANNELS = (32, 64, 64)   # Conv2d(3->32->64->64), k=4, s=2, p=1
DEC_CHANNELS = (64, 32, 3)    # ConvTranspose2d(64->64->32->3), k=4, s=2, p=1


# ----------------------------------------------------------------------------
# Small helpers
# ----------------------------------------------------------------------------
def _pad_axis(x, axis, mult):
    pad = (-x.shape[axis]) % mult
    if pad == 0:
        return x
    widths = [(0, 0)] * x.ndim
    widths[axis] = (0, pad)
    return jnp.pad(x, widths)


# ----------------------------------------------------------------------------
# Fused layer kernel: (grouped) matmul + bias + ReLU + BN + sigmoid + round
# ----------------------------------------------------------------------------
def _fused_layer_kernel(a_ref, w_ref, b_ref, g_ref, be_ref, o_ref, *,
                        n_groups, relu, bn, sigmoid, rnd, eps):
    # a_ref: (G, M, K) bf16   w_ref: (G, K, Cp) bf16
    # b/g/be: (1, Cp) f32     o_ref: (G*M, Cp) f32
    outs = []
    for g in range(n_groups):                      # static unroll, G <= 4
        outs.append(jnp.dot(a_ref[g], w_ref[g],
                            preferred_element_type=jnp.float32))
    y = outs[0] if n_groups == 1 else jnp.concatenate(outs, axis=0)
    y = y + b_ref[...]
    if relu:
        y = jnp.maximum(y, 0.0)
    if bn:
        # Full-batch statistics: the whole layer output is resident in this
        # kernel instance, so stats are exact (not per-tile).
        mean = jnp.mean(y, axis=0, keepdims=True)
        var = jnp.mean(jnp.square(y - mean), axis=0, keepdims=True)  # biased
        y = (y - mean) * jax.lax.rsqrt(var + eps)
        y = y * g_ref[...] + be_ref[...]
    if sigmoid:
        y = jax.nn.sigmoid(y)
    if rnd:                                        # STE forward fused in
        y = jnp.round(y)
    o_ref[...] = y.astype(o_ref.dtype)


def fused_layer(a_gmk, w_gkc, bias, gamma, beta, *, relu, bn, sigmoid, rnd):
    G, M, K = a_gmk.shape
    Cp = w_gkc.shape[-1]
    kernel = partial(_fused_layer_kernel, n_groups=G, relu=relu, bn=bn,
                     sigmoid=sigmoid, rnd=rnd, eps=BN_EPS)
    return pl.pallas_call(
        kernel,
        out_shape=jax.ShapeDtypeStruct((G * M, Cp), jnp.float32),
        grid=(1,),
        in_specs=[
            pl.BlockSpec((G, M, K), lambda i: (0, 0, 0)),
            pl.BlockSpec((G, K, Cp), lambda i: (0, 0, 0)),
            pl.BlockSpec((1, Cp), lambda i: (0, 0)),
            pl.BlockSpec((1, Cp), lambda i: (0, 0)),
            pl.BlockSpec((1, Cp), lambda i: (0, 0)),
        ],
        out_specs=pl.BlockSpec((G * M, Cp), lambda i: (0, 0)),
        compiler_params=pltpu.CompilerParams(
            dimension_semantics=("arbitrary",)),
    )(a_gmk, w_gkc, bias, gamma, beta)


# ----------------------------------------------------------------------------
# Patch construction (cheap XLA data prep; all hot math is in the kernels)
# ----------------------------------------------------------------------------
def _conv_patches(x_nhwc, k, s, pad):
    """im2col for a k x k, stride-s conv.  Returns (N*Ho*Wo, k*k*C)."""
    xp = jnp.pad(x_nhwc, ((0, 0), (pad, pad), (pad, pad), (0, 0)))
    N, Hp, Wp, C = xp.shape
    Ho = (Hp - k) // s + 1
    Wo = (Wp - k) // s + 1
    taps = []
    for i in range(k):
        for j in range(k):
            taps.append(xp[:, i:i + s * (Ho - 1) + 1:s,
                           j:j + s * (Wo - 1) + 1:s, :])
    p = jnp.stack(taps, axis=3)                    # (N, Ho, Wo, k*k, C)
    return p.reshape(N * Ho * Wo, k * k * C), (N, Ho, Wo)


def _deconv_patches(x_nhwc):
    """ConvTranspose2d(k=4,s=2,p=1) as 4 stride-1 2x2 sub-convs (no zero taps).

    Returns patches of shape (4, N*H*W, 4*C); group index = py*2 + px is the
    output-pixel parity class (oy = 2r + py, ox = 2c + px).
    """
    N, H, W, C = x_nhwc.shape
    xp = jnp.pad(x_nhwc, ((0, 0), (1, 1), (1, 1), (0, 0)))
    groups = []
    for py in range(2):
        for px in range(2):
            win = xp[:, py:py + H + 1, px:px + W + 1, :]
            taps = []
            for a in range(2):
                for b in range(2):
                    taps.append(win[:, a:a + H, b:b + W, :])
            p = jnp.stack(taps, axis=3).reshape(N * H * W, 4 * C)
            groups.append(p)
    return jnp.stack(groups, axis=0), (N, H, W)


# ----------------------------------------------------------------------------
# Parameters
# ----------------------------------------------------------------------------
def init_params(key):
    ks = jax.random.split(key, 6)

    def conv_w(k, cout, cin, ksz):
        return 0.05 * jax.random.normal(k, (cout, cin, ksz, ksz), jnp.float32)

    def convt_w(k, cin, cout, ksz):
        return 0.05 * jax.random.normal(k, (cin, cout, ksz, ksz), jnp.float32)

    return {
        "enc": [
            dict(w=conv_w(ks[0], 32, 3, 4), b=jnp.zeros((32,), jnp.float32),
                 gamma=jnp.ones((32,), jnp.float32), beta=jnp.zeros((32,), jnp.float32)),
            dict(w=conv_w(ks[1], 64, 32, 4), b=jnp.zeros((64,), jnp.float32),
                 gamma=jnp.ones((64,), jnp.float32), beta=jnp.zeros((64,), jnp.float32)),
            dict(w=conv_w(ks[2], 64, 64, 4), b=jnp.zeros((64,), jnp.float32),
                 gamma=jnp.ones((64,), jnp.float32), beta=jnp.zeros((64,), jnp.float32)),
        ],
        "dec": [
            dict(w=convt_w(ks[3], 64, 64, 4), b=jnp.zeros((64,), jnp.float32),
                 gamma=jnp.ones((64,), jnp.float32), beta=jnp.zeros((64,), jnp.float32)),
            dict(w=convt_w(ks[4], 64, 32, 4), b=jnp.zeros((32,), jnp.float32),
                 gamma=jnp.ones((32,), jnp.float32), beta=jnp.zeros((32,), jnp.float32)),
            dict(w=convt_w(ks[5], 32, 3, 4), b=jnp.zeros((3,), jnp.float32)),
        ],
    }


def prepare_params(params):
    """Precompute matmul-ready weight layouts (done ONCE, not per forward)."""
    prep = {"enc": [], "dec": []}

    for layer in params["enc"]:
        w = layer["w"]                                       # (Cout, Cin, 4, 4)
        cout = w.shape[0]
        wm = jnp.transpose(w, (2, 3, 1, 0)).reshape(-1, cout)   # (k*k*Cin, Cout)
        wm = _pad_axis(_pad_axis(wm, 0, LANE), 1, LANE).astype(jnp.bfloat16)[None]
        prep["enc"].append(dict(
            w=wm,                                            # (1, Kp, 128)
            b=_pad_axis(layer["b"][None, :], 1, LANE),
            gamma=_pad_axis(layer["gamma"][None, :], 1, LANE),
            beta=_pad_axis(layer["beta"][None, :], 1, LANE)))

    for layer in params["dec"]:
        w = layer["w"]                                       # (Cin, Cout, 4, 4)
        cin, cout = w.shape[0], w.shape[1]
        groups = []
        for py in range(2):
            for px in range(2):
                taps = [w[:, :, 3 - py - 2 * a, 3 - px - 2 * b]
                        for a in range(2) for b in range(2)]  # each (Cin, Cout)
                groups.append(jnp.stack(taps, axis=0).reshape(4 * cin, cout))
        wm = jnp.stack(groups, axis=0)                       # (4, 4*Cin, Cout)
        wm = _pad_axis(_pad_axis(wm, 1, LANE), 2, LANE).astype(jnp.bfloat16)
        entry = dict(w=wm, b=_pad_axis(layer["b"][None, :], 1, LANE))
        if "gamma" in layer:
            entry["gamma"] = _pad_axis(layer["gamma"][None, :], 1, LANE)
            entry["beta"] = _pad_axis(layer["beta"][None, :], 1, LANE)
        else:   # last decoder layer has no BN; dummies (unread in kernel)
            entry["gamma"] = jnp.zeros_like(entry["b"])
            entry["beta"] = jnp.zeros_like(entry["b"])
        prep["dec"].append(entry)
    return prep


# ----------------------------------------------------------------------------
# Forward
# ----------------------------------------------------------------------------
def encode(prep, x_nhwc, apply_sigmoid=True, apply_ste=True):
    x = x_nhwc
    for i, layer in enumerate(prep["enc"]):
        patches, (N, Ho, Wo) = _conv_patches(x, k=4, s=2, pad=1)
        patches = _pad_axis(patches, 1, LANE).astype(jnp.bfloat16)[None]
        last = i == len(prep["enc"]) - 1
        y = fused_layer(patches, layer["w"], layer["b"],
                        layer["gamma"], layer["beta"],
                        relu=True, bn=True,
                        sigmoid=(apply_sigmoid and last),
                        rnd=(apply_ste and last))            # STE fused in
        cout = ENC_CHANNELS[i]
        x = y[:, :cout].reshape(N, Ho, Wo, cout)
    return x


def decode(prep, x_nhwc):
    x = x_nhwc
    for i, layer in enumerate(prep["dec"]):
        patches, (N, H, W) = _deconv_patches(x)              # (4, N*H*W, 4*Cin)
        patches = _pad_axis(patches, 2, LANE).astype(jnp.bfloat16)
        last = i == len(prep["dec"]) - 1
        y = fused_layer(patches, layer["w"], layer["b"],
                        layer["gamma"], layer["beta"],
                        relu=not last, bn=not last, sigmoid=last, rnd=False)
        cout = DEC_CHANNELS[i]
        # interleave the 4 parity classes back into (N, 2H, 2W, Cout)
        y = y.reshape(2, 2, N, H, W, -1)
        y = jnp.transpose(y, (2, 3, 0, 4, 1, 5)).reshape(N, 2 * H, 2 * W, -1)
        x = y[:, :, :, :cout]
    return x


@partial(jax.jit, static_argnames=("apply_sigmoid",))
def autoencoder_forward(prep, x_nchw, apply_sigmoid=True):
    """Default path of Autoencoder.forward: decoder(STE(encoder(x)))."""
    x = jnp.transpose(x_nchw, (0, 2, 3, 1)).astype(jnp.float32)   # NCHW -> NHWC
    x = encode(prep, x, apply_sigmoid=apply_sigmoid, apply_ste=True)
    x = decode(prep, x)
    return jnp.transpose(x, (0, 3, 1, 2))                         # NHWC -> NCHW


if __name__ == "__main__":
    key = jax.random.PRNGKey(0)
    k_param, k_input = jax.random.split(key)
    params = init_params(k_param)
    prep = prepare_params(params)                 # weight layouts computed once
    x = jax.random.normal(k_input, (2, 3, 16, 16), jnp.float32)   # NCHW

    out = autoencoder_forward(prep, x)
    out = jax.block_until_ready(out)

    assert out.shape == (2, 3, 16, 16), out.shape
    assert out.dtype == jnp.float32
    assert bool(jnp.all(jnp.isfinite(out)))
    print("KERNEL_OK")
</pallas_src>

<mosaic_0001>
module attributes {stable_mosaic.version = 11 : i64} {
  func.func @_fused_layer_kernel(%arg0: i32, %arg1: memref<1x128x128xbf16, #tpu.memory_space<vmem>>, %arg2: memref<1x128x128xbf16, #tpu.memory_space<vmem>>, %arg3: memref<1x128xf32, #tpu.memory_space<vmem>>, %arg4: memref<1x128xf32, #tpu.memory_space<vmem>>, %arg5: memref<1x128xf32, #tpu.memory_space<vmem>>, %arg6: memref<128x128xf32, #tpu.memory_space<vmem>>) attributes {dimension_semantics = [#tpu.dimension_semantics<arbitrary>], iteration_bounds = array<i64: 1>, scalar_prefetch = 0 : i64, scratch_operands = 0 : i64, tpu.core_type = #tpu.core_type<tc>, window_params = [{pipeline_mode = #tpu.pipeline_mode<synchronous>, transform_indices = @transform_0, window_bounds = array<i64: 1, 128, 128>}, {pipeline_mode = #tpu.pipeline_mode<synchronous>, transform_indices = @transform_1, window_bounds = array<i64: 1, 128, 128>}, {pipeline_mode = #tpu.pipeline_mode<synchronous>, transform_indices = @transform_2, window_bounds = array<i64: 1, 128>}, {pipeline_mode = #tpu.pipeline_mode<synchronous>, transform_indices = @transform_3, window_bounds = array<i64: 1, 128>}, {pipeline_mode = #tpu.pipeline_mode<synchronous>, transform_indices = @transform_4, window_bounds = array<i64: 1, 128>}, {pipeline_mode = #tpu.pipeline_mode<synchronous>, transform_indices = @transform_5, window_bounds = array<i64: 128, 128>}]} {
    %c0 = arith.constant 0 : index
    %c0_0 = arith.constant 0 : index
    %c0_1 = arith.constant 0 : index
    %0 = vector.load %arg1[%c0, %c0_0, %c0_1] : memref<1x128x128xbf16, #tpu.memory_space<vmem>>, vector<1x128x128xbf16>
    %1 = vector.shape_cast %0 : vector<1x128x128xbf16> to vector<128x128xbf16>
    %c0_2 = arith.constant 0 : index
    %c0_3 = arith.constant 0 : index
    %c0_4 = arith.constant 0 : index
    %2 = vector.load %arg2[%c0_2, %c0_3, %c0_4] : memref<1x128x128xbf16, #tpu.memory_space<vmem>>, vector<1x128x128xbf16>
    %3 = vector.shape_cast %2 : vector<1x128x128xbf16> to vector<128x128xbf16>
    %cst = arith.constant dense<0.000000e+00> : vector<128x128xf32>
    %4 = tpu.matmul %1, %3, %cst {dimension_numbers = #tpu.dot_dimension_numbers<[1], [0], [0], [1], [0, 0, 1, 1], [], []>} : vector<128x128xbf16>, vector<128x128xbf16>, vector<128x128xf32> -> vector<128x128xf32>
    %c0_5 = arith.constant 0 : index
    %c0_6 = arith.constant 0 : index
    %5 = vector.load %arg3[%c0_5, %c0_6] : memref<1x128xf32, #tpu.memory_space<vmem>>, vector<1x128xf32>
    %6 = vector.broadcast %5 : vector<1x128xf32> to vector<128x128xf32>
    %7 = arith.addf %4, %6 : vector<128x128xf32>
    %cst_7 = arith.constant 0.000000e+00 : f32
    %8 = vector.broadcast %cst_7 : f32 to vector<128x128xf32>
    %9 = arith.maximumf %7, %8 : vector<128x128xf32>
    %cst_8 = arith.constant dense<0.000000e+00> : vector<128xf32>
    %10 = vector.multi_reduction <add>, %9, %cst_8 [0] : vector<128x128xf32> to vector<128xf32>
    %11 = vector.shape_cast %10 : vector<128xf32> to vector<1x128xf32>
    %cst_9 = arith.constant 1.280000e+02 : f32
    %12 = vector.broadcast %cst_9 : f32 to vector<1x128xf32>
    %13 = arith.divf %11, %12 : vector<1x128xf32>
    %14 = vector.broadcast %13 : vector<1x128xf32> to vector<128x128xf32>
    %15 = arith.subf %9, %14 : vector<128x128xf32>
    %16 = arith.mulf %15, %15 : vector<128x128xf32>
    %cst_10 = arith.constant dense<0.000000e+00> : vector<128xf32>
    %17 = vector.multi_reduction <add>, %16, %cst_10 [0] : vector<128x128xf32> to vector<128xf32>
    %18 = vector.shape_cast %17 : vector<128xf32> to vector<1x128xf32>
    %cst_11 = arith.constant 1.280000e+02 : f32
    %19 = vector.broadcast %cst_11 : f32 to vector<1x128xf32>
    %20 = arith.divf %18, %19 : vector<1x128xf32>
    %21 = vector.broadcast %13 : vector<1x128xf32> to vector<128x128xf32>
    %22 = arith.subf %9, %21 : vector<128x128xf32>
    %cst_12 = arith.constant 9.99999974E-6 : f32
    %23 = vector.broadcast %cst_12 : f32 to vector<1x128xf32>
    %24 = arith.addf %20, %23 : vector<1x128xf32>
    %25 = math.rsqrt %24 : vector<1x128xf32>
    %26 = vector.broadcast %25 : vector<1x128xf32> to vector<128x128xf32>
    %27 = arith.mulf %22, %26 : vector<128x128xf32>
    %c0_13 = arith.constant 0 : index
    %c0_14 = arith.constant 0 : index
    %28 = vector.load %arg4[%c0_13, %c0_14] : memref<1x128xf32, #tpu.memory_space<vmem>>, vector<1x128xf32>
    %29 = vector.broadcast %28 : vector<1x128xf32> to vector<128x128xf32>
    %30 = arith.mulf %27, %29 : vector<128x128xf32>
    %c0_15 = arith.constant 0 : index
    %c0_16 = arith.constant 0 : index
    %31 = vector.load %arg5[%c0_15, %c0_16] : memref<1x128xf32, #tpu.memory_space<vmem>>, vector<1x128xf32>
    %32 = vector.broadcast %31 : vector<1x128xf32> to vector<128x128xf32>
    %33 = arith.addf %30, %32 : vector<128x128xf32>
    %c0_17 = arith.constant 0 : index
    %c0_18 = arith.constant 0 : index
    %34 = vector.load %arg6[%c0_17, %c0_18] : memref<128x128xf32, #tpu.memory_space<vmem>>, vector<128x128xf32>
    tpu.vector_store %arg6[%c0_17, %c0_18], %33 {strides = array<i32>} : memref<128x128xf32, #tpu.memory_space<vmem>>, vector<128x128xf32>,
    return
  }
  func.func @transform_0(%arg0: i32) -> (i32, i32, i32) {
    %c0_i32 = arith.constant 0 : i32
    %c0_i32_0 = arith.constant 0 : i32
    %c0_i32_1 = arith.constant 0 : i32
    %c0_i32_2 = arith.constant 0 : i32
    return %c0_i32, %c0_i32_0, %c0_i32_1 : i32, i32, i32
  }
  func.func @transform_1(%arg0: i32) -> (i32, i32, i32) {
    %c0_i32 = arith.constant 0 : i32
    %c0_i32_0 = arith.constant 0 : i32
    %c0_i32_1 = arith.constant 0 : i32
    %c0_i32_2 = arith.constant 0 : i32
    return %c0_i32, %c0_i32_0, %c0_i32_1 : i32, i32, i32
  }
  func.func @transform_2(%arg0: i32) -> (i32, i32) {
    %c0_i32 = arith.constant 0 : i32
    %c0_i32_0 = arith.constant 0 : i32
    %c0_i32_1 = arith.constant 0 : i32
    return %c0_i32, %c0_i32_0 : i32, i32
  }
  func.func @transform_3(%arg0: i32) -> (i32, i32) {
    %c0_i32 = arith.constant 0 : i32
    %c0_i32_0 = arith.constant 0 : i32
    %c0_i32_1 = arith.constant 0 : i32
    return %c0_i32, %c0_i32_0 : i32, i32
  }
  func.func @transform_4(%arg0: i32) -> (i32, i32) {
    %c0_i32 = arith.constant 0 : i32
    %c0_i32_0 = arith.constant 0 : i32
    %c0_i32_1 = arith.constant 0 : i32
    return %c0_i32, %c0_i32_0 : i32, i32
  }
  func.func @transform_5(%arg0: i32) -> (i32, i32) {
    %c0_i32 = arith.constant 0 : i32
    %c0_i32_0 = arith.constant 0 : i32
    %c0_i32_1 = arith.constant 0 : i32
    return %c0_i32, %c0_i32_0 : i32, i32
  }
}

module attributes {stable_mosaic.version = 11 : i64} {
  func.func @_fused_layer_kernel(%arg0: i32, %arg1: memref<1x32x512xbf16, #tpu.memory_space<vmem>>, %arg2: memref<1x512x128xbf16, #tpu.memory_space<vmem>>, %arg3: memref<1x128xf32, #tpu.memory_space<vmem>>, %arg4: memref<1x128xf32, #tpu.memory_space<vmem>>, %arg5: memref<1x128xf32, #tpu.memory_space<vmem>>, %arg6: memref<32x128xf32, #tpu.memory_space<vmem>>) attributes {dimension_semantics = [#tpu.dimension_semantics<arbitrary>], iteration_bounds = array<i64: 1>, scalar_prefetch = 0 : i64, scratch_operands = 0 : i64, tpu.core_type = #tpu.core_type<tc>, window_params = [{pipeline_mode = #tpu.pipeline_mode<synchronous>, transform_indices = @transform_0, window_bounds = array<i64: 1, 32, 512>}, {pipeline_mode = #tpu.pipeline_mode<synchronous>, transform_indices = @transform_1, window_bounds = array<i64: 1, 512, 128>}, {pipeline_mode = #tpu.pipeline_mode<synchronous>, transform_indices = @transform_2, window_bounds = array<i64: 1, 128>}, {pipeline_mode = #tpu.pipeline_mode<synchronous>, transform_indices = @transform_3, window_bounds = array<i64: 1, 128>}, {pipeline_mode = #tpu.pipeline_mode<synchronous>, transform_indices = @transform_4, window_bounds = array<i64: 1, 128>}, {pipeline_mode = #tpu.pipeline_mode<synchronous>, transform_indices = @transform_5, window_bounds = array<i64: 32, 128>}]} {
    %c0 = arith.constant 0 : index
    %c0_0 = arith.constant 0 : index
    %c0_1 = arith.constant 0 : index
    %0 = vector.load %arg1[%c0, %c0_0, %c0_1] : memref<1x32x512xbf16, #tpu.memory_space<vmem>>, vector<1x32x512xbf16>
    %1 = vector.shape_cast %0 : vector<1x32x512xbf16> to vector<32x512xbf16>
    %c0_2 = arith.constant 0 : index
    %c0_3 = arith.constant 0 : index
    %c0_4 = arith.constant 0 : index
    %2 = vector.load %arg2[%c0_2, %c0_3, %c0_4] : memref<1x512x128xbf16, #tpu.memory_space<vmem>>, vector<1x512x128xbf16>
    %3 = vector.shape_cast %2 : vector<1x512x128xbf16> to vector<512x128xbf16>
    %cst = arith.constant dense<0.000000e+00> : vector<32x128xf32>
    %4 = tpu.matmul %1, %3, %cst {dimension_numbers = #tpu.dot_dimension_numbers<[1], [0], [0], [1], [0, 0, 1, 1], [], []>} : vector<32x512xbf16>, vector<512x128xbf16>, vector<32x128xf32> -> vector<32x128xf32>
    %c0_5 = arith.constant 0 : index
    %c0_6 = arith.constant 0 : index
    %5 = vector.load %arg3[%c0_5, %c0_6] : memref<1x128xf32, #tpu.memory_space<vmem>>, vector<1x128xf32>
    %6 = vector.broadcast %5 : vector<1x128xf32> to vector<32x128xf32>
    %7 = arith.addf %4, %6 : vector<32x128xf32>
    %cst_7 = arith.constant 0.000000e+00 : f32
    %8 = vector.broadcast %cst_7 : f32 to vector<32x128xf32>
    %9 = arith.maximumf %7, %8 : vector<32x128xf32>
    %cst_8 = arith.constant dense<0.000000e+00> : vector<128xf32>
    %10 = vector.multi_reduction <add>, %9, %cst_8 [0] : vector<32x128xf32> to vector<128xf32>
    %11 = vector.shape_cast %10 : vector<128xf32> to vector<1x128xf32>
    %cst_9 = arith.constant 3.200000e+01 : f32
    %12 = vector.broadcast %cst_9 : f32 to vector<1x128xf32>
    %13 = arith.divf %11, %12 : vector<1x128xf32>
    %14 = vector.broadcast %13 : vector<1x128xf32> to vector<32x128xf32>
    %15 = arith.subf %9, %14 : vector<32x128xf32>
    %16 = arith.mulf %15, %15 : vector<32x128xf32>
    %cst_10 = arith.constant dense<0.000000e+00> : vector<128xf32>
    %17 = vector.multi_reduction <add>, %16, %cst_10 [0] : vector<32x128xf32> to vector<128xf32>
    %18 = vector.shape_cast %17 : vector<128xf32> to vector<1x128xf32>
    %cst_11 = arith.constant 3.200000e+01 : f32
    %19 = vector.broadcast %cst_11 : f32 to vector<1x128xf32>
    %20 = arith.divf %18, %19 : vector<1x128xf32>
    %21 = vector.broadcast %13 : vector<1x128xf32> to vector<32x128xf32>
    %22 = arith.subf %9, %21 : vector<32x128xf32>
    %cst_12 = arith.constant 9.99999974E-6 : f32
    %23 = vector.broadcast %cst_12 : f32 to vector<1x128xf32>
    %24 = arith.addf %20, %23 : vector<1x128xf32>
    %25 = math.rsqrt %24 : vector<1x128xf32>
    %26 = vector.broadcast %25 : vector<1x128xf32> to vector<32x128xf32>
    %27 = arith.mulf %22, %26 : vector<32x128xf32>
    %c0_13 = arith.constant 0 : index
    %c0_14 = arith.constant 0 : index
    %28 = vector.load %arg4[%c0_13, %c0_14] : memref<1x128xf32, #tpu.memory_space<vmem>>, vector<1x128xf32>
    %29 = vector.broadcast %28 : vector<1x128xf32> to vector<32x128xf32>
    %30 = arith.mulf %27, %29 : vector<32x128xf32>
    %c0_15 = arith.constant 0 : index
    %c0_16 = arith.constant 0 : index
    %31 = vector.load %arg5[%c0_15, %c0_16] : memref<1x128xf32, #tpu.memory_space<vmem>>, vector<1x128xf32>
    %32 = vector.broadcast %31 : vector<1x128xf32> to vector<32x128xf32>
    %33 = arith.addf %30, %32 : vector<32x128xf32>
    %c0_17 = arith.constant 0 : index
    %c0_18 = arith.constant 0 : index
    %34 = vector.load %arg6[%c0_17, %c0_18] : memref<32x128xf32, #tpu.memory_space<vmem>>, vector<32x128xf32>
    tpu.vector_store %arg6[%c0_17, %c0_18], %33 {strides = array<i32>} : memref<32x128xf32, #tpu.memory_space<vmem>>, vector<32x128xf32>,
    return
  }
  func.func @transform_0(%arg0: i32) -> (i32, i32, i32) {
    %c0_i32 = arith.constant 0 : i32
    %c0_i32_0 = arith.constant 0 : i32
    %c0_i32_1 = arith.constant 0 : i32
    %c0_i32_2 = arith.constant 0 : i32
    return %c0_i32, %c0_i32_0, %c0_i32_1 : i32, i32, i32
  }
  func.func @transform_1(%arg0: i32) -> (i32, i32, i32) {
    %c0_i32 = arith.constant 0 : i32
    %c0_i32_0 = arith.constant 0 : i32
    %c0_i32_1 = arith.constant 0 : i32
    %c0_i32_2 = arith.constant 0 : i32
    return %c0_i32, %c0_i32_0, %c0_i32_1 : i32, i32, i32
  }
  func.func @transform_2(%arg0: i32) -> (i32, i32) {
    %c0_i32 = arith.constant 0 : i32
    %c0_i32_0 = arith.constant 0 : i32
    %c0_i32_1 = arith.constant 0 : i32
    return %c0_i32, %c0_i32_0 : i32, i32
  }
  func.func @transform_3(%arg0: i32) -> (i32, i32) {
    %c0_i32 = arith.constant 0 : i32
    %c0_i32_0 = arith.constant 0 : i32
    %c0_i32_1 = arith.constant 0 : i32
    return %c0_i32, %c0_i32_0 : i32, i32
  }
  func.func @transform_4(%arg0: i32) -> (i32, i32) {
    %c0_i32 = arith.constant 0 : i32
    %c0_i32_0 = arith.constant 0 : i32
    %c0_i32_1 = arith.constant 0 : i32
    return %c0_i32, %c0_i32_0 : i32, i32
  }
  func.func @transform_5(%arg0: i32) -> (i32, i32) {
    %c0_i32 = arith.constant 0 : i32
    %c0_i32_0 = arith.constant 0 : i32
    %c0_i32_1 = arith.constant 0 : i32
    return %c0_i32, %c0_i32_0 : i32, i32
  }
}

module attributes {stable_mosaic.version = 11 : i64} {
  func.func @_fused_layer_kernel(%arg0: i32, %arg1: memref<1x8x1024xbf16, #tpu.memory_space<vmem>>, %arg2: memref<1x1024x128xbf16, #tpu.memory_space<vmem>>, %arg3: memref<1x128xf32, #tpu.memory_space<vmem>>, %arg4: memref<1x128xf32, #tpu.memory_space<vmem>>, %arg5: memref<1x128xf32, #tpu.memory_space<vmem>>, %arg6: memref<8x128xf32, #tpu.memory_space<vmem>>) attributes {dimension_semantics = [#tpu.dimension_semantics<arbitrary>], iteration_bounds = array<i64: 1>, scalar_prefetch = 0 : i64, scratch_operands = 0 : i64, tpu.core_type = #tpu.core_type<tc>, window_params = [{pipeline_mode = #tpu.pipeline_mode<synchronous>, transform_indices = @transform_0, window_bounds = array<i64: 1, 8, 1024>}, {pipeline_mode = #tpu.pipeline_mode<synchronous>, transform_indices = @transform_1, window_bounds = array<i64: 1, 1024, 128>}, {pipeline_mode = #tpu.pipeline_mode<synchronous>, transform_indices = @transform_2, window_bounds = array<i64: 1, 128>}, {pipeline_mode = #tpu.pipeline_mode<synchronous>, transform_indices = @transform_3, window_bounds = array<i64: 1, 128>}, {pipeline_mode = #tpu.pipeline_mode<synchronous>, transform_indices = @transform_4, window_bounds = array<i64: 1, 128>}, {pipeline_mode = #tpu.pipeline_mode<synchronous>, transform_indices = @transform_5, window_bounds = array<i64: 8, 128>}]} {
    %c0 = arith.constant 0 : index
    %c0_0 = arith.constant 0 : index
    %c0_1 = arith.constant 0 : index
    %0 = vector.load %arg1[%c0, %c0_0, %c0_1] : memref<1x8x1024xbf16, #tpu.memory_space<vmem>>, vector<1x8x1024xbf16>
    %1 = vector.shape_cast %0 : vector<1x8x1024xbf16> to vector<8x1024xbf16>
    %c0_2 = arith.constant 0 : index
    %c0_3 = arith.constant 0 : index
    %c0_4 = arith.constant 0 : index
    %2 = vector.load %arg2[%c0_2, %c0_3, %c0_4] : memref<1x1024x128xbf16, #tpu.memory_space<vmem>>, vector<1x1024x128xbf16>
    %3 = vector.shape_cast %2 : vector<1x1024x128xbf16> to vector<1024x128xbf16>
    %cst = arith.constant dense<0.000000e+00> : vector<8x128xf32>
    %4 = tpu.matmul %1, %3, %cst {dimension_numbers = #tpu.dot_dimension_numbers<[1], [0], [0], [1], [0, 0, 1, 1], [], []>} : vector<8x1024xbf16>, vector<1024x128xbf16>, vector<8x128xf32> -> vector<8x128xf32>
    %c0_5 = arith.constant 0 : index
    %c0_6 = arith.constant 0 : index
    %5 = vector.load %arg3[%c0_5, %c0_6] : memref<1x128xf32, #tpu.memory_space<vmem>>, vector<1x128xf32>
    %6 = vector.broadcast %5 : vector<1x128xf32> to vector<8x128xf32>
    %7 = arith.addf %4, %6 : vector<8x128xf32>
    %cst_7 = arith.constant 0.000000e+00 : f32
    %8 = vector.broadcast %cst_7 : f32 to vector<8x128xf32>
    %9 = arith.maximumf %7, %8 : vector<8x128xf32>
    %cst_8 = arith.constant dense<0.000000e+00> : vector<128xf32>
    %10 = vector.multi_reduction <add>, %9, %cst_8 [0] : vector<8x128xf32> to vector<128xf32>
    %11 = vector.shape_cast %10 : vector<128xf32> to vector<1x128xf32>
    %cst_9 = arith.constant 8.000000e+00 : f32
    %12 = vector.broadcast %cst_9 : f32 to vector<1x128xf32>
    %13 = arith.divf %11, %12 : vector<1x128xf32>
    %14 = vector.broadcast %13 : vector<1x128xf32> to vector<8x128xf32>
    %15 = arith.subf %9, %14 : vector<8x128xf32>
    %16 = arith.mulf %15, %15 : vector<8x128xf32>
    %cst_10 = arith.constant dense<0.000000e+00> : vector<128xf32>
    %17 = vector.multi_reduction <add>, %16, %cst_10 [0] : vector<8x128xf32> to vector<128xf32>
    %18 = vector.shape_cast %17 : vector<128xf32> to vector<1x128xf32>
    %cst_11 = arith.constant 8.000000e+00 : f32
    %19 = vector.broadcast %cst_11 : f32 to vector<1x128xf32>
    %20 = arith.divf %18, %19 : vector<1x128xf32>
    %21 = vector.broadcast %13 : vector<1x128xf32> to vector<8x128xf32>
    %22 = arith.subf %9, %21 : vector<8x128xf32>
    %cst_12 = arith.constant 9.99999974E-6 : f32
    %23 = vector.broadcast %cst_12 : f32 to vector<1x128xf32>
    %24 = arith.addf %20, %23 : vector<1x128xf32>
    %25 = math.rsqrt %24 : vector<1x128xf32>
    %26 = vector.broadcast %25 : vector<1x128xf32> to vector<8x128xf32>
    %27 = arith.mulf %22, %26 : vector<8x128xf32>
    %c0_13 = arith.constant 0 : index
    %c0_14 = arith.constant 0 : index
    %28 = vector.load %arg4[%c0_13, %c0_14] : memref<1x128xf32, #tpu.memory_space<vmem>>, vector<1x128xf32>
    %29 = vector.broadcast %28 : vector<1x128xf32> to vector<8x128xf32>
    %30 = arith.mulf %27, %29 : vector<8x128xf32>
    %c0_15 = arith.constant 0 : index
    %c0_16 = arith.constant 0 : index
    %31 = vector.load %arg5[%c0_15, %c0_16] : memref<1x128xf32, #tpu.memory_space<vmem>>, vector<1x128xf32>
    %32 = vector.broadcast %31 : vector<1x128xf32> to vector<8x128xf32>
    %33 = arith.addf %30, %32 : vector<8x128xf32>
    %34 = arith.negf %33 : vector<8x128xf32>
    %35 = math.exp %34 : vector<8x128xf32>
    %cst_17 = arith.constant 1.000000e+00 : f32
    %36 = vector.broadcast %cst_17 : f32 to vector<8x128xf32>
    %37 = arith.addf %36, %35 : vector<8x128xf32>
    %38 = arith.divf %36, %37 : vector<8x128xf32>
    %39 = math.roundeven %38 : vector<8x128xf32>
    %c0_18 = arith.constant 0 : index
    %c0_19 = arith.constant 0 : index
    %40 = vector.load %arg6[%c0_18, %c0_19] : memref<8x128xf32, #tpu.memory_space<vmem>>, vector<8x128xf32>
    tpu.vector_store %arg6[%c0_18, %c0_19], %39 {strides = array<i32>} : memref<8x128xf32, #tpu.memory_space<vmem>>, vector<8x128xf32>,
    return
  }
  func.func @transform_0(%arg0: i32) -> (i32, i32, i32) {
    %c0_i32 = arith.constant 0 : i32
    %c0_i32_0 = arith.constant 0 : i32
    %c0_i32_1 = arith.constant 0 : i32
    %c0_i32_2 = arith.constant 0 : i32
    return %c0_i32, %c0_i32_0, %c0_i32_1 : i32, i32, i32
  }
  func.func @transform_1(%arg0: i32) -> (i32, i32, i32) {
    %c0_i32 = arith.constant 0 : i32
    %c0_i32_0 = arith.constant 0 : i32
    %c0_i32_1 = arith.constant 0 : i32
    %c0_i32_2 = arith.constant 0 : i32
    return %c0_i32, %c0_i32_0, %c0_i32_1 : i32, i32, i32
  }
  func.func @transform_2(%arg0: i32) -> (i32, i32) {
    %c0_i32 = arith.constant 0 : i32
    %c0_i32_0 = arith.constant 0 : i32
    %c0_i32_1 = arith.constant 0 : i32
    return %c0_i32, %c0_i32_0 : i32, i32
  }
  func.func @transform_3(%arg0: i32) -> (i32, i32) {
    %c0_i32 = arith.constant 0 : i32
    %c0_i32_0 = arith.constant 0 : i32
    %c0_i32_1 = arith.constant 0 : i32
    return %c0_i32, %c0_i32_0 : i32, i32
  }
  func.func @transform_4(%arg0: i32) -> (i32, i32) {
    %c0_i32 = arith.constant 0 : i32
    %c0_i32_0 = arith.constant 0 : i32
    %c0_i32_1 = arith.constant 0 : i32
    return %c0_i32, %c0_i32_0 : i32, i32
  }
  func.func @transform_5(%arg0: i32) -> (i32, i32) {
    %c0_i32 = arith.constant 0 : i32
    %c0_i32_0 = arith.constant 0 : i32
    %c0_i32_1 = arith.constant 0 : i32
    return %c0_i32, %c0_i32_0 : i32, i32
  }
}

module attributes {stable_mosaic.version = 11 : i64} {
  func.func @_fused_layer_kernel(%arg0: i32, %arg1: memref<4x8x256xbf16, #tpu.memory_space<vmem>>, %arg2: memref<4x256x128xbf16, #tpu.memory_space<vmem>>, %arg3: memref<1x128xf32, #tpu.memory_space<vmem>>, %arg4: memref<1x128xf32, #tpu.memory_space<vmem>>, %arg5: memref<1x128xf32, #tpu.memory_space<vmem>>, %arg6: memref<32x128xf32, #tpu.memory_space<vmem>>) attributes {dimension_semantics = [#tpu.dimension_semantics<arbitrary>], iteration_bounds = array<i64: 1>, scalar_prefetch = 0 : i64, scratch_operands = 0 : i64, tpu.core_type = #tpu.core_type<tc>, window_params = [{pipeline_mode = #tpu.pipeline_mode<synchronous>, transform_indices = @transform_0, window_bounds = array<i64: 4, 8, 256>}, {pipeline_mode = #tpu.pipeline_mode<synchronous>, transform_indices = @transform_1, window_bounds = array<i64: 4, 256, 128>}, {pipeline_mode = #tpu.pipeline_mode<synchronous>, transform_indices = @transform_2, window_bounds = array<i64: 1, 128>}, {pipeline_mode = #tpu.pipeline_mode<synchronous>, transform_indices = @transform_3, window_bounds = array<i64: 1, 128>}, {pipeline_mode = #tpu.pipeline_mode<synchronous>, transform_indices = @transform_4, window_bounds = array<i64: 1, 128>}, {pipeline_mode = #tpu.pipeline_mode<synchronous>, transform_indices = @transform_5, window_bounds = array<i64: 32, 128>}]} {
    %c0 = arith.constant 0 : index
    %c0_0 = arith.constant 0 : index
    %c0_1 = arith.constant 0 : index
    %0 = vector.load %arg1[%c0, %c0_0, %c0_1] : memref<4x8x256xbf16, #tpu.memory_space<vmem>>, vector<1x8x256xbf16>
    %1 = vector.shape_cast %0 : vector<1x8x256xbf16> to vector<8x256xbf16>
    %c0_2 = arith.constant 0 : index
    %c0_3 = arith.constant 0 : index
    %c0_4 = arith.constant 0 : index
    %2 = vector.load %arg2[%c0_2, %c0_3, %c0_4] : memref<4x256x128xbf16, #tpu.memory_space<vmem>>, vector<1x256x128xbf16>
    %3 = vector.shape_cast %2 : vector<1x256x128xbf16> to vector<256x128xbf16>
    %cst = arith.constant dense<0.000000e+00> : vector<8x128xf32>
    %4 = tpu.matmul %1, %3, %cst {dimension_numbers = #tpu.dot_dimension_numbers<[1], [0], [0], [1], [0, 0, 1, 1], [], []>} : vector<8x256xbf16>, vector<256x128xbf16>, vector<8x128xf32> -> vector<8x128xf32>
    %c1 = arith.constant 1 : index
    %c0_5 = arith.constant 0 : index
    %c0_6 = arith.constant 0 : index
    %5 = vector.load %arg1[%c1, %c0_5, %c0_6] : memref<4x8x256xbf16, #tpu.memory_space<vmem>>, vector<1x8x256xbf16>
    %6 = vector.shape_cast %5 : vector<1x8x256xbf16> to vector<8x256xbf16>
    %c1_7 = arith.constant 1 : index
    %c0_8 = arith.constant 0 : index
    %c0_9 = arith.constant 0 : index
    %7 = vector.load %arg2[%c1_7, %c0_8, %c0_9] : memref<4x256x128xbf16, #tpu.memory_space<vmem>>, vector<1x256x128xbf16>
    %8 = vector.shape_cast %7 : vector<1x256x128xbf16> to vector<256x128xbf16>
    %cst_10 = arith.constant dense<0.000000e+00> : vector<8x128xf32>
    %9 = tpu.matmul %6, %8, %cst_10 {dimension_numbers = #tpu.dot_dimension_numbers<[1], [0], [0], [1], [0, 0, 1, 1], [], []>} : vector<8x256xbf16>, vector<256x128xbf16>, vector<8x128xf32> -> vector<8x128xf32>
    %c2 = arith.constant 2 : index
    %c0_11 = arith.constant 0 : index
    %c0_12 = arith.constant 0 : index
    %10 = vector.load %arg1[%c2, %c0_11, %c0_12] : memref<4x8x256xbf16, #tpu.memory_space<vmem>>, vector<1x8x256xbf16>
    %11 = vector.shape_cast %10 : vector<1x8x256xbf16> to vector<8x256xbf16>
    %c2_13 = arith.constant 2 : index
    %c0_14 = arith.constant 0 : index
    %c0_15 = arith.constant 0 : index
    %12 = vector.load %arg2[%c2_13, %c0_14, %c0_15] : memref<4x256x128xbf16, #tpu.memory_space<vmem>>, vector<1x256x128xbf16>
    %13 = vector.shape_cast %12 : vector<1x256x128xbf16> to vector<256x128xbf16>
    %cst_16 = arith.constant dense<0.000000e+00> : vector<8x128xf32>
    %14 = tpu.matmul %11, %13, %cst_16 {dimension_numbers = #tpu.dot_dimension_numbers<[1], [0], [0], [1], [0, 0, 1, 1], [], []>} : vector<8x256xbf16>, vector<256x128xbf16>, vector<8x128xf32> -> vector<8x128xf32>
    %c3 = arith.constant 3 : index
    %c0_17 = arith.constant 0 : index
    %c0_18 = arith.constant 0 : index
    %15 = vector.load %arg1[%c3, %c0_17, %c0_18] : memref<4x8x256xbf16, #tpu.memory_space<vmem>>, vector<1x8x256xbf16>
    %16 = vector.shape_cast %15 : vector<1x8x256xbf16> to vector<8x256xbf16>
    %c3_19 = arith.constant 3 : index
    %c0_20 = arith.constant 0 : index
    %c0_21 = arith.constant 0 : index
    %17 = vector.load %arg2[%c3_19, %c0_20, %c0_21] : memref<4x256x128xbf16, #tpu.memory_space<vmem>>, vector<1x256x128xbf16>
    %18 = vector.shape_cast %17 : vector<1x256x128xbf16> to vector<256x128xbf16>
    %cst_22 = arith.constant dense<0.000000e+00> : vector<8x128xf32>
    %19 = tpu.matmul %16, %18, %cst_22 {dimension_numbers = #tpu.dot_dimension_numbers<[1], [0], [0], [1], [0, 0, 1, 1], [], []>} : vector<8x256xbf16>, vector<256x128xbf16>, vector<8x128xf32> -> vector<8x128xf32>
    %20 = tpu.concatenate %4, %9, %14, %19 in 0 : vector<8x128xf32>, vector<8x128xf32>, vector<8x128xf32>, vector<8x128xf32> -> vector<32x128xf32>
    %c0_23 = arith.constant 0 : index
    %c0_24 = arith.constant 0 : index
    %21 = vector.load %arg3[%c0_23, %c0_24] : memref<1x128xf32, #tpu.memory_space<vmem>>, vector<1x128xf32>
    %22 = vector.broadcast %21 : vector<1x128xf32> to vector<32x128xf32>
    %23 = arith.addf %20, %22 : vector<32x128xf32>
    %cst_25 = arith.constant 0.000000e+00 : f32
    %24 = vector.broadcast %cst_25 : f32 to vector<32x128xf32>
    %25 = arith.maximumf %23, %24 : vector<32x128xf32>
    %cst_26 = arith.constant dense<0.000000e+00> : vector<128xf32>
    %26 = vector.multi_reduction <add>, %25, %cst_26 [0] : vector<32x128xf32> to vector<128xf32>
    %27 = vector.shape_cast %26 : vector<128xf32> to vector<1x128xf32>
    %cst_27 = arith.constant 3.200000e+01 : f32
    %28 = vector.broadcast %cst_27 : f32 to vector<1x128xf32>
    %29 = arith.divf %27, %28 : vector<1x128xf32>
    %30 = vector.broadcast %29 : vector<1x128xf32> to vector<32x128xf32>
    %31 = arith.subf %25, %30 : vector<32x128xf32>
    %32 = arith.mulf %31, %31 : vector<32x128xf32>
    %cst_28 = arith.constant dense<0.000000e+00> : vector<128xf32>
    %33 = vector.multi_reduction <add>, %32, %cst_28 [0] : vector<32x128xf32> to vector<128xf32>
    %34 = vector.shape_cast %33 : vector<128xf32> to vector<1x128xf32>
    %cst_29 = arith.constant 3.200000e+01 : f32
    %35 = vector.broadcast %cst_29 : f32 to vector<1x128xf32>
    %36 = arith.divf %34, %35 : vector<1x128xf32>
    %37 = vector.broadcast %29 : vector<1x128xf32> to vector<32x128xf32>
    %38 = arith.subf %25, %37 : vector<32x128xf32>
    %cst_30 = arith.constant 9.99999974E-6 : f32
    %39 = vector.broadcast %cst_30 : f32 to vector<1x128xf32>
    %40 = arith.addf %36, %39 : vector<1x128xf32>
    %41 = math.rsqrt %40 : vector<1x128xf32>
    %42 = vector.broadcast %41 : vector<1x128xf32> to vector<32x128xf32>
    %43 = arith.mulf %38, %42 : vector<32x128xf32>
    %c0_31 = arith.constant 0 : index
    %c0_32 = arith.constant 0 : index
    %44 = vector.load %arg4[%c0_31, %c0_32] : memref<1x128xf32, #tpu.memory_space<vmem>>, vector<1x128xf32>
    %45 = vector.broadcast %44 : vector<1x128xf32> to vector<32x128xf32>
    %46 = arith.mulf %43, %45 : vector<32x128xf32>
    %c0_33 = arith.constant 0 : index
    %c0_34 = arith.constant 0 : index
    %47 = vector.load %arg5[%c0_33, %c0_34] : memref<1x128xf32, #tpu.memory_space<vmem>>, vector<1x128xf32>
    %48 = vector.broadcast %47 : vector<1x128xf32> to vector<32x128xf32>
    %49 = arith.addf %46, %48 : vector<32x128xf32>
    %c0_35 = arith.constant 0 : index
    %c0_36 = arith.constant 0 : index
    %50 = vector.load %arg6[%c0_35, %c0_36] : memref<32x128xf32, #tpu.memory_space<vmem>>, vector<32x128xf32>
    tpu.vector_store %arg6[%c0_35, %c0_36], %49 {strides = array<i32>} : memref<32x128xf32, #tpu.memory_space<vmem>>, vector<32x128xf32>,
    return
  }
  func.func @transform_0(%arg0: i32) -> (i32, i32, i32) {
    %c0_i32 = arith.constant 0 : i32
    %c0_i32_0 = arith.constant 0 : i32
    %c0_i32_1 = arith.constant 0 : i32
    %c0_i32_2 = arith.constant 0 : i32
    return %c0_i32, %c0_i32_0, %c0_i32_1 : i32, i32, i32
  }
  func.func @transform_1(%arg0: i32) -> (i32, i32, i32) {
    %c0_i32 = arith.constant 0 : i32
    %c0_i32_0 = arith.constant 0 : i32
    %c0_i32_1 = arith.constant 0 : i32
    %c0_i32_2 = arith.constant 0 : i32
    return %c0_i32, %c0_i32_0, %c0_i32_1 : i32, i32, i32
  }
  func.func @transform_2(%arg0: i32) -> (i32, i32) {
    %c0_i32 = arith.constant 0 : i32
    %c0_i32_0 = arith.constant 0 : i32
    %c0_i32_1 = arith.constant 0 : i32
    return %c0_i32, %c0_i32_0 : i32, i32
  }
  func.func @transform_3(%arg0: i32) -> (i32, i32) {
    %c0_i32 = arith.constant 0 : i32
    %c0_i32_0 = arith.constant 0 : i32
    %c0_i32_1 = arith.constant 0 : i32
    return %c0_i32, %c0_i32_0 : i32, i32
  }
  func.func @transform_4(%arg0: i32) -> (i32, i32) {
    %c0_i32 = arith.constant 0 : i32
    %c0_i32_0 = arith.constant 0 : i32
    %c0_i32_1 = arith.constant 0 : i32
    return %c0_i32, %c0_i32_0 : i32, i32
  }
  func.func @transform_5(%arg0: i32) -> (i32, i32) {
    %c0_i32 = arith.constant 0 : i32
    %c0_i32_0 = arith.constant 0 : i32
    %c0_i32_1 = arith.constant 0 : i32
    return %c0_i32, %c0_i32_0 : i32, i32
  }
}

module attributes {stable_mosaic.version = 11 : i64} {
  func.func @_fused_layer_kernel(%arg0: i32, %arg1: memref<4x32x256xbf16, #tpu.memory_space<vmem>>, %arg2: memref<4x256x128xbf16, #tpu.memory_space<vmem>>, %arg3: memref<1x128xf32, #tpu.memory_space<vmem>>, %arg4: memref<1x128xf32, #tpu.memory_space<vmem>>, %arg5: memref<1x128xf32, #tpu.memory_space<vmem>>, %arg6: memref<128x128xf32, #tpu.memory_space<vmem>>) attributes {dimension_semantics = [#tpu.dimension_semantics<arbitrary>], iteration_bounds = array<i64: 1>, scalar_prefetch = 0 : i64, scratch_operands = 0 : i64, tpu.core_type = #tpu.core_type<tc>, window_params = [{pipeline_mode = #tpu.pipeline_mode<synchronous>, transform_indices = @transform_0, window_bounds = array<i64: 4, 32, 256>}, {pipeline_mode = #tpu.pipeline_mode<synchronous>, transform_indices = @transform_1, window_bounds = array<i64: 4, 256, 128>}, {pipeline_mode = #tpu.pipeline_mode<synchronous>, transform_indices = @transform_2, window_bounds = array<i64: 1, 128>}, {pipeline_mode = #tpu.pipeline_mode<synchronous>, transform_indices = @transform_3, window_bounds = array<i64: 1, 128>}, {pipeline_mode = #tpu.pipeline_mode<synchronous>, transform_indices = @transform_4, window_bounds = array<i64: 1, 128>}, {pipeline_mode = #tpu.pipeline_mode<synchronous>, transform_indices = @transform_5, window_bounds = array<i64: 128, 128>}]} {
    %c0 = arith.constant 0 : index
    %c0_0 = arith.constant 0 : index
    %c0_1 = arith.constant 0 : index
    %0 = vector.load %arg1[%c0, %c0_0, %c0_1] : memref<4x32x256xbf16, #tpu.memory_space<vmem>>, vector<1x32x256xbf16>
    %1 = vector.shape_cast %0 : vector<1x32x256xbf16> to vector<32x256xbf16>
    %c0_2 = arith.constant 0 : index
    %c0_3 = arith.constant 0 : index
    %c0_4 = arith.constant 0 : index
    %2 = vector.load %arg2[%c0_2, %c0_3, %c0_4] : memref<4x256x128xbf16, #tpu.memory_space<vmem>>, vector<1x256x128xbf16>
    %3 = vector.shape_cast %2 : vector<1x256x128xbf16> to vector<256x128xbf16>
    %cst = arith.constant dense<0.000000e+00> : vector<32x128xf32>
    %4 = tpu.matmul %1, %3, %cst {dimension_numbers = #tpu.dot_dimension_numbers<[1], [0], [0], [1], [0, 0, 1, 1], [], []>} : vector<32x256xbf16>, vector<256x128xbf16>, vector<32x128xf32> -> vector<32x128xf32>
    %c1 = arith.constant 1 : index
    %c0_5 = arith.constant 0 : index
    %c0_6 = arith.constant 0 : index
    %5 = vector.load %arg1[%c1, %c0_5, %c0_6] : memref<4x32x256xbf16, #tpu.memory_space<vmem>>, vector<1x32x256xbf16>
    %6 = vector.shape_cast %5 : vector<1x32x256xbf16> to vector<32x256xbf16>
    %c1_7 = arith.constant 1 : index
    %c0_8 = arith.constant 0 : index
    %c0_9 = arith.constant 0 : index
    %7 = vector.load %arg2[%c1_7, %c0_8, %c0_9] : memref<4x256x128xbf16, #tpu.memory_space<vmem>>, vector<1x256x128xbf16>
    %8 = vector.shape_cast %7 : vector<1x256x128xbf16> to vector<256x128xbf16>
    %cst_10 = arith.constant dense<0.000000e+00> : vector<32x128xf32>
    %9 = tpu.matmul %6, %8, %cst_10 {dimension_numbers = #tpu.dot_dimension_numbers<[1], [0], [0], [1], [0, 0, 1, 1], [], []>} : vector<32x256xbf16>, vector<256x128xbf16>, vector<32x128xf32> -> vector<32x128xf32>
    %c2 = arith.constant 2 : index
    %c0_11 = arith.constant 0 : index
    %c0_12 = arith.constant 0 : index
    %10 = vector.load %arg1[%c2, %c0_11, %c0_12] : memref<4x32x256xbf16, #tpu.memory_space<vmem>>, vector<1x32x256xbf16>
    %11 = vector.shape_cast %10 : vector<1x32x256xbf16> to vector<32x256xbf16>
    %c2_13 = arith.constant 2 : index
    %c0_14 = arith.constant 0 : index
    %c0_15 = arith.constant 0 : index
    %12 = vector.load %arg2[%c2_13, %c0_14, %c0_15] : memref<4x256x128xbf16, #tpu.memory_space<vmem>>, vector<1x256x128xbf16>
    %13 = vector.shape_cast %12 : vector<1x256x128xbf16> to vector<256x128xbf16>
    %cst_16 = arith.constant dense<0.000000e+00> : vector<32x128xf32>
    %14 = tpu.matmul %11, %13, %cst_16 {dimension_numbers = #tpu.dot_dimension_numbers<[1], [0], [0], [1], [0, 0, 1, 1], [], []>} : vector<32x256xbf16>, vector<256x128xbf16>, vector<32x128xf32> -> vector<32x128xf32>
    %c3 = arith.constant 3 : index
    %c0_17 = arith.constant 0 : index
    %c0_18 = arith.constant 0 : index
    %15 = vector.load %arg1[%c3, %c0_17, %c0_18] : memref<4x32x256xbf16, #tpu.memory_space<vmem>>, vector<1x32x256xbf16>
    %16 = vector.shape_cast %15 : vector<1x32x256xbf16> to vector<32x256xbf16>
    %c3_19 = arith.constant 3 : index
    %c0_20 = arith.constant 0 : index
    %c0_21 = arith.constant 0 : index
    %17 = vector.load %arg2[%c3_19, %c0_20, %c0_21] : memref<4x256x128xbf16, #tpu.memory_space<vmem>>, vector<1x256x128xbf16>
    %18 = vector.shape_cast %17 : vector<1x256x128xbf16> to vector<256x128xbf16>
    %cst_22 = arith.constant dense<0.000000e+00> : vector<32x128xf32>
    %19 = tpu.matmul %16, %18, %cst_22 {dimension_numbers = #tpu.dot_dimension_numbers<[1], [0], [0], [1], [0, 0, 1, 1], [], []>} : vector<32x256xbf16>, vector<256x128xbf16>, vector<32x128xf32> -> vector<32x128xf32>
    %20 = tpu.concatenate %4, %9, %14, %19 in 0 : vector<32x128xf32>, vector<32x128xf32>, vector<32x128xf32>, vector<32x128xf32> -> vector<128x128xf32>
    %c0_23 = arith.constant 0 : index
    %c0_24 = arith.constant 0 : index
    %21 = vector.load %arg3[%c0_23, %c0_24] : memref<1x128xf32, #tpu.memory_space<vmem>>, vector<1x128xf32>
    %22 = vector.broadcast %21 : vector<1x128xf32> to vector<128x128xf32>
    %23 = arith.addf %20, %22 : vector<128x128xf32>
    %cst_25 = arith.constant 0.000000e+00 : f32
    %24 = vector.broadcast %cst_25 : f32 to vector<128x128xf32>
    %25 = arith.maximumf %23, %24 : vector<128x128xf32>
    %cst_26 = arith.constant dense<0.000000e+00> : vector<128xf32>
    %26 = vector.multi_reduction <add>, %25, %cst_26 [0] : vector<128x128xf32> to vector<128xf32>
    %27 = vector.shape_cast %26 : vector<128xf32> to vector<1x128xf32>
    %cst_27 = arith.constant 1.280000e+02 : f32
    %28 = vector.broadcast %cst_27 : f32 to vector<1x128xf32>
    %29 = arith.divf %27, %28 : vector<1x128xf32>
    %30 = vector.broadcast %29 : vector<1x128xf32> to vector<128x128xf32>
    %31 = arith.subf %25, %30 : vector<128x128xf32>
    %32 = arith.mulf %31, %31 : vector<128x128xf32>
    %cst_28 = arith.constant dense<0.000000e+00> : vector<128xf32>
    %33 = vector.multi_reduction <add>, %32, %cst_28 [0] : vector<128x128xf32> to vector<128xf32>
    %34 = vector.shape_cast %33 : vector<128xf32> to vector<1x128xf32>
    %cst_29 = arith.constant 1.280000e+02 : f32
    %35 = vector.broadcast %cst_29 : f32 to vector<1x128xf32>
    %36 = arith.divf %34, %35 : vector<1x128xf32>
    %37 = vector.broadcast %29 : vector<1x128xf32> to vector<128x128xf32>
    %38 = arith.subf %25, %37 : vector<128x128xf32>
    %cst_30 = arith.constant 9.99999974E-6 : f32
    %39 = vector.broadcast %cst_30 : f32 to vector<1x128xf32>
    %40 = arith.addf %36, %39 : vector<1x128xf32>
    %41 = math.rsqrt %40 : vector<1x128xf32>
    %42 = vector.broadcast %41 : vector<1x128xf32> to vector<128x128xf32>
    %43 = arith.mulf %38, %42 : vector<128x128xf32>
    %c0_31 = arith.constant 0 : index
    %c0_32 = arith.constant 0 : index
    %44 = vector.load %arg4[%c0_31, %c0_32] : memref<1x128xf32, #tpu.memory_space<vmem>>, vector<1x128xf32>
    %45 = vector.broadcast %44 : vector<1x128xf32> to vector<128x128xf32>
    %46 = arith.mulf %43, %45 : vector<128x128xf32>
    %c0_33 = arith.constant 0 : index
    %c0_34 = arith.constant 0 : index
    %47 = vector.load %arg5[%c0_33, %c0_34] : memref<1x128xf32, #tpu.memory_space<vmem>>, vector<1x128xf32>
    %48 = vector.broadcast %47 : vector<1x128xf32> to vector<128x128xf32>
    %49 = arith.addf %46, %48 : vector<128x128xf32>
    %c0_35 = arith.constant 0 : index
    %c0_36 = arith.constant 0 : index
    %50 = vector.load %arg6[%c0_35, %c0_36] : memref<128x128xf32, #tpu.memory_space<vmem>>, vector<128x128xf32>
    tpu.vector_store %arg6[%c0_35, %c0_36], %49 {strides = array<i32>} : memref<128x128xf32, #tpu.memory_space<vmem>>, vector<128x128xf32>,
    return
  }
  func.func @transform_0(%arg0: i32) -> (i32, i32, i32) {
    %c0_i32 = arith.constant 0 : i32
    %c0_i32_0 = arith.constant 0 : i32
    %c0_i32_1 = arith.constant 0 : i32
    %c0_i32_2 = arith.constant 0 : i32
    return %c0_i32, %c0_i32_0, %c0_i32_1 : i32, i32, i32
  }
  func.func @transform_1(%arg0: i32) -> (i32, i32, i32) {
    %c0_i32 = arith.constant 0 : i32
    %c0_i32_0 = arith.constant 0 : i32
    %c0_i32_1 = arith.constant 0 : i32
    %c0_i32_2 = arith.constant 0 : i32
    return %c0_i32, %c0_i32_0, %c0_i32_1 : i32, i32, i32
  }
  func.func @transform_2(%arg0: i32) -> (i32, i32) {
    %c0_i32 = arith.constant 0 : i32
    %c0_i32_0 = arith.constant 0 : i32
    %c0_i32_1 = arith.constant 0 : i32
    return %c0_i32, %c0_i32_0 : i32, i32
  }
  func.func @transform_3(%arg0: i32) -> (i32, i32) {
    %c0_i32 = arith.constant 0 : i32
    %c0_i32_0 = arith.constant 0 : i32
    %c0_i32_1 = arith.constant 0 : i32
    return %c0_i32, %c0_i32_0 : i32, i32
  }
  func.func @transform_4(%arg0: i32) -> (i32, i32) {
    %c0_i32 = arith.constant 0 : i32
    %c0_i32_0 = arith.constant 0 : i32
    %c0_i32_1 = arith.constant 0 : i32
    return %c0_i32, %c0_i32_0 : i32, i32
  }
  func.func @transform_5(%arg0: i32) -> (i32, i32) {
    %c0_i32 = arith.constant 0 : i32
    %c0_i32_0 = arith.constant 0 : i32
    %c0_i32_1 = arith.constant 0 : i32
    return %c0_i32, %c0_i32_0 : i32, i32
  }
}

module attributes {stable_mosaic.version = 11 : i64} {
  func.func @_fused_layer_kernel(%arg0: i32, %arg1: memref<4x128x128xbf16, #tpu.memory_space<vmem>>, %arg2: memref<4x128x128xbf16, #tpu.memory_space<vmem>>, %arg3: memref<1x128xf32, #tpu.memory_space<vmem>>, %arg4: memref<1x128xf32, #tpu.memory_space<vmem>>, %arg5: memref<1x128xf32, #tpu.memory_space<vmem>>, %arg6: memref<512x128xf32, #tpu.memory_space<vmem>>) attributes {dimension_semantics = [#tpu.dimension_semantics<arbitrary>], iteration_bounds = array<i64: 1>, scalar_prefetch = 0 : i64, scratch_operands = 0 : i64, tpu.core_type = #tpu.core_type<tc>, window_params = [{pipeline_mode = #tpu.pipeline_mode<synchronous>, transform_indices = @transform_0, window_bounds = array<i64: 4, 128, 128>}, {pipeline_mode = #tpu.pipeline_mode<synchronous>, transform_indices = @transform_1, window_bounds = array<i64: 4, 128, 128>}, {pipeline_mode = #tpu.pipeline_mode<synchronous>, transform_indices = @transform_2, window_bounds = array<i64: 1, 128>}, {pipeline_mode = #tpu.pipeline_mode<synchronous>, transform_indices = @transform_3, window_bounds = array<i64: 1, 128>}, {pipeline_mode = #tpu.pipeline_mode<synchronous>, transform_indices = @transform_4, window_bounds = array<i64: 1, 128>}, {pipeline_mode = #tpu.pipeline_mode<synchronous>, transform_indices = @transform_5, window_bounds = array<i64: 512, 128>}]} {
    %c0 = arith.constant 0 : index
    %c0_0 = arith.constant 0 : index
    %c0_1 = arith.constant 0 : index
    %0 = vector.load %arg1[%c0, %c0_0, %c0_1] : memref<4x128x128xbf16, #tpu.memory_space<vmem>>, vector<1x128x128xbf16>
    %1 = vector.shape_cast %0 : vector<1x128x128xbf16> to vector<128x128xbf16>
    %c0_2 = arith.constant 0 : index
    %c0_3 = arith.constant 0 : index
    %c0_4 = arith.constant 0 : index
    %2 = vector.load %arg2[%c0_2, %c0_3, %c0_4] : memref<4x128x128xbf16, #tpu.memory_space<vmem>>, vector<1x128x128xbf16>
    %3 = vector.shape_cast %2 : vector<1x128x128xbf16> to vector<128x128xbf16>
    %cst = arith.constant dense<0.000000e+00> : vector<128x128xf32>
    %4 = tpu.matmul %1, %3, %cst {dimension_numbers = #tpu.dot_dimension_numbers<[1], [0], [0], [1], [0, 0, 1, 1], [], []>} : vector<128x128xbf16>, vector<128x128xbf16>, vector<128x128xf32> -> vector<128x128xf32>
    %c1 = arith.constant 1 : index
    %c0_5 = arith.constant 0 : index
    %c0_6 = arith.constant 0 : index
    %5 = vector.load %arg1[%c1, %c0_5, %c0_6] : memref<4x128x128xbf16, #tpu.memory_space<vmem>>, vector<1x128x128xbf16>
    %6 = vector.shape_cast %5 : vector<1x128x128xbf16> to vector<128x128xbf16>
    %c1_7 = arith.constant 1 : index
    %c0_8 = arith.constant 0 : index
    %c0_9 = arith.constant 0 : index
    %7 = vector.load %arg2[%c1_7, %c0_8, %c0_9] : memref<4x128x128xbf16, #tpu.memory_space<vmem>>, vector<1x128x128xbf16>
    %8 = vector.shape_cast %7 : vector<1x128x128xbf16> to vector<128x128xbf16>
    %cst_10 = arith.constant dense<0.000000e+00> : vector<128x128xf32>
    %9 = tpu.matmul %6, %8, %cst_10 {dimension_numbers = #tpu.dot_dimension_numbers<[1], [0], [0], [1], [0, 0, 1, 1], [], []>} : vector<128x128xbf16>, vector<128x128xbf16>, vector<128x128xf32> -> vector<128x128xf32>
    %c2 = arith.constant 2 : index
    %c0_11 = arith.constant 0 : index
    %c0_12 = arith.constant 0 : index
    %10 = vector.load %arg1[%c2, %c0_11, %c0_12] : memref<4x128x128xbf16, #tpu.memory_space<vmem>>, vector<1x128x128xbf16>
    %11 = vector.shape_cast %10 : vector<1x128x128xbf16> to vector<128x128xbf16>
    %c2_13 = arith.constant 2 : index
    %c0_14 = arith.constant 0 : index
    %c0_15 = arith.constant 0 : index
    %12 = vector.load %arg2[%c2_13, %c0_14, %c0_15] : memref<4x128x128xbf16, #tpu.memory_space<vmem>>, vector<1x128x128xbf16>
    %13 = vector.shape_cast %12 : vector<1x128x128xbf16> to vector<128x128xbf16>
    %cst_16 = arith.constant dense<0.000000e+00> : vector<128x128xf32>
    %14 = tpu.matmul %11, %13, %cst_16 {dimension_numbers = #tpu.dot_dimension_numbers<[1], [0], [0], [1], [0, 0, 1, 1], [], []>} : vector<128x128xbf16>, vector<128x128xbf16>, vector<128x128xf32> -> vector<128x128xf32>
    %c3 = arith.constant 3 : index
    %c0_17 = arith.constant 0 : index
    %c0_18 = arith.constant 0 : index
    %15 = vector.load %arg1[%c3, %c0_17, %c0_18] : memref<4x128x128xbf16, #tpu.memory_space<vmem>>, vector<1x128x128xbf16>
    %16 = vector.shape_cast %15 : vector<1x128x128xbf16> to vector<128x128xbf16>
    %c3_19 = arith.constant 3 : index
    %c0_20 = arith.constant 0 : index
    %c0_21 = arith.constant 0 : index
    %17 = vector.load %arg2[%c3_19, %c0_20, %c0_21] : memref<4x128x128xbf16, #tpu.memory_space<vmem>>, vector<1x128x128xbf16>
    %18 = vector.shape_cast %17 : vector<1x128x128xbf16> to vector<128x128xbf16>
    %cst_22 = arith.constant dense<0.000000e+00> : vector<128x128xf32>
    %19 = tpu.matmul %16, %18, %cst_22 {dimension_numbers = #tpu.dot_dimension_numbers<[1], [0], [0], [1], [0, 0, 1, 1], [], []>} : vector<128x128xbf16>, vector<128x128xbf16>, vector<128x128xf32> -> vector<128x128xf32>
    %20 = tpu.concatenate %4, %9, %14, %19 in 0 : vector<128x128xf32>, vector<128x128xf32>, vector<128x128xf32>, vector<128x128xf32> -> vector<512x128xf32>
    %c0_23 = arith.constant 0 : index
    %c0_24 = arith.constant 0 : index
    %21 = vector.load %arg3[%c0_23, %c0_24] : memref<1x128xf32, #tpu.memory_space<vmem>>, vector<1x128xf32>
    %22 = vector.broadcast %21 : vector<1x128xf32> to vector<512x128xf32>
    %23 = arith.addf %20, %22 : vector<512x128xf32>
    %24 = arith.negf %23 : vector<512x128xf32>
    %25 = math.exp %24 : vector<512x128xf32>
    %cst_25 = arith.constant 1.000000e+00 : f32
    %26 = vector.broadcast %cst_25 : f32 to vector<512x128xf32>
    %27 = arith.addf %26, %25 : vector<512x128xf32>
    %28 = arith.divf %26, %27 : vector<512x128xf32>
    %c0_26 = arith.constant 0 : index
    %c0_27 = arith.constant 0 : index
    %29 = vector.load %arg6[%c0_26, %c0_27] : memref<512x128xf32, #tpu.memory_space<vmem>>, vector<512x128xf32>
    tpu.vector_store %arg6[%c0_26, %c0_27], %28 {strides = array<i32>} : memref<512x128xf32, #tpu.memory_space<vmem>>, vector<512x128xf32>,
    return
  }
  func.func @transform_0(%arg0: i32) -> (i32, i32, i32) {
    %c0_i32 = arith.constant 0 : i32
    %c0_i32_0 = arith.constant 0 : i32
    %c0_i32_1 = arith.constant 0 : i32
    %c0_i32_2 = arith.constant 0 : i32
    return %c0_i32, %c0_i32_0, %c0_i32_1 : i32, i32, i32
  }
  func.func @transform_1(%arg0: i32) -> (i32, i32, i32) {
    %c0_i32 = arith.constant 0 : i32
    %c0_i32_0 = arith.constant 0 : i32
    %c0_i32_1 = arith.constant 0 : i32
    %c0_i32_2 = arith.constant 0 : i32
    return %c0_i32, %c0_i32_0, %c0_i32_1 : i32, i32, i32
  }
  func.func @transform_2(%arg0: i32) -> (i32, i32) {
    %c0_i32 = arith.constant 0 : i32
    %c0_i32_0 = arith.constant 0 : i32
    %c0_i32_1 = arith.constant 0 : i32
    return %c0_i32, %c0_i32_0 : i32, i32
  }
  func.func @transform_3(%arg0: i32) -> (i32, i32) {
    %c0_i32 = arith.constant 0 : i32
    %c0_i32_0 = arith.constant 0 : i32
    %c0_i32_1 = arith.constant 0 : i32
    return %c0_i32, %c0_i32_0 : i32, i32
  }
  func.func @transform_4(%arg0: i32) -> (i32, i32) {
    %c0_i32 = arith.constant 0 : i32
    %c0_i32_0 = arith.constant 0 : i32
    %c0_i32_1 = arith.constant 0 : i32
    return %c0_i32, %c0_i32_0 : i32, i32
  }
  func.func @transform_5(%arg0: i32) -> (i32, i32) {
    %c0_i32 = arith.constant 0 : i32
    %c0_i32_0 = arith.constant 0 : i32
    %c0_i32_1 = arith.constant 0 : i32
    return %c0_i32, %c0_i32_0 : i32, i32
  }
}

</mosaic_0001>

<bundles_post_ra>
// kernel: autoencoder_forward.6
= control target key start
LH: loop header
LB: loop body
LE: loop exit
PB: predicated region body
PF: predicated region fallthrough
CT: control target
= control target key end

     0   :  { %s672_s1 = inlined_call_operand.vmem [shape: bf16[1,128,128], index: 1, kind: input, shape index: {}]   ;;  %s673_s0 = inlined_call_operand.vmem [shape: bf16[1,128,128], index: 0, kind: input, shape index: {}]   ;;  %s674_s2 = inlined_call_operand.vmem [shape: f32[1,128], index: 2, kind: input, shape index: {}]   ;;  %s675_s3 = inlined_call_operand.vmem [shape: f32[1,128], index: 3, kind: input, shape index: {}]   ;;  %s676_s4 = inlined_call_operand.vmem [shape: f32[1,128], index: 4, kind: input, shape index: {}]   ;;  %s677_s5 = inlined_call_operand.vmem [shape: f32[128,128], index: 5, kind: output, shape index: {}]  }
   0x1   :  { %v513_v0 = vld [vmem:[%s672_s1] sm:$0xff]   ;;  %v514_v1 = vld [vmem:[%s672_s1 + $0x8] sm:$0xff]   ;;  %v515_v2 = vld [vmem:[%s672_s1 + $0x10] sm:$0xff]  }
   0x2   :  { %465 = vmatprep.subr.bf16.mxu0 %v513_v0  ;;  %497 = vmatprep.subr.bf16.mxu1 %v513_v0  ;;  %v516_v3 = vld [vmem:[%s672_s1 + $0x18] sm:$0xff]   ;;  %v521_v4 = vld [vmem:[%s673_s0] sm:$0xff]   ;;  %v518_v7 = vld [vmem:[%s672_s1 + $0x28] sm:$0xff]  }
   0x3   :  { %466 = vmatpush3.bf16.msra.mxu0 %v513_v0  ;;  %505 = vmatpush3.bf16.msra.mxu1 %v513_v0  ;;  %v517_v5 = vld [vmem:[%s672_s1 + $0x20] sm:$0xff]   ;;  %v519_v8 = vld [vmem:[%s672_s1 + $0x30] sm:$0xff]   ;;  %v520_v9 = vld [vmem:[%s672_s1 + $0x38] sm:$0xff]  }
   0x4   :  { %467 = vmatprep.subr.bf16.mxu0 %v514_v1  ;;  %498 = vmatprep.subr.bf16.mxu1 %v514_v1  ;;  %v525_v6 = vld [vmem:[%s673_s0 + $0x20] sm:$0xff]   ;;  %v522_v10 = vld [vmem:[%s673_s0 + $0x8] sm:$0xff]   ;;  %v523_v12 = vld [vmem:[%s673_s0 + $0x10] sm:$0xff]  }
   0x5   :  { %481 = vmatprep.mubr.bf16.mxu0 %v521_v4  ;;  %489 = vmatprep.mubr.bf16.mxu1 %v525_v6  ;;  %v526_v11 = vld [vmem:[%s673_s0 + $0x28] sm:$0xff]   ;;  %v527_v13 = vld [vmem:[%s673_s0 + $0x30] sm:$0xff]   ;;  %v524_v14 = vld [vmem:[%s673_s0 + $0x18] sm:$0xff]  }
   0x6   :  { %v528_v15 = vld [vmem:[%s673_s0 + $0x38] sm:$0xff]   ;;  %v430_v16 = vld [vmem:[%s674_s2] ss:$0 sm:$0xff] }
   0x7   :  { %468 = vmatpush3.bf16.msra.mxu0 %v514_v1  ;;  %506 = vmatpush3.bf16.msra.mxu1 %v514_v1 }
   0x8   :  { %469 = vmatprep.subr.bf16.mxu0 %v515_v2  ;;  %499 = vmatprep.subr.bf16.mxu1 %v515_v2 }
   0xb   :  { %470 = vmatpush3.bf16.msra.mxu0 %v515_v2  ;;  %507 = vmatpush3.bf16.msra.mxu1 %v515_v2 }
   0xc   :  { %471 = vmatprep.subr.bf16.mxu0 %v516_v3  ;;  %500 = vmatprep.subr.bf16.mxu1 %v516_v3 }
   0xf   :  { %472 = vmatpush3.bf16.msra.mxu0 %v516_v3  ;;  %508 = vmatpush3.bf16.msra.mxu1 %v516_v3 }
  0x10   :  { %473 = vmatprep.subr.bf16.mxu0 %v517_v5  ;;  %501 = vmatprep.subr.bf16.mxu1 %v517_v5 }
  0x13   :  { %474 = vmatpush3.bf16.msra.mxu0 %v517_v5  ;;  %509 = vmatpush3.bf16.msra.mxu1 %v517_v5 }
  0x14   :  { %475 = vmatprep.subr.bf16.mxu0 %v518_v7  ;;  %502 = vmatprep.subr.bf16.mxu1 %v518_v7 }
  0x17   :  { %476 = vmatpush3.bf16.msra.mxu0 %v518_v7  ;;  %510 = vmatpush3.bf16.msra.mxu1 %v518_v7 }
  0x18   :  { %477 = vmatprep.subr.bf16.mxu0 %v519_v8  ;;  %503 = vmatprep.subr.bf16.mxu1 %v519_v8 }
  0x1b   :  { %478 = vmatpush3.bf16.msra.mxu0 %v519_v8  ;;  %511 = vmatpush3.bf16.msra.mxu1 %v519_v8 }
  0x1c   :  { %479 = vmatprep.subr.bf16.mxu0 %v520_v9  ;;  %504 = vmatprep.subr.bf16.mxu1 %v520_v9 }
  0x1f   :  { %480 = vmatpush3.bf16.msra.mxu0 %v520_v9  ;;  %512 = vmatpush3.bf16.msra.mxu1 %v520_v9 }
  0x22   :  { %482 = vmatmul.mubr.bf16.vlgmr.msra.gmra.mrb[0].mxu0 %v522_v10  ;;  %490 = vmatmul.mubr.bf16.vlgmr.msra.gmra.mrb[0].mxu1 %v526_v11 }
  0x23   :  { %485 = vmatprep.mubr.bf16.mxu0 %v523_v12  ;;  %493 = vmatprep.mubr.bf16.mxu1 %v527_v13 }
  0x2a   :  { %486 = vmatmul.mubr.bf16.gmra.mrb[4].mxu0 %v524_v14  ;;  %494 = vmatmul.mubr.bf16.gmra.mrb[4].mxu1 %v528_v15 }
  0xf5   :  { %v483_v17 = vpop.f32.mrb[0].mxu0  ;;  %v491_v18 = vpop.f32.mrb[0].mxu1 }
  0xf6   :  { %v190_v19 = vpop.f32.mrb[1].mxu0  ;;  %v222_v20 = vpop.f32.mrb[1].mxu1  ;;  %v614_v26 = vadd.f32 %v483_v17, %v430_v16  ;;  %v231_v58 = vadd.f32 %v491_v18, %v430_v16 }
  0xf7   :  { %v612_v21 = vadd.f32 %v430_v16, %v190_v19  ;;  %v484_v22 = vpop.f32.mrb[2].mxu0  ;;  %v492_v23 = vpop.f32.mrb[2].mxu1  ;;  %v223_v51 = vadd.f32 %v430_v16, %v222_v20 }
  0xf8   :  { %v193_v24 = vpop.f32.mrb[3].mxu0  ;;  %v225_v25 = vpop.f32.mrb[3].mxu1  ;;  %v202_v29 = vadd.f32 %v484_v22, %v430_v16  ;;  %v255_v31 = vmax.f32 %v614_v26, 0.0  ;;  %v234_v61 = vadd.f32 %v492_v23, %v430_v16  ;;  %v263_v0 = vmax.f32 %v231_v58, 0.0 }
  0xf9   :  { %v194_v27 = vadd.f32 %v430_v16, %v193_v24  ;;  %v253_v28 = vmax.f32 %v612_v21, 0.0  ;;  %v261_v56 = vmax.f32 %v223_v51, 0.0  ;;  %v226_v57 = vadd.f32 %v430_v16, %v225_v25 }
  0xfa   :  { %v256_v37 = vmax.f32 %v202_v29, 0.0  ;;  %v264_v2 = vmax.f32 %v234_v61, 0.0 }
  0xfb   :  { %v254_v30 = vmax.f32 %v194_v27, 0.0  ;;  %v262_v62 = vmax.f32 %v226_v57, 0.0 }
  0xfd   :  { %v269_v32 = vadd.f32 %v254_v30, %v253_v28  ;;  %v487_v33 = vpop.f32.mrb[4].mxu0  ;;  %v495_v34 = vpop.f32.mrb[4].mxu1 }
  0xfe   :  { %v206_v35 = vpop.f32.mrb[5].mxu0  ;;  %v238_v36 = vpop.f32.mrb[5].mxu1  ;;  %v215_v44 = vadd.f32 %v487_v33, %v430_v16  ;;  %v247_v6 = vadd.f32 %v495_v34, %v430_v16 }
  0xff   :  { %v270_v38 = vadd.f32 %v269_v32, %v255_v31  ;;  %v207_v39 = vadd.f32 %v430_v16, %v206_v35  ;;  %v488_v40 = vpop.f32.mrb[6].mxu0  ;;  %v496_v41 = vpop.f32.mrb[6].mxu1  ;;  %v239_v63 = vadd.f32 %v430_v16, %v238_v36 }
 0x100   :  { %v209_v42 = vpop.f32.mrb[7].mxu0  ;;  %v241_v43 = vpop.f32.mrb[7].mxu1  ;;  %v218_v49 = vadd.f32 %v488_v40, %v430_v16  ;;  %v259_v52 = vmax.f32 %v215_v44, 0.0  ;;  %v250_v9 = vadd.f32 %v496_v41, %v430_v16  ;;  %v267_v11 = vmax.f32 %v247_v6, 0.0 }
 0x101   :  { %v257_v45 = vmax.f32 %v207_v39, 0.0  ;;  %v271_v46 = vadd.f32 %v270_v38, %v256_v37  ;;  %v210_v47 = vadd.f32 %v430_v16, %v209_v42  ;;  %v265_v4 = vmax.f32 %v239_v63, 0.0 }
 0x102   :  { %v260_v54 = vmax.f32 %v218_v49, 0.0  ;;  %v242_v5 = vadd.f32 %v430_v16, %v241_v43  ;;  %v268_v13 = vmax.f32 %v250_v9, 0.0 }
 0x103   :  { %v272_v48 = vadd.f32 %v271_v46, %v257_v45  ;;  %v258_v50 = vmax.f32 %v210_v47, 0.0 }
 0x104   :  { %v266_v10 = vmax.f32 %v242_v5, 0.0 }
 0x105   :  { %v273_v53 = vadd.f32 %v272_v48, %v258_v50 }
 0x107   :  { %v274_v55 = vadd.f32 %v273_v53, %v259_v52 }
 0x109   :  { %v275_v59 = vadd.f32 %v274_v55, %v260_v54 }
 0x10b   :  { %v276_v60 = vadd.f32 %v275_v59, %v261_v56 }
 0x10d   :  { %v277_v1 = vadd.f32 %v276_v60, %v262_v62 }
 0x10f   :  { %v278_v3 = vadd.f32 %v277_v1, %v263_v0 }
 0x111   :  { %v279_v7 = vadd.f32 %v278_v3, %v264_v2 }
 0x113   :  { %v280_v8 = vadd.f32 %v279_v7, %v265_v4 }
 0x115   :  { %v281_v12 = vadd.f32 %v280_v8, %v266_v10 }
 0x117   :  { %v282_v14 = vadd.f32 %v281_v12, %v267_v11 }
 0x119   :  { %v283_v15 = vadd.f32 %v282_v14, %v268_v13 }
 0x11b   :  { %v284_v17 = vrot.slane %v283_v15, 4 }
 0x11d   :  { %v285_v18 = vadd.f32 %v284_v17, %v283_v15 }
 0x11f   :  { %v286_v19 = vrot.slane %v285_v18, 2 }
 0x121   :  { %v287_v20 = vadd.f32 %v286_v19, %v285_v18 }
 0x123   :  { %v288_v21 = vrot.slane %v287_v20, 1 }
 0x125   :  { %v289_v22 = vadd.f32 %v288_v21, %v287_v20 }
 0x127   :  { %v291_v23 = vmul.f32 0.0078125, %v289_v22 }
 0x129   :  { %v292_v24 = vsub.f32 %v253_v28, %v291_v23  ;;  %v293_v25 = vsub.f32 %v254_v30, %v291_v23  ;;  %v294_v26 = vsub.f32 %v255_v31, %v291_v23  ;;  %v295_v27 = vsub.f32 %v256_v37, %v291_v23 }
 0x12a   :  { %v296_v29 = vsub.f32 %v257_v45, %v291_v23  ;;  %v297_v32 = vsub.f32 %v258_v50, %v291_v23  ;;  %v298_v16 = vsub.f32 %v259_v52, %v291_v23  ;;  %v299_v33 = vsub.f32 %v260_v54, %v291_v23 }
 0x12b   :  { %v300_v34 = vsub.f32 %v261_v56, %v291_v23  ;;  %v301_v35 = vsub.f32 %v262_v62, %v291_v23  ;;  %v302_v36 = vsub.f32 %v263_v0, %v291_v23  ;;  %v303_v38 = vsub.f32 %v264_v2, %v291_v23 }
 0x12c   :  { %v304_v39 = vsub.f32 %v265_v4, %v291_v23  ;;  %v305_v40 = vsub.f32 %v266_v10, %v291_v23  ;;  %v306_v41 = vsub.f32 %v267_v11, %v291_v23  ;;  %v307_v42 = vsub.f32 %v268_v13, %v291_v23 }
 0x12d   :  { %v308_v43 = vmul.f32 %v292_v24, %v292_v24  ;;  %v309_v44 = vmul.f32 %v293_v25, %v293_v25  ;;  %v310_v46 = vmul.f32 %v294_v26, %v294_v26  ;;  %v311_v28 = vmul.f32 %v295_v27, %v295_v27 }
 0x12e   :  { %v312_v31 = vmul.f32 %v296_v29, %v296_v29  ;;  %v313_v45 = vmul.f32 %v297_v32, %v297_v32  ;;  %v314_v49 = vmul.f32 %v298_v16, %v298_v16  ;;  %v315_v51 = vmul.f32 %v299_v33, %v299_v33 }
 0x12f   :  { %v324_v47 = vadd.f32 %v309_v44, %v308_v43  ;;  %v316_v53 = vmul.f32 %v300_v34, %v300_v34  ;;  %v317_v55 = vmul.f32 %v301_v35, %v301_v35  ;;  %v318_v57 = vmul.f32 %v302_v36, %v302_v36  ;;  %v447_v43 = vld [vmem:[%s675_s3] ss:$0 sm:$0xff] }
 0x130   :  { %v319_v59 = vmul.f32 %v303_v38, %v303_v38  ;;  %v320_v61 = vmul.f32 %v304_v39, %v304_v39  ;;  %v321_v63 = vmul.f32 %v305_v40, %v305_v40  ;;  %v322_v1 = vmul.f32 %v306_v41, %v306_v41 }
 0x131   :  { %v325_v30 = vadd.f32 %v324_v47, %v310_v46  ;;  %v323_v3 = vmul.f32 %v307_v42, %v307_v42 }
 0x133   :  { %v326_v37 = vadd.f32 %v325_v30, %v311_v28 }
 0x135   :  { %v327_v48 = vadd.f32 %v326_v37, %v312_v31 }
 0x137   :  { %v328_v50 = vadd.f32 %v327_v48, %v313_v45  ;;  %v448_v48 = vld [vmem:[%s676_s4] ss:$0 sm:$0xff] }
 0x139   :  { %v329_v52 = vadd.f32 %v328_v50, %v314_v49 }
 0x13b   :  { %v330_v54 = vadd.f32 %v329_v52, %v315_v51 }
 0x13d   :  { %v331_v56 = vadd.f32 %v330_v54, %v316_v53 }
 0x13f   :  { %v332_v58 = vadd.f32 %v331_v56, %v317_v55 }
 0x141   :  { %v333_v60 = vadd.f32 %v332_v58, %v318_v57 }
 0x143   :  { %v334_v62 = vadd.f32 %v333_v60, %v319_v59 }
 0x145   :  { %v335_v0 = vadd.f32 %v334_v62, %v320_v61 }
 0x147   :  { %v336_v2 = vadd.f32 %v335_v0, %v321_v63 }
 0x149   :  { %v337_v4 = vadd.f32 %v336_v2, %v322_v1 }
 0x14b   :  { %v338_v5 = vadd.f32 %v337_v4, %v323_v3 }
 0x14d   :  { %v339_v6 = vrot.slane %v338_v5, 4 }
 0x14f   :  { %v340_v7 = vadd.f32 %v339_v6, %v338_v5 }
 0x151   :  { %v341_v8 = vrot.slane %v340_v7, 2 }
 0x153   :  { %v342_v9 = vadd.f32 %v341_v8, %v340_v7 }
 0x155   :  { %v343_v10 = vrot.slane %v342_v9, 1 }
 0x157   :  { %v344_v11 = vadd.f32 %v343_v10, %v342_v9 }
 0x159   :  { %v345_v12 = vmul.f32 0.0078125, %v344_v11 }
 0x15b   :  { %v346_v13 = vadd.f32 1e-05, %v345_v12 }
 0x15d   :  { %529 = vrsqrt.f32 %v346_v13 }
 0x167   :  { %v530_v14 = vpop.eup %529 }
 0x168   :  { %v348_v15 = vmul.f32 %v530_v14, %v292_v24  ;;  %v349_v17 = vmul.f32 %v530_v14, %v293_v25  ;;  %v350_v18 = vmul.f32 %v530_v14, %v294_v26  ;;  %v351_v19 = vmul.f32 %v530_v14, %v295_v27 }
 0x169   :  { %v352_v20 = vmul.f32 %v530_v14, %v296_v29  ;;  %v353_v21 = vmul.f32 %v530_v14, %v297_v32  ;;  %v354_v22 = vmul.f32 %v530_v14, %v298_v16  ;;  %v355_v23 = vmul.f32 %v530_v14, %v299_v33 }
 0x16a   :  { %v356_v44 = vmul.f32 %v530_v14, %v300_v34  ;;  %v357_v46 = vmul.f32 %v530_v14, %v301_v35  ;;  %v358_v47 = vmul.f32 %v530_v14, %v302_v36  ;;  %v359_v28 = vmul.f32 %v530_v14, %v303_v38 }
 0x16b   :  { %v360_v30 = vmul.f32 %v530_v14, %v304_v39  ;;  %v361_v31 = vmul.f32 %v530_v14, %v305_v40  ;;  %v362_v37 = vmul.f32 %v530_v14, %v306_v41  ;;  %v363_v45 = vmul.f32 %v530_v14, %v307_v42 }
 0x16c   :  { %v371_v24 = vmul.f32 %v447_v43, %v348_v15  ;;  %v372_v25 = vmul.f32 %v447_v43, %v349_v17  ;;  %v373_v26 = vmul.f32 %v447_v43, %v350_v18  ;;  %v374_v27 = vmul.f32 %v447_v43, %v351_v19 }
 0x16d   :  { %v375_v29 = vmul.f32 %v447_v43, %v352_v20  ;;  %v376_v32 = vmul.f32 %v447_v43, %v353_v21  ;;  %v377_v16 = vmul.f32 %v447_v43, %v354_v22  ;;  %v378_v33 = vmul.f32 %v447_v43, %v355_v23 }
 0x16e   :  { %v379_v34 = vmul.f32 %v447_v43, %v356_v44  ;;  %v380_v35 = vmul.f32 %v447_v43, %v357_v46  ;;  %v381_v36 = vmul.f32 %v447_v43, %v358_v47  ;;  %v382_v38 = vmul.f32 %v447_v43, %v359_v28 }
 0x16f   :  { %v383_v39 = vmul.f32 %v447_v43, %v360_v30  ;;  %v384_v40 = vmul.f32 %v447_v43, %v361_v31  ;;  %v385_v41 = vmul.f32 %v447_v43, %v362_v37  ;;  %v386_v42 = vmul.f32 %v447_v43, %v363_v45 }
 0x170   :  { %v394_v49 = vadd.f32 %v448_v48, %v371_v24  ;;  %v395_v50 = vadd.f32 %v448_v48, %v372_v25  ;;  %v396_v51 = vadd.f32 %v448_v48, %v373_v26  ;;  %v397_v52 = vadd.f32 %v448_v48, %v374_v27 }
 0x171   :  { %v398_v53 = vadd.f32 %v448_v48, %v375_v29  ;;  %v399_v54 = vadd.f32 %v448_v48, %v376_v32  ;;  %v400_v55 = vadd.f32 %v448_v48, %v377_v16  ;;  %v401_v56 = vadd.f32 %v448_v48, %v378_v33 }
 0x172   :  { %v402_v57 = vadd.f32 %v448_v48, %v379_v34  ;;  %v403_v58 = vadd.f32 %v448_v48, %v380_v35  ;;  %v404_v59 = vadd.f32 %v448_v48, %v381_v36  ;;  %v405_v60 = vadd.f32 %v448_v48, %v382_v38  ;;  %410 = vst [vmem:[%s677_s5] sm:$0xff] %v394_v49 }
 0x173   :  { %411 = vst [vmem:[%s677_s5 + $0x8] sm:$0xff] %v395_v50  ;;  %412 = vst [vmem:[%s677_s5 + $0x10] sm:$0xff] %v396_v51  ;;  %v406_v61 = vadd.f32 %v448_v48, %v383_v39  ;;  %v407_v62 = vadd.f32 %v448_v48, %v384_v40  ;;  %v408_v63 = vadd.f32 %v448_v48, %v385_v41 }
 0x174   :  { %413 = vst [vmem:[%s677_s5 + $0x18] sm:$0xff] %v397_v52  ;;  %v409_v0 = vadd.f32 %v448_v48, %v386_v42  ;;  %414 = vst [vmem:[%s677_s5 + $0x20] sm:$0xff] %v398_v53 }
 0x175   :  { %415 = vst [vmem:[%s677_s5 + $0x28] sm:$0xff] %v399_v54  ;;  %416 = vst [vmem:[%s677_s5 + $0x30] sm:$0xff] %v400_v55 }
 0x176   :  { %417 = vst [vmem:[%s677_s5 + $0x38] sm:$0xff] %v401_v56  ;;  %418 = vst [vmem:[%s677_s5 + $0x40] sm:$0xff] %v402_v57 }
 0x177   :  { %419 = vst [vmem:[%s677_s5 + $0x48] sm:$0xff] %v403_v58  ;;  %420 = vst [vmem:[%s677_s5 + $0x50] sm:$0xff] %v404_v59 }
 0x178   :  { %421 = vst [vmem:[%s677_s5 + $0x58] sm:$0xff] %v405_v60  ;;  %422 = vst [vmem:[%s677_s5 + $0x60] sm:$0xff] %v406_v61 }
 0x179   :  { %423 = vst [vmem:[%s677_s5 + $0x68] sm:$0xff] %v407_v62  ;;  %424 = vst [vmem:[%s677_s5 + $0x70] sm:$0xff] %v408_v63 }
 0x17a   :  { %425 = vst [vmem:[%s677_s5 + $0x78] sm:$0xff] %v409_v0 }

// kernel: autoencoder_forward.7
= control target key start
LH: loop header
LB: loop body
LE: loop exit
PB: predicated region body
PF: predicated region fallthrough
CT: control target
= control target key end

     0   :  { %s815_s1 = inlined_call_operand.vmem [shape: bf16[1,512,128], index: 1, kind: input, shape index: {}]   ;;  %s816_s0 = inlined_call_operand.vmem [shape: bf16[1,32,512], index: 0, kind: input, shape index: {}]   ;;  %s817_s2 = inlined_call_operand.vmem [shape: f32[1,128], index: 2, kind: input, shape index: {}]   ;;  %s818_s3 = inlined_call_operand.vmem [shape: f32[1,128], index: 3, kind: input, shape index: {}]   ;;  %s819_s4 = inlined_call_operand.vmem [shape: f32[1,128], index: 4, kind: input, shape index: {}]   ;;  %s820_s5 = inlined_call_operand.vmem [shape: f32[32,128], index: 5, kind: output, shape index: {}]  }
   0x1   :  { %v598_v0 = vld [vmem:[%s815_s1 + $0x40] sm:$0xff]   ;;  %v602_v4 = vld [vmem:[%s815_s1 + $0x48] sm:$0xff]   ;;  %v606_v8 = vld [vmem:[%s815_s1 + $0x50] sm:$0xff]  }
   0x2   :  { %v599_v1 = vld [vmem:[%s815_s1 + $0xc0] sm:$0xff]   ;;  %542 = vmatprep.subr.bf16.mxu0 %v598_v0  ;;  %v603_v5 = vld [vmem:[%s815_s1 + $0xc8] sm:$0xff]   ;;  %v607_v9 = vld [vmem:[%s815_s1 + $0xd0] sm:$0xff]  }
   0x3   :  { %v600_v2 = vld [vmem:[%s815_s1] sm:$0xff]   ;;  %570 = vmatprep.subr.bf16.mxu1 %v599_v1  ;;  %v604_v6 = vld [vmem:[%s815_s1 + $0x8] sm:$0xff]   ;;  %v608_v10 = vld [vmem:[%s815_s1 + $0x10] sm:$0xff]  }
   0x4   :  { %v601_v3 = vld [vmem:[%s815_s1 + $0x80] sm:$0xff]   ;;  %543 = vmatpush3.bf16.msra.mxu0 %v600_v2  ;;  %v605_v7 = vld [vmem:[%s815_s1 + $0x88] sm:$0xff]   ;;  %v609_v11 = vld [vmem:[%s815_s1 + $0x90] sm:$0xff]  }
   0x5   :  { %571 = vmatpush3.bf16.msra.mxu1 %v601_v3  ;;  %544 = vmatprep.subr.bf16.mxu0 %v602_v4  ;;  %v610_v12 = vld [vmem:[%s815_s1 + $0x58] sm:$0xff]   ;;  %v614_v16 = vld [vmem:[%s815_s1 + $0x60] sm:$0xff]   ;;  %v618_v20 = vld [vmem:[%s815_s1 + $0x68] sm:$0xff]  }
   0x6   :  { %572 = vmatprep.subr.bf16.mxu1 %v603_v5  ;;  %v611_v13 = vld [vmem:[%s815_s1 + $0xd8] sm:$0xff]   ;;  %v615_v17 = vld [vmem:[%s815_s1 + $0xe0] sm:$0xff]   ;;  %v619_v21 = vld [vmem:[%s815_s1 + $0xe8] sm:$0xff]  }
   0x7   :  { %v612_v14 = vld [vmem:[%s815_s1 + $0x18] sm:$0xff]   ;;  %v616_v18 = vld [vmem:[%s815_s1 + $0x20] sm:$0xff]   ;;  %v620_v22 = vld [vmem:[%s815_s1 + $0x28] sm:$0xff]  }
   0x8   :  { %545 = vmatpush3.bf16.msra.mxu0 %v604_v6  ;;  %v613_v15 = vld [vmem:[%s815_s1 + $0x98] sm:$0xff]   ;;  %v617_v19 = vld [vmem:[%s815_s1 + $0xa0] sm:$0xff]   ;;  %v621_v23 = vld [vmem:[%s815_s1 + $0xa8] sm:$0xff]  }
   0x9   :  { %573 = vmatpush3.bf16.msra.mxu1 %v605_v7  ;;  %546 = vmatprep.subr.bf16.mxu0 %v606_v8  ;;  %v622_v24 = vld [vmem:[%s815_s1 + $0x70] sm:$0xff]   ;;  %v626_v28 = vld [vmem:[%s815_s1 + $0x78] sm:$0xff]   ;;  %v499_v42 = vld [vmem:[%s817_s2] ss:$0 sm:$0xff] }
   0xa   :  { %574 = vmatprep.subr.bf16.mxu1 %v607_v9  ;;  %v623_v25 = vld [vmem:[%s815_s1 + $0xf0] sm:$0xff]   ;;  %v627_v29 = vld [vmem:[%s815_s1 + $0xf8] sm:$0xff]  }
   0xb   :  { %v624_v26 = vld [vmem:[%s815_s1 + $0x30] sm:$0xff]   ;;  %v628_v30 = vld [vmem:[%s815_s1 + $0x38] sm:$0xff]  }
   0xc   :  { %547 = vmatpush3.bf16.msra.mxu0 %v608_v10  ;;  %v625_v27 = vld [vmem:[%s815_s1 + $0xb0] sm:$0xff]   ;;  %v629_v31 = vld [vmem:[%s815_s1 + $0xb8] sm:$0xff]  }
   0xd   :  { %575 = vmatpush3.bf16.msra.mxu1 %v609_v11  ;;  %548 = vmatprep.subr.bf16.mxu0 %v610_v12  ;;  %v630_v32 = vld [vmem:[%s816_s0] ss:$16 sps:$4 sm:$0xff]   ;;  %v632_v33 = vld [vmem:[%s816_s0 + $0x4] ss:$16 sps:$4 sm:$0xff]   ;;  %v633_v34 = vld [vmem:[%s816_s0 + $0x8] ss:$16 sps:$4 sm:$0xff]  }
   0xe   :  { %576 = vmatprep.subr.bf16.mxu1 %v611_v13  ;;  %v635_v35 = vld [vmem:[%s816_s0 + $0xc] ss:$16 sps:$4 sm:$0xff]   ;;  %364 = vmatprep.mubr.bf16.mxu0 %v632_v33  ;;  %v636_v36 = vld [vmem:[%s816_s0 + $0x24] ss:$16 sps:$4 sm:$0xff]   ;;  %v640_v38 = vld [vmem:[%s816_s0 + $0x20] ss:$16 sps:$4 sm:$0xff]  }
   0xf   :  { %413 = vmatprep.mubr.bf16.mxu1 %v635_v35  ;;  %v638_v37 = vld [vmem:[%s816_s0 + $0x2c] ss:$16 sps:$4 sm:$0xff]   ;;  %v641_v39 = vld [vmem:[%s816_s0 + $0x28] ss:$16 sps:$4 sm:$0xff]  }
  0x10   :  { %549 = vmatpush3.bf16.msra.mxu0 %v612_v14 }
  0x11   :  { %577 = vmatpush3.bf16.msra.mxu1 %v613_v15  ;;  %550 = vmatprep.subr.bf16.mxu0 %v614_v16 }
  0x12   :  { %578 = vmatprep.subr.bf16.mxu1 %v615_v17 }
  0x14   :  { %551 = vmatpush3.bf16.msra.mxu0 %v616_v18 }
  0x15   :  { %579 = vmatpush3.bf16.msra.mxu1 %v617_v19  ;;  %552 = vmatprep.subr.bf16.mxu0 %v618_v20 }
  0x16   :  { %580 = vmatprep.subr.bf16.mxu1 %v619_v21 }
  0x18   :  { %553 = vmatpush3.bf16.msra.mxu0 %v620_v22 }
  0x19   :  { %581 = vmatpush3.bf16.msra.mxu1 %v621_v23  ;;  %554 = vmatprep.subr.bf16.mxu0 %v622_v24 }
  0x1a   :  { %582 = vmatprep.subr.bf16.mxu1 %v623_v25 }
  0x1c   :  { %555 = vmatpush3.bf16.msra.mxu0 %v624_v26 }
  0x1d   :  { %583 = vmatpush3.bf16.msra.mxu1 %v625_v27  ;;  %556 = vmatprep.subr.bf16.mxu0 %v626_v28 }
  0x1e   :  { %584 = vmatprep.subr.bf16.mxu1 %v627_v29 }
  0x20   :  { %557 = vmatpush3.bf16.msra.mxu0 %v628_v30 }
  0x21   :  { %585 = vmatpush3.bf16.msra.mxu1 %v629_v31 }
  0x23   :  { %365 = vmatmul.mubr.bf16.vlgmr.msra.gmra.mrb[0].mxu0 %v630_v32 }
  0x24   :  { %414 = vmatmul.mubr.bf16.vlgmr.msra.gmra.mrb[0].mxu1 %v633_v34  ;;  %372 = vmatprep.mubr.bf16.mxu0 %v636_v36 }
  0x25   :  { %421 = vmatprep.mubr.bf16.mxu1 %v638_v37 }
  0x2b   :  { %373 = vmatmul.mubr.bf16.gmra.mrb[4].mxu0 %v640_v38 }
  0x2c   :  { %422 = vmatmul.mubr.bf16.gmra.mrb[4].mxu1 %v641_v39 }
  0xf6   :  { %v558_v40 = vpop.f32.mrb[0].mxu0 }
  0xf7   :  { %v586_v41 = vpop.f32.mrb[0].mxu1  ;;  %v559_v43 = vpop.f32.mrb[1].mxu0 }
  0xf8   :  { %v560_v44 = vadd.f32 %v559_v43, %v558_v40  ;;  %v587_v45 = vpop.f32.mrb[1].mxu1  ;;  %v561_v46 = vpop.f32.mrb[2].mxu0  ;;  %v540_v43 = vld [vmem:[%s818_s3] ss:$0 sm:$0xff] }
  0xf9   :  { %v588_v47 = vadd.f32 %v587_v45, %v586_v41  ;;  %v589_v48 = vpop.f32.mrb[2].mxu1  ;;  %v562_v49 = vpop.f32.mrb[3].mxu0 }
  0xfa   :  { %v367_v50 = vadd.f32 %v560_v44, %v499_v42  ;;  %v563_v51 = vadd.f32 %v562_v49, %v561_v46  ;;  %v590_v52 = vpop.f32.mrb[3].mxu1 }
  0xfb   :  { %v591_v53 = vadd.f32 %v590_v52, %v589_v48  ;;  %v541_v48 = vld [vmem:[%s819_s4] ss:$0 sm:$0xff] }
  0xfc   :  { %v416_v54 = vadd.f32 %v588_v47, %v367_v50  ;;  %v370_v55 = vadd.f32 %v563_v51, %v499_v42 }
  0xfe   :  { %v419_v56 = vadd.f32 %v591_v53, %v370_v55  ;;  %v564_v57 = vpop.f32.mrb[4].mxu0  ;;  %v430_v60 = vmax.f32 %v416_v54, 0.0 }
  0xff   :  { %v592_v58 = vpop.f32.mrb[4].mxu1  ;;  %v565_v59 = vpop.f32.mrb[5].mxu0 }
 0x100   :  { %v431_v61 = vmax.f32 %v419_v56, 0.0  ;;  %v566_v62 = vadd.f32 %v565_v59, %v564_v57  ;;  %v593_v63 = vpop.f32.mrb[5].mxu1  ;;  %v567_v0 = vpop.f32.mrb[6].mxu0 }
 0x101   :  { %v594_v1 = vadd.f32 %v593_v63, %v592_v58  ;;  %v595_v2 = vpop.f32.mrb[6].mxu1  ;;  %v568_v3 = vpop.f32.mrb[7].mxu0 }
 0x102   :  { %v434_v4 = vadd.f32 %v431_v61, %v430_v60  ;;  %v375_v5 = vadd.f32 %v566_v62, %v499_v42  ;;  %v569_v6 = vadd.f32 %v568_v3, %v567_v0  ;;  %v596_v7 = vpop.f32.mrb[7].mxu1 }
 0x103   :  { %v597_v8 = vadd.f32 %v596_v7, %v595_v2 }
 0x104   :  { %v424_v9 = vadd.f32 %v594_v1, %v375_v5  ;;  %v378_v10 = vadd.f32 %v569_v6, %v499_v42 }
 0x106   :  { %v432_v11 = vmax.f32 %v424_v9, 0.0  ;;  %v427_v12 = vadd.f32 %v597_v8, %v378_v10 }
 0x108   :  { %v435_v13 = vadd.f32 %v434_v4, %v432_v11  ;;  %v433_v14 = vmax.f32 %v427_v12, 0.0 }
 0x10a   :  { %v436_v15 = vadd.f32 %v435_v13, %v433_v14 }
 0x10c   :  { %v437_v16 = vrot.slane %v436_v15, 4 }
 0x10e   :  { %v438_v17 = vadd.f32 %v437_v16, %v436_v15 }
 0x110   :  { %v439_v18 = vrot.slane %v438_v17, 2 }
 0x112   :  { %v440_v19 = vadd.f32 %v439_v18, %v438_v17 }
 0x114   :  { %v441_v20 = vrot.slane %v440_v19, 1 }
 0x116   :  { %v442_v21 = vadd.f32 %v441_v20, %v440_v19 }
 0x118   :  { %v444_v22 = vmul.f32 0.03125, %v442_v21 }
 0x11a   :  { %v445_v23 = vsub.f32 %v430_v60, %v444_v22  ;;  %v446_v24 = vsub.f32 %v431_v61, %v444_v22  ;;  %v447_v25 = vsub.f32 %v432_v11, %v444_v22  ;;  %v448_v26 = vsub.f32 %v433_v14, %v444_v22 }
 0x11c   :  { %v449_v27 = vmul.f32 %v445_v23, %v445_v23  ;;  %v450_v28 = vmul.f32 %v446_v24, %v446_v24  ;;  %v451_v29 = vmul.f32 %v447_v25, %v447_v25  ;;  %v452_v31 = vmul.f32 %v448_v26, %v448_v26 }
 0x11e   :  { %v453_v30 = vadd.f32 %v450_v28, %v449_v27 }
 0x120   :  { %v454_v32 = vadd.f32 %v453_v30, %v451_v29 }
 0x122   :  { %v455_v33 = vadd.f32 %v454_v32, %v452_v31 }
 0x124   :  { %v456_v34 = vrot.slane %v455_v33, 4 }
 0x126   :  { %v457_v35 = vadd.f32 %v456_v34, %v455_v33 }
 0x128   :  { %v458_v36 = vrot.slane %v457_v35, 2 }
 0x12a   :  { %v459_v37 = vadd.f32 %v458_v36, %v457_v35 }
 0x12c   :  { %v460_v38 = vrot.slane %v459_v37, 1 }
 0x12e   :  { %v461_v39 = vadd.f32 %v460_v38, %v459_v37 }
 0x130   :  { %v462_v40 = vmul.f32 0.03125, %v461_v39 }
 0x132   :  { %v463_v41 = vadd.f32 1e-05, %v462_v40 }
 0x134   :  { %642 = vrsqrt.f32 %v463_v41 }
 0x13e   :  { %v643_v42 = vpop.eup %642 }
 0x13f   :  { %v465_v44 = vmul.f32 %v643_v42, %v445_v23  ;;  %v466_v45 = vmul.f32 %v643_v42, %v446_v24  ;;  %v467_v46 = vmul.f32 %v643_v42, %v447_v25  ;;  %v468_v47 = vmul.f32 %v643_v42, %v448_v26 }
 0x141   :  { %v476_v49 = vmul.f32 %v540_v43, %v465_v44  ;;  %v477_v50 = vmul.f32 %v540_v43, %v466_v45  ;;  %v478_v51 = vmul.f32 %v540_v43, %v467_v46  ;;  %v479_v52 = vmul.f32 %v540_v43, %v468_v47 }
 0x143   :  { %v487_v53 = vadd.f32 %v541_v48, %v476_v49  ;;  %v488_v54 = vadd.f32 %v541_v48, %v477_v50  ;;  %v489_v55 = vadd.f32 %v541_v48, %v478_v51  ;;  %v490_v56 = vadd.f32 %v541_v48, %v479_v52 }
 0x145   :  { %491 = vst [vmem:[%s820_s5] sm:$0xff] %v487_v53  ;;  %492 = vst [vmem:[%s820_s5 + $0x8] sm:$0xff] %v488_v54 }
 0x146   :  { %493 = vst [vmem:[%s820_s5 + $0x10] sm:$0xff] %v489_v55  ;;  %494 = vst [vmem:[%s820_s5 + $0x18] sm:$0xff] %v490_v56 }

// kernel: autoencoder_forward.8
= control target key start
LH: loop header
LB: loop body
LE: loop exit
PB: predicated region body
PF: predicated region fallthrough
CT: control target
= control target key end

     0   :  { %s1270_s1 = inlined_call_operand.vmem [shape: bf16[1,1024,128], index: 1, kind: input, shape index: {}]   ;;  %s1271_s0 = inlined_call_operand.vmem [shape: bf16[1,8,1024], index: 0, kind: input, shape index: {}]   ;;  %s1272_s2 = inlined_call_operand.vmem [shape: f32[1,128], index: 2, kind: input, shape index: {}]   ;;  %s1273_s3 = inlined_call_operand.vmem [shape: f32[1,128], index: 3, kind: input, shape index: {}]   ;;  %s1274_s4 = inlined_call_operand.vmem [shape: f32[1,128], index: 4, kind: input, shape index: {}]   ;;  %s1275_s5 = inlined_call_operand.vmem [shape: f32[8,128], index: 5, kind: output, shape index: {}]  }
   0x1   :  { %v946_v0 = vld [vmem:[%s1270_s1 + $0x40] sm:$0xff]   ;;  %v950_v4 = vld [vmem:[%s1270_s1 + $0x48] sm:$0xff]   ;;  %v954_v8 = vld [vmem:[%s1270_s1 + $0x50] sm:$0xff]  }
   0x2   :  { %v947_v1 = vld [vmem:[%s1270_s1 + $0xc0] sm:$0xff]   ;;  %857 = vmatprep.subr.bf16.mxu0 %v946_v0  ;;  %v951_v5 = vld [vmem:[%s1270_s1 + $0xc8] sm:$0xff]   ;;  %v955_v9 = vld [vmem:[%s1270_s1 + $0xd0] sm:$0xff]  }
   0x3   :  { %v948_v2 = vld [vmem:[%s1270_s1] sm:$0xff]   ;;  %879 = vmatprep.subr.bf16.mxu1 %v947_v1  ;;  %v952_v6 = vld [vmem:[%s1270_s1 + $0x8] sm:$0xff]   ;;  %v956_v10 = vld [vmem:[%s1270_s1 + $0x10] sm:$0xff]  }
   0x4   :  { %v949_v3 = vld [vmem:[%s1270_s1 + $0x80] sm:$0xff]   ;;  %858 = vmatpush3.bf16.msra.mxu0 %v948_v2  ;;  %v953_v7 = vld [vmem:[%s1270_s1 + $0x88] sm:$0xff]   ;;  %v957_v11 = vld [vmem:[%s1270_s1 + $0x90] sm:$0xff]  }
   0x5   :  { %880 = vmatpush3.bf16.msra.mxu1 %v949_v3  ;;  %859 = vmatprep.subr.bf16.mxu0 %v950_v4  ;;  %v958_v12 = vld [vmem:[%s1270_s1 + $0x58] sm:$0xff]   ;;  %v962_v16 = vld [vmem:[%s1270_s1 + $0x60] sm:$0xff]   ;;  %v966_v20 = vld [vmem:[%s1270_s1 + $0x68] sm:$0xff]  }
   0x6   :  { %881 = vmatprep.subr.bf16.mxu1 %v951_v5  ;;  %v959_v13 = vld [vmem:[%s1270_s1 + $0xd8] sm:$0xff]   ;;  %v963_v17 = vld [vmem:[%s1270_s1 + $0xe0] sm:$0xff]   ;;  %v967_v21 = vld [vmem:[%s1270_s1 + $0xe8] sm:$0xff]  }
   0x7   :  { %v960_v14 = vld [vmem:[%s1270_s1 + $0x18] sm:$0xff]   ;;  %v964_v18 = vld [vmem:[%s1270_s1 + $0x20] sm:$0xff]   ;;  %v968_v22 = vld [vmem:[%s1270_s1 + $0x28] sm:$0xff]  }
   0x8   :  { %860 = vmatpush3.bf16.msra.mxu0 %v952_v6  ;;  %v961_v15 = vld [vmem:[%s1270_s1 + $0x98] sm:$0xff]   ;;  %v965_v19 = vld [vmem:[%s1270_s1 + $0xa0] sm:$0xff]   ;;  %v969_v23 = vld [vmem:[%s1270_s1 + $0xa8] sm:$0xff]  }
   0x9   :  { %882 = vmatpush3.bf16.msra.mxu1 %v953_v7  ;;  %861 = vmatprep.subr.bf16.mxu0 %v954_v8  ;;  %v970_v24 = vld [vmem:[%s1270_s1 + $0x70] sm:$0xff]   ;;  %v974_v28 = vld [vmem:[%s1270_s1 + $0x78] sm:$0xff]   ;;  %v21_v32 = vld [vmem:[%s1271_s0] sm:$0xff] }
   0xa   :  { %883 = vmatprep.subr.bf16.mxu1 %v955_v9  ;;  %v971_v25 = vld [vmem:[%s1270_s1 + $0xf0] sm:$0xff]   ;;  %v975_v29 = vld [vmem:[%s1270_s1 + $0xf8] sm:$0xff]   ;;  %v22_v33 = vld [vmem:[%s1271_s0 + $0x8] sm:$0xff]  ;;  %v782_v34 = vcombine.low %v21_v32, %v21_v32  ;;  %v783_v35 = vcombine.high %v21_v32, %v21_v32 }
   0xb   :  { %v972_v26 = vld [vmem:[%s1270_s1 + $0x30] sm:$0xff]   ;;  %v976_v30 = vld [vmem:[%s1270_s1 + $0x38] sm:$0xff]   ;;  %v784_v36 = vcombine.low %v22_v33, %v22_v33  ;;  %v785_v37 = vcombine.high %v22_v33, %v22_v33  ;;  %v982_v38 = vld [vmem:[%s1270_s1 + $0x140] sm:$0xff]  }
   0xc   :  { %862 = vmatpush3.bf16.msra.mxu0 %v956_v10  ;;  %v973_v27 = vld [vmem:[%s1270_s1 + $0xb0] sm:$0xff]   ;;  %v977_v31 = vld [vmem:[%s1270_s1 + $0xb8] sm:$0xff]   ;;  %v983_v39 = vld [vmem:[%s1270_s1 + $0x1c0] sm:$0xff]   ;;  %604 = vmatprep.mubr.bf16.mxu0 %v783_v35 }
   0xd   :  { %884 = vmatpush3.bf16.msra.mxu1 %v957_v11  ;;  %863 = vmatprep.subr.bf16.mxu0 %v958_v12  ;;  %v984_v40 = vld [vmem:[%s1270_s1 + $0x100] sm:$0xff]   ;;  %v986_v42 = vld [vmem:[%s1270_s1 + $0x148] sm:$0xff]   ;;  %v990_v46 = vld [vmem:[%s1270_s1 + $0x150] sm:$0xff]  }
   0xe   :  { %885 = vmatprep.subr.bf16.mxu1 %v959_v13  ;;  %644 = vmatprep.mubr.bf16.mxu1 %v785_v37  ;;  %v985_v41 = vld [vmem:[%s1270_s1 + $0x180] sm:$0xff]   ;;  %v987_v43 = vld [vmem:[%s1270_s1 + $0x1c8] sm:$0xff]   ;;  %v991_v47 = vld [vmem:[%s1270_s1 + $0x1d0] sm:$0xff]  }
   0xf   :  { %v988_v44 = vld [vmem:[%s1270_s1 + $0x108] sm:$0xff]   ;;  %v992_v48 = vld [vmem:[%s1270_s1 + $0x110] sm:$0xff]   ;;  %v994_v50 = vld [vmem:[%s1270_s1 + $0x158] sm:$0xff]  }
  0x10   :  { %864 = vmatpush3.bf16.msra.mxu0 %v960_v14  ;;  %v989_v45 = vld [vmem:[%s1270_s1 + $0x188] sm:$0xff]   ;;  %v993_v49 = vld [vmem:[%s1270_s1 + $0x190] sm:$0xff]   ;;  %v995_v51 = vld [vmem:[%s1270_s1 + $0x1d8] sm:$0xff]  }
  0x11   :  { %886 = vmatpush3.bf16.msra.mxu1 %v961_v15  ;;  %865 = vmatprep.subr.bf16.mxu0 %v962_v16  ;;  %v996_v52 = vld [vmem:[%s1270_s1 + $0x118] sm:$0xff]   ;;  %v998_v54 = vld [vmem:[%s1270_s1 + $0x160] sm:$0xff]   ;;  %v1002_v58 = vld [vmem:[%s1270_s1 + $0x168] sm:$0xff]  }
  0x12   :  { %887 = vmatprep.subr.bf16.mxu1 %v963_v17  ;;  %v997_v53 = vld [vmem:[%s1270_s1 + $0x198] sm:$0xff]   ;;  %v999_v55 = vld [vmem:[%s1270_s1 + $0x1e0] sm:$0xff]   ;;  %v1003_v59 = vld [vmem:[%s1270_s1 + $0x1e8] sm:$0xff]  }
  0x13   :  { %v1000_v56 = vld [vmem:[%s1270_s1 + $0x120] sm:$0xff]   ;;  %v1004_v60 = vld [vmem:[%s1270_s1 + $0x128] sm:$0xff]   ;;  %v1006_v62 = vld [vmem:[%s1270_s1 + $0x170] sm:$0xff]  }
  0x14   :  { %866 = vmatpush3.bf16.msra.mxu0 %v964_v18  ;;  %v1001_v57 = vld [vmem:[%s1270_s1 + $0x1a0] sm:$0xff]   ;;  %v1005_v61 = vld [vmem:[%s1270_s1 + $0x1a8] sm:$0xff]   ;;  %v1007_v63 = vld [vmem:[%s1270_s1 + $0x1f0] sm:$0xff]  }
  0x15   :  { %888 = vmatpush3.bf16.msra.mxu1 %v965_v19  ;;  %867 = vmatprep.subr.bf16.mxu0 %v966_v20  ;;  %v1008_v0 = vld [vmem:[%s1270_s1 + $0x130] sm:$0xff]   ;;  %v1010_v2 = vld [vmem:[%s1270_s1 + $0x178] sm:$0xff]   ;;  %v781_v14 = vld [vmem:[%s1272_s2] ss:$0 sm:$0xff] }
  0x16   :  { %889 = vmatprep.subr.bf16.mxu1 %v967_v21  ;;  %v1009_v1 = vld [vmem:[%s1270_s1 + $0x1b0] sm:$0xff]   ;;  %v1011_v3 = vld [vmem:[%s1270_s1 + $0x1f8] sm:$0xff]  }
  0x17   :  { %v1012_v4 = vld [vmem:[%s1270_s1 + $0x138] sm:$0xff]   ;;  %v23_v6 = vld [vmem:[%s1271_s0 + $0x10] sm:$0xff] }
  0x18   :  { %868 = vmatpush3.bf16.msra.mxu0 %v968_v22  ;;  %v1013_v5 = vld [vmem:[%s1270_s1 + $0x1b8] sm:$0xff]   ;;  %v786_v7 = vcombine.low %v23_v6, %v23_v6  ;;  %v787_v8 = vcombine.high %v23_v6, %v23_v6 }
  0x19   :  { %890 = vmatpush3.bf16.msra.mxu1 %v969_v23  ;;  %869 = vmatprep.subr.bf16.mxu0 %v970_v24  ;;  %v24_v9 = vld [vmem:[%s1271_s0 + $0x18] sm:$0xff] }
  0x1a   :  { %891 = vmatprep.subr.bf16.mxu1 %v971_v25  ;;  %v788_v10 = vcombine.low %v24_v9, %v24_v9  ;;  %v789_v11 = vcombine.high %v24_v9, %v24_v9 }
  0x1c   :  { %870 = vmatpush3.bf16.msra.mxu0 %v972_v26 }
  0x1d   :  { %892 = vmatpush3.bf16.msra.mxu1 %v973_v27  ;;  %871 = vmatprep.subr.bf16.mxu0 %v974_v28 }
  0x1e   :  { %893 = vmatprep.subr.bf16.mxu1 %v975_v29 }
  0x20   :  { %872 = vmatpush3.bf16.msra.mxu0 %v976_v30 }
  0x21   :  { %894 = vmatpush3.bf16.msra.mxu1 %v977_v31  ;;  %901 = vmatprep.subr.bf16.mxu0 %v982_v38 }
  0x22   :  { %923 = vmatprep.subr.bf16.mxu1 %v983_v39 }
  0x23   :  { %605 = vmatmul.mubr.bf16.vlgmr.msra.gmra.mrb[0].mxu0 %v782_v34 }
  0x24   :  { %645 = vmatmul.mubr.bf16.vlgmr.msra.gmra.mrb[0].mxu1 %v784_v36  ;;  %902 = vmatpush3.bf16.msra.mxu0 %v984_v40 }
  0x25   :  { %924 = vmatpush3.bf16.msra.mxu1 %v985_v41  ;;  %903 = vmatprep.subr.bf16.mxu0 %v986_v42 }
  0x26   :  { %925 = vmatprep.subr.bf16.mxu1 %v987_v43  ;;  %684 = vmatprep.mubr.bf16.mxu0 %v787_v8 }
  0x27   :  { %724 = vmatprep.mubr.bf16.mxu1 %v789_v11 }
  0x28   :  { %904 = vmatpush3.bf16.msra.mxu0 %v988_v44 }
  0x29   :  { %926 = vmatpush3.bf16.msra.mxu1 %v989_v45  ;;  %905 = vmatprep.subr.bf16.mxu0 %v990_v46 }
  0x2a   :  { %927 = vmatprep.subr.bf16.mxu1 %v991_v47 }
  0x2c   :  { %906 = vmatpush3.bf16.msra.mxu0 %v992_v48 }
  0x2d   :  { %928 = vmatpush3.bf16.msra.mxu1 %v993_v49  ;;  %907 = vmatprep.subr.bf16.mxu0 %v994_v50 }
  0x2e   :  { %929 = vmatprep.subr.bf16.mxu1 %v995_v51 }
  0x30   :  { %908 = vmatpush3.bf16.msra.mxu0 %v996_v52 }
  0x31   :  { %930 = vmatpush3.bf16.msra.mxu1 %v997_v53  ;;  %909 = vmatprep.subr.bf16.mxu0 %v998_v54 }
  0x32   :  { %931 = vmatprep.subr.bf16.mxu1 %v999_v55 }
  0x34   :  { %910 = vmatpush3.bf16.msra.mxu0 %v1000_v56  ;;  %v854_v56 = vld [vmem:[%s1273_s3] ss:$0 sm:$0xff] }
  0x35   :  { %932 = vmatpush3.bf16.msra.mxu1 %v1001_v57  ;;  %911 = vmatprep.subr.bf16.mxu0 %v1002_v58  ;;  %v855_v58 = vld [vmem:[%s1274_s4] ss:$0 sm:$0xff] }
  0x36   :  { %933 = vmatprep.subr.bf16.mxu1 %v1003_v59 }
  0x38   :  { %912 = vmatpush3.bf16.msra.mxu0 %v1004_v60 }
  0x39   :  { %934 = vmatpush3.bf16.msra.mxu1 %v1005_v61  ;;  %913 = vmatprep.subr.bf16.mxu0 %v1006_v62 }
  0x3a   :  { %935 = vmatprep.subr.bf16.mxu1 %v1007_v63 }
  0x3c   :  { %914 = vmatpush3.bf16.msra.mxu0 %v1008_v0 }
  0x3d   :  { %936 = vmatpush3.bf16.msra.mxu1 %v1009_v1  ;;  %915 = vmatprep.subr.bf16.mxu0 %v1010_v2 }
  0x3e   :  { %937 = vmatprep.subr.bf16.mxu1 %v1011_v3 }
  0x40   :  { %916 = vmatpush3.bf16.msra.mxu0 %v1012_v4 }
  0x41   :  { %938 = vmatpush3.bf16.msra.mxu1 %v1013_v5 }
  0x43   :  { %685 = vmatmul.mubr.bf16.vlgmr.msra.gmra.mrb[4].mxu0 %v786_v7 }
  0x44   :  { %725 = vmatmul.mubr.bf16.vlgmr.msra.gmra.mrb[4].mxu1 %v788_v10 }
  0xf6   :  { %v873_v12 = vpop.f32.mrb[0].mxu0 }
  0xf7   :  { %v895_v13 = vpop.f32.mrb[0].mxu1  ;;  %v874_v15 = vpop.f32.mrb[1].mxu0 }
  0xf8   :  { %v896_v16 = vpop.f32.mrb[1].mxu1  ;;  %v875_v17 = vadd.f32 %v874_v15, %v873_v12  ;;  %v876_v19 = vpop.f32.mrb[2].mxu0 }
  0xf9   :  { %v897_v18 = vadd.f32 %v896_v16, %v895_v13  ;;  %v898_v20 = vpop.f32.mrb[2].mxu1  ;;  %v877_v21 = vpop.f32.mrb[3].mxu0 }
  0xfa   :  { %v899_v22 = vpop.f32.mrb[3].mxu1  ;;  %v607_v23 = vadd.f32 %v875_v17, %v781_v14 }
  0xfc   :  { %v647_v24 = vadd.f32 %v897_v18, %v607_v23 }
 0x116   :  { %v917_v25 = vpop.f32.mrb[4].mxu0 }
 0x117   :  { %v939_v26 = vpop.f32.mrb[4].mxu1  ;;  %v918_v27 = vpop.f32.mrb[5].mxu0 }
 0x118   :  { %v940_v28 = vpop.f32.mrb[5].mxu1  ;;  %v919_v29 = vadd.f32 %v918_v27, %v917_v25  ;;  %v920_v31 = vpop.f32.mrb[6].mxu0 }
 0x119   :  { %v941_v30 = vadd.f32 %v940_v28, %v939_v26  ;;  %v942_v32 = vpop.f32.mrb[6].mxu1  ;;  %v921_v33 = vpop.f32.mrb[7].mxu0 }
 0x11a   :  { %v943_v34 = vpop.f32.mrb[7].mxu1  ;;  %v687_v35 = vadd.f32 %v919_v29, %v647_v24 }
 0x11c   :  { %v727_v36 = vadd.f32 %v941_v30, %v687_v35 }
 0x11e   :  { %v732_v37 = vmax.f32 %v727_v36, 0.0 }
 0x120   :  { %v733_v38 = vrot.slane %v732_v37, 4 }
 0x122   :  { %v734_v39 = vadd.f32 %v733_v38, %v732_v37 }
 0x124   :  { %v735_v40 = vrot.slane %v734_v39, 2 }
 0x126   :  { %v736_v41 = vadd.f32 %v735_v40, %v734_v39 }
 0x128   :  { %v737_v42 = vrot.slane %v736_v41, 1 }
 0x12a   :  { %v738_v43 = vadd.f32 %v737_v42, %v736_v41 }
 0x12c   :  { %v740_v44 = vmul.f32 0.125, %v738_v43 }
 0x12e   :  { %v741_v45 = vsub.f32 %v732_v37, %v740_v44 }
 0x130   :  { %v742_v46 = vmul.f32 %v741_v45, %v741_v45 }
 0x132   :  { %v743_v47 = vrot.slane %v742_v46, 4 }
 0x134   :  { %v744_v48 = vadd.f32 %v743_v47, %v742_v46 }
 0x136   :  { %v745_v49 = vrot.slane %v744_v48, 2 }
 0x138   :  { %v746_v50 = vadd.f32 %v745_v49, %v744_v48 }
 0x13a   :  { %v747_v51 = vrot.slane %v746_v50, 1 }
 0x13c   :  { %v748_v52 = vadd.f32 %v747_v51, %v746_v50 }
 0x13e   :  { %v749_v53 = vmul.f32 0.125, %v748_v52 }
 0x140   :  { %v750_v54 = vadd.f32 1e-05, %v749_v53 }
 0x142   :  { %1018 = vrsqrt.f32 %v750_v54 }
 0x14c   :  { %v1019_v55 = vpop.eup %1018 }
 0x14d   :  { %v752_v57 = vmul.f32 %v1019_v55, %v741_v45 }
 0x14f   :  { %v760_v59 = vmul.f32 %v854_v56, %v752_v57 }
 0x151   :  { %v768_v60 = vadd.f32 %v855_v58, %v760_v59 }
 0x153   :  { %v856_v61 = vmul.f32 -1.442695, %v768_v60 }
 0x155   :  { %1020 = vpow2.f32 %v856_v61 }
 0x15f   :  { %v1021_v62 = vpop.eup %1020 }
 0x160   :  { %v772_v63 = vadd.f32 1.0, %v1021_v62 }
 0x162   :  { %1022 = vrcp.f32 %v772_v63 }
 0x16c   :  { %v1023_v0 = vpop.eup %1022 }
 0x16d   :  { %v945_v1 = vround.rtne.f32 %v1023_v0 }
 0x16f   :  { %776 = vst [vmem:[%s1275_s5] sm:$0xff] %v945_v1 }

// kernel: autoencoder_forward.9
= control target key start
LH: loop header
LB: loop body
LE: loop exit
PB: predicated region body
PF: predicated region fallthrough
CT: control target
= control target key end

     0   :  { %s1402_s1 = inlined_call_operand.vmem [shape: bf16[4,256,128], index: 1, kind: input, shape index: {}]   ;;  %s1403_s0 = inlined_call_operand.vmem [shape: bf16[4,8,256], index: 0, kind: input, shape index: {}]   ;;  %s1404_s2 = inlined_call_operand.vmem [shape: f32[1,128], index: 2, kind: input, shape index: {}]   ;;  %s1405_s3 = inlined_call_operand.vmem [shape: f32[1,128], index: 3, kind: input, shape index: {}]   ;;  %s1406_s4 = inlined_call_operand.vmem [shape: f32[1,128], index: 4, kind: input, shape index: {}]   ;;  %s1407_s5 = inlined_call_operand.vmem [shape: f32[32,128], index: 5, kind: output, shape index: {}]  }
   0x1   :  { %v1073_v0 = vld [vmem:[%s1402_s1 + $0x40] sm:$0xff]   ;;  %v1077_v4 = vld [vmem:[%s1402_s1 + $0x48] sm:$0xff]   ;;  %v1081_v8 = vld [vmem:[%s1402_s1 + $0x50] sm:$0xff]  }
   0x2   :  { %v1074_v1 = vld [vmem:[%s1402_s1 + $0xc0] sm:$0xff]   ;;  %985 = vmatprep.subr.bf16.mxu0 %v1073_v0  ;;  %v1078_v5 = vld [vmem:[%s1402_s1 + $0xc8] sm:$0xff]   ;;  %v1082_v9 = vld [vmem:[%s1402_s1 + $0xd0] sm:$0xff]  }
   0x3   :  { %v1075_v2 = vld [vmem:[%s1402_s1] sm:$0xff]   ;;  %1007 = vmatprep.subr.bf16.mxu1 %v1074_v1  ;;  %v1079_v6 = vld [vmem:[%s1402_s1 + $0x8] sm:$0xff]   ;;  %v1083_v10 = vld [vmem:[%s1402_s1 + $0x10] sm:$0xff]  }
   0x4   :  { %v1076_v3 = vld [vmem:[%s1402_s1 + $0x80] sm:$0xff]   ;;  %986 = vmatpush3.bf16.msra.mxu0 %v1075_v2  ;;  %v1080_v7 = vld [vmem:[%s1402_s1 + $0x88] sm:$0xff]   ;;  %v1084_v11 = vld [vmem:[%s1402_s1 + $0x90] sm:$0xff]  }
   0x5   :  { %1008 = vmatpush3.bf16.msra.mxu1 %v1076_v3  ;;  %987 = vmatprep.subr.bf16.mxu0 %v1077_v4  ;;  %v1085_v12 = vld [vmem:[%s1402_s1 + $0x58] sm:$0xff]   ;;  %v1089_v16 = vld [vmem:[%s1402_s1 + $0x60] sm:$0xff]   ;;  %v1093_v20 = vld [vmem:[%s1402_s1 + $0x68] sm:$0xff]  }
   0x6   :  { %1009 = vmatprep.subr.bf16.mxu1 %v1078_v5  ;;  %v1086_v13 = vld [vmem:[%s1402_s1 + $0xd8] sm:$0xff]   ;;  %v1090_v17 = vld [vmem:[%s1402_s1 + $0xe0] sm:$0xff]   ;;  %v1094_v21 = vld [vmem:[%s1402_s1 + $0xe8] sm:$0xff]  }
   0x7   :  { %v1087_v14 = vld [vmem:[%s1402_s1 + $0x18] sm:$0xff]   ;;  %v1091_v18 = vld [vmem:[%s1402_s1 + $0x20] sm:$0xff]   ;;  %v1095_v22 = vld [vmem:[%s1402_s1 + $0x28] sm:$0xff]  }
   0x8   :  { %988 = vmatpush3.bf16.msra.mxu0 %v1079_v6  ;;  %v1088_v15 = vld [vmem:[%s1402_s1 + $0x98] sm:$0xff]   ;;  %v1092_v19 = vld [vmem:[%s1402_s1 + $0xa0] sm:$0xff]   ;;  %v1096_v23 = vld [vmem:[%s1402_s1 + $0xa8] sm:$0xff]  }
   0x9   :  { %1010 = vmatpush3.bf16.msra.mxu1 %v1080_v7  ;;  %989 = vmatprep.subr.bf16.mxu0 %v1081_v8  ;;  %v1097_v24 = vld [vmem:[%s1402_s1 + $0x70] sm:$0xff]   ;;  %v1101_v28 = vld [vmem:[%s1402_s1 + $0x78] sm:$0xff]   ;;  %v21_v32 = vld [vmem:[%s1403_s0] sm:$0xff] }
   0xa   :  { %1011 = vmatprep.subr.bf16.mxu1 %v1082_v9  ;;  %v1098_v25 = vld [vmem:[%s1402_s1 + $0xf0] sm:$0xff]   ;;  %v1102_v29 = vld [vmem:[%s1402_s1 + $0xf8] sm:$0xff]   ;;  %v829_v33 = vld [vmem:[%s1403_s0 + $0x8] sm:$0xff]  ;;  %v811_v34 = vcombine.low %v21_v32, %v21_v32  ;;  %v812_v35 = vcombine.high %v21_v32, %v21_v32 }
   0xb   :  { %v1099_v26 = vld [vmem:[%s1402_s1 + $0x30] sm:$0xff]   ;;  %v1103_v30 = vld [vmem:[%s1402_s1 + $0x38] sm:$0xff]   ;;  %v862_v36 = vcombine.low %v829_v33, %v829_v33  ;;  %v863_v37 = vcombine.high %v829_v33, %v829_v33  ;;  %v1109_v38 = vld [vmem:[%s1402_s1 + $0x140] sm:$0xff]  }
   0xc   :  { %990 = vmatpush3.bf16.msra.mxu0 %v1083_v10  ;;  %v1100_v27 = vld [vmem:[%s1402_s1 + $0xb0] sm:$0xff]   ;;  %v1104_v31 = vld [vmem:[%s1402_s1 + $0xb8] sm:$0xff]   ;;  %v1110_v39 = vld [vmem:[%s1402_s1 + $0x1c0] sm:$0xff]   ;;  %189 = vmatprep.mubr.bf16.mxu0 %v812_v35 }
   0xd   :  { %1012 = vmatpush3.bf16.msra.mxu1 %v1084_v11  ;;  %991 = vmatprep.subr.bf16.mxu0 %v1085_v12  ;;  %v1111_v40 = vld [vmem:[%s1402_s1 + $0x100] sm:$0xff]   ;;  %v1113_v42 = vld [vmem:[%s1402_s1 + $0x148] sm:$0xff]   ;;  %v1117_v46 = vld [vmem:[%s1402_s1 + $0x150] sm:$0xff]  }
   0xe   :  { %1013 = vmatprep.subr.bf16.mxu1 %v1086_v13  ;;  %367 = vmatprep.mubr.bf16.mxu1 %v863_v37  ;;  %v1112_v41 = vld [vmem:[%s1402_s1 + $0x180] sm:$0xff]   ;;  %v1114_v43 = vld [vmem:[%s1402_s1 + $0x1c8] sm:$0xff]   ;;  %v1118_v47 = vld [vmem:[%s1402_s1 + $0x1d0] sm:$0xff]  }
   0xf   :  { %v1115_v44 = vld [vmem:[%s1402_s1 + $0x108] sm:$0xff]   ;;  %v1119_v48 = vld [vmem:[%s1402_s1 + $0x110] sm:$0xff]   ;;  %v1121_v50 = vld [vmem:[%s1402_s1 + $0x158] sm:$0xff]  }
  0x10   :  { %992 = vmatpush3.bf16.msra.mxu0 %v1087_v14  ;;  %v1116_v45 = vld [vmem:[%s1402_s1 + $0x188] sm:$0xff]   ;;  %v1120_v49 = vld [vmem:[%s1402_s1 + $0x190] sm:$0xff]   ;;  %v1122_v51 = vld [vmem:[%s1402_s1 + $0x1d8] sm:$0xff]  }
  0x11   :  { %1014 = vmatpush3.bf16.msra.mxu1 %v1088_v15  ;;  %993 = vmatprep.subr.bf16.mxu0 %v1089_v16  ;;  %v1123_v52 = vld [vmem:[%s1402_s1 + $0x118] sm:$0xff]   ;;  %v1125_v54 = vld [vmem:[%s1402_s1 + $0x160] sm:$0xff]   ;;  %v1129_v58 = vld [vmem:[%s1402_s1 + $0x168] sm:$0xff]  }
  0x12   :  { %1015 = vmatprep.subr.bf16.mxu1 %v1090_v17  ;;  %v1124_v53 = vld [vmem:[%s1402_s1 + $0x198] sm:$0xff]   ;;  %v1126_v55 = vld [vmem:[%s1402_s1 + $0x1e0] sm:$0xff]   ;;  %v1130_v59 = vld [vmem:[%s1402_s1 + $0x1e8] sm:$0xff]  }
  0x13   :  { %v1127_v56 = vld [vmem:[%s1402_s1 + $0x120] sm:$0xff]   ;;  %v1131_v60 = vld [vmem:[%s1402_s1 + $0x128] sm:$0xff]   ;;  %v1133_v62 = vld [vmem:[%s1402_s1 + $0x170] sm:$0xff]  }
  0x14   :  { %994 = vmatpush3.bf16.msra.mxu0 %v1091_v18  ;;  %v1128_v57 = vld [vmem:[%s1402_s1 + $0x1a0] sm:$0xff]   ;;  %v1132_v61 = vld [vmem:[%s1402_s1 + $0x1a8] sm:$0xff]   ;;  %v1134_v63 = vld [vmem:[%s1402_s1 + $0x1f0] sm:$0xff]  }
  0x15   :  { %1016 = vmatpush3.bf16.msra.mxu1 %v1092_v19  ;;  %995 = vmatprep.subr.bf16.mxu0 %v1093_v20  ;;  %v1135_v0 = vld [vmem:[%s1402_s1 + $0x130] sm:$0xff]   ;;  %v1137_v2 = vld [vmem:[%s1402_s1 + $0x178] sm:$0xff]   ;;  %v982_v15 = vld [vmem:[%s1404_s2] ss:$0 sm:$0xff] }
  0x16   :  { %1017 = vmatprep.subr.bf16.mxu1 %v1094_v21  ;;  %v1136_v1 = vld [vmem:[%s1402_s1 + $0x1b0] sm:$0xff]   ;;  %v1138_v3 = vld [vmem:[%s1402_s1 + $0x1f8] sm:$0xff]  }
  0x17   :  { %v1139_v4 = vld [vmem:[%s1402_s1 + $0x138] sm:$0xff]   ;;  %v880_v6 = vld [vmem:[%s1403_s0 + $0x10] sm:$0xff] }
  0x18   :  { %996 = vmatpush3.bf16.msra.mxu0 %v1095_v22  ;;  %v1140_v5 = vld [vmem:[%s1402_s1 + $0x1b8] sm:$0xff]   ;;  %v913_v7 = vcombine.low %v880_v6, %v880_v6  ;;  %v914_v8 = vcombine.high %v880_v6, %v880_v6 }
  0x19   :  { %1018 = vmatpush3.bf16.msra.mxu1 %v1096_v23  ;;  %997 = vmatprep.subr.bf16.mxu0 %v1097_v24  ;;  %v931_v9 = vld [vmem:[%s1403_s0 + $0x18] sm:$0xff] }
  0x1a   :  { %1019 = vmatprep.subr.bf16.mxu1 %v1098_v25  ;;  %v964_v10 = vcombine.low %v931_v9, %v931_v9  ;;  %v965_v11 = vcombine.high %v931_v9, %v931_v9 }
  0x1c   :  { %998 = vmatpush3.bf16.msra.mxu0 %v1099_v26 }
  0x1d   :  { %1020 = vmatpush3.bf16.msra.mxu1 %v1100_v27  ;;  %999 = vmatprep.subr.bf16.mxu0 %v1101_v28 }
  0x1e   :  { %1021 = vmatprep.subr.bf16.mxu1 %v1102_v29 }
  0x20   :  { %1000 = vmatpush3.bf16.msra.mxu0 %v1103_v30 }
  0x21   :  { %1022 = vmatpush3.bf16.msra.mxu1 %v1104_v31  ;;  %1029 = vmatprep.subr.bf16.mxu0 %v1109_v38 }
  0x22   :  { %1051 = vmatprep.subr.bf16.mxu1 %v1110_v39 }
  0x23   :  { %190 = vmatmul.mubr.bf16.vlgmr.msra.gmra.mrb[0].mxu0 %v811_v34 }
  0x24   :  { %368 = vmatmul.mubr.bf16.vlgmr.msra.gmra.mrb[0].mxu1 %v862_v36  ;;  %1030 = vmatpush3.bf16.msra.mxu0 %v1111_v40 }
  0x25   :  { %1052 = vmatpush3.bf16.msra.mxu1 %v1112_v41  ;;  %1031 = vmatprep.subr.bf16.mxu0 %v1113_v42 }
  0x26   :  { %1053 = vmatprep.subr.bf16.mxu1 %v1114_v43  ;;  %545 = vmatprep.mubr.bf16.mxu0 %v914_v8 }
  0x27   :  { %723 = vmatprep.mubr.bf16.mxu1 %v965_v11 }
  0x28   :  { %1032 = vmatpush3.bf16.msra.mxu0 %v1115_v44 }
  0x29   :  { %1054 = vmatpush3.bf16.msra.mxu1 %v1116_v45  ;;  %1033 = vmatprep.subr.bf16.mxu0 %v1117_v46 }
  0x2a   :  { %1055 = vmatprep.subr.bf16.mxu1 %v1118_v47 }
  0x2c   :  { %1034 = vmatpush3.bf16.msra.mxu0 %v1119_v48 }
  0x2d   :  { %1056 = vmatpush3.bf16.msra.mxu1 %v1120_v49  ;;  %1035 = vmatprep.subr.bf16.mxu0 %v1121_v50 }
  0x2e   :  { %1057 = vmatprep.subr.bf16.mxu1 %v1122_v51 }
  0x30   :  { %1036 = vmatpush3.bf16.msra.mxu0 %v1123_v52 }
  0x31   :  { %1058 = vmatpush3.bf16.msra.mxu1 %v1124_v53  ;;  %1037 = vmatprep.subr.bf16.mxu0 %v1125_v54 }
  0x32   :  { %1059 = vmatprep.subr.bf16.mxu1 %v1126_v55 }
  0x34   :  { %1038 = vmatpush3.bf16.msra.mxu0 %v1127_v56 }
  0x35   :  { %1060 = vmatpush3.bf16.msra.mxu1 %v1128_v57  ;;  %1039 = vmatprep.subr.bf16.mxu0 %v1129_v58 }
  0x36   :  { %1061 = vmatprep.subr.bf16.mxu1 %v1130_v59 }
  0x38   :  { %1040 = vmatpush3.bf16.msra.mxu0 %v1131_v60 }
  0x39   :  { %1062 = vmatpush3.bf16.msra.mxu1 %v1132_v61  ;;  %1041 = vmatprep.subr.bf16.mxu0 %v1133_v62 }
  0x3a   :  { %1063 = vmatprep.subr.bf16.mxu1 %v1134_v63 }
  0x3c   :  { %1042 = vmatpush3.bf16.msra.mxu0 %v1135_v0 }
  0x3d   :  { %1064 = vmatpush3.bf16.msra.mxu1 %v1136_v1  ;;  %1043 = vmatprep.subr.bf16.mxu0 %v1137_v2 }
  0x3e   :  { %1065 = vmatprep.subr.bf16.mxu1 %v1138_v3 }
  0x40   :  { %1044 = vmatpush3.bf16.msra.mxu0 %v1139_v4 }
  0x41   :  { %1066 = vmatpush3.bf16.msra.mxu1 %v1140_v5 }
  0x43   :  { %546 = vmatmul.mubr.bf16.vlgmr.msra.gmra.mrb[4].mxu0 %v913_v7  ;;  %v983_v7 = vld [vmem:[%s1405_s3] ss:$0 sm:$0xff] }
  0x44   :  { %724 = vmatmul.mubr.bf16.vlgmr.msra.gmra.mrb[4].mxu1 %v964_v10 }
  0xf6   :  { %v1001_v12 = vpop.f32.mrb[0].mxu0 }
  0xf7   :  { %v1023_v13 = vpop.f32.mrb[0].mxu1  ;;  %v1002_v14 = vpop.f32.mrb[1].mxu0 }
  0xf8   :  { %v1024_v16 = vpop.f32.mrb[1].mxu1  ;;  %v1003_v17 = vadd.f32 %v1002_v14, %v1001_v12  ;;  %v1004_v19 = vpop.f32.mrb[2].mxu0  ;;  %v984_v12 = vld [vmem:[%s1406_s4] ss:$0 sm:$0xff] }
  0xf9   :  { %v1025_v18 = vadd.f32 %v1024_v16, %v1023_v13  ;;  %v1026_v20 = vpop.f32.mrb[2].mxu1  ;;  %v1005_v21 = vpop.f32.mrb[3].mxu0 }
  0xfa   :  { %v1027_v22 = vpop.f32.mrb[3].mxu1  ;;  %v738_v23 = vadd.f32 %v1003_v17, %v982_v15 }
  0xfb   :  { %v739_v24 = vadd.f32 %v1025_v18, %v982_v15 }
  0xfc   :  { %v742_v25 = vmax.f32 %v738_v23, 0.0 }
  0xfd   :  { %v743_v26 = vmax.f32 %v739_v24, 0.0 }
  0xff   :  { %v746_v27 = vadd.f32 %v743_v26, %v742_v25 }
 0x116   :  { %v1045_v28 = vpop.f32.mrb[4].mxu0 }
 0x117   :  { %v1067_v29 = vpop.f32.mrb[4].mxu1  ;;  %v1046_v30 = vpop.f32.mrb[5].mxu0 }
 0x118   :  { %v1068_v31 = vpop.f32.mrb[5].mxu1  ;;  %v1047_v32 = vadd.f32 %v1046_v30, %v1045_v28  ;;  %v1048_v34 = vpop.f32.mrb[6].mxu0 }
 0x119   :  { %v1069_v33 = vadd.f32 %v1068_v31, %v1067_v29  ;;  %v1070_v35 = vpop.f32.mrb[6].mxu1  ;;  %v1049_v36 = vpop.f32.mrb[7].mxu0 }
 0x11a   :  { %v1071_v37 = vpop.f32.mrb[7].mxu1  ;;  %v740_v38 = vadd.f32 %v1047_v32, %v982_v15 }
 0x11b   :  { %v741_v39 = vadd.f32 %v1069_v33, %v982_v15 }
 0x11c   :  { %v744_v40 = vmax.f32 %v740_v38, 0.0 }
 0x11d   :  { %v745_v41 = vmax.f32 %v741_v39, 0.0 }
 0x11e   :  { %v747_v42 = vadd.f32 %v746_v27, %v744_v40 }
 0x120   :  { %v748_v43 = vadd.f32 %v747_v42, %v745_v41 }
 0x122   :  { %v749_v44 = vrot.slane %v748_v43, 4 }
 0x124   :  { %v750_v45 = vadd.f32 %v749_v44, %v748_v43 }
 0x126   :  { %v751_v46 = vrot.slane %v750_v45, 2 }
 0x128   :  { %v752_v47 = vadd.f32 %v751_v46, %v750_v45 }
 0x12a   :  { %v753_v48 = vrot.slane %v752_v47, 1 }
 0x12c   :  { %v754_v49 = vadd.f32 %v753_v48, %v752_v47 }
 0x12e   :  { %v756_v50 = vmul.f32 0.03125, %v754_v49 }
 0x130   :  { %v757_v51 = vsub.f32 %v742_v25, %v756_v50  ;;  %v758_v52 = vsub.f32 %v743_v26, %v756_v50  ;;  %v759_v53 = vsub.f32 %v744_v40, %v756_v50  ;;  %v760_v54 = vsub.f32 %v745_v41, %v756_v50 }
 0x132   :  { %v761_v55 = vmul.f32 %v757_v51, %v757_v51  ;;  %v762_v56 = vmul.f32 %v758_v52, %v758_v52  ;;  %v763_v57 = vmul.f32 %v759_v53, %v759_v53  ;;  %v764_v59 = vmul.f32 %v760_v54, %v760_v54 }
 0x134   :  { %v765_v58 = vadd.f32 %v762_v56, %v761_v55 }
 0x136   :  { %v766_v60 = vadd.f32 %v765_v58, %v763_v57 }
 0x138   :  { %v767_v61 = vadd.f32 %v766_v60, %v764_v59 }
 0x13a   :  { %v768_v62 = vrot.slane %v767_v61, 4 }
 0x13c   :  { %v769_v63 = vadd.f32 %v768_v62, %v767_v61 }
 0x13e   :  { %v770_v0 = vrot.slane %v769_v63, 2 }
 0x140   :  { %v771_v1 = vadd.f32 %v770_v0, %v769_v63 }
 0x142   :  { %v772_v2 = vrot.slane %v771_v1, 1 }
 0x144   :  { %v773_v3 = vadd.f32 %v772_v2, %v771_v1 }
 0x146   :  { %v774_v4 = vmul.f32 0.03125, %v773_v3 }
 0x148   :  { %v775_v5 = vadd.f32 1e-05, %v774_v4 }
 0x14a   :  { %1145 = vrsqrt.f32 %v775_v5 }
 0x154   :  { %v1146_v6 = vpop.eup %1145 }
 0x155   :  { %v777_v8 = vmul.f32 %v1146_v6, %v757_v51  ;;  %v778_v9 = vmul.f32 %v1146_v6, %v758_v52  ;;  %v779_v10 = vmul.f32 %v1146_v6, %v759_v53  ;;  %v780_v11 = vmul.f32 %v1146_v6, %v760_v54 }
 0x157   :  { %v788_v13 = vmul.f32 %v983_v7, %v777_v8  ;;  %v789_v14 = vmul.f32 %v983_v7, %v778_v9  ;;  %v790_v15 = vmul.f32 %v983_v7, %v779_v10  ;;  %v791_v16 = vmul.f32 %v983_v7, %v780_v11 }
 0x159   :  { %v799_v17 = vadd.f32 %v984_v12, %v788_v13  ;;  %v800_v18 = vadd.f32 %v984_v12, %v789_v14  ;;  %v801_v19 = vadd.f32 %v984_v12, %v790_v15  ;;  %v802_v20 = vadd.f32 %v984_v12, %v791_v16 }
 0x15b   :  { %803 = vst [vmem:[%s1407_s5] sm:$0xff] %v799_v17  ;;  %804 = vst [vmem:[%s1407_s5 + $0x8] sm:$0xff] %v800_v18 }
 0x15c   :  { %805 = vst [vmem:[%s1407_s5 + $0x10] sm:$0xff] %v801_v19  ;;  %806 = vst [vmem:[%s1407_s5 + $0x18] sm:$0xff] %v802_v20 }

// kernel: autoencoder_forward.10
= control target key start
LH: loop header
LB: loop body
LE: loop exit
PB: predicated region body
PF: predicated region fallthrough
CT: control target
= control target key end

     0   :  { %s1825_s1 = inlined_call_operand.vmem [shape: bf16[4,256,128], index: 1, kind: input, shape index: {}]   ;;  %s1826_s0 = inlined_call_operand.vmem [shape: bf16[4,32,256], index: 0, kind: input, shape index: {}]   ;;  %s1827_s2 = inlined_call_operand.vmem [shape: f32[1,128], index: 2, kind: input, shape index: {}]   ;;  %s1828_s3 = inlined_call_operand.vmem [shape: f32[1,128], index: 3, kind: input, shape index: {}]   ;;  %s1829_s4 = inlined_call_operand.vmem [shape: f32[1,128], index: 4, kind: input, shape index: {}]   ;;  %s1830_s5 = inlined_call_operand.vmem [shape: f32[128,128], index: 5, kind: output, shape index: {}]  }
   0x1   :  { %v1334_v0 = vld [vmem:[%s1825_s1 + $0x40] sm:$0xff]   ;;  %v1336_v2 = vld [vmem:[%s1825_s1 + $0x48] sm:$0xff]   ;;  %v1340_v6 = vld [vmem:[%s1825_s1 + $0x50] sm:$0xff]  }
   0x2   :  { %v1335_v1 = vld [vmem:[%s1825_s1] sm:$0xff]   ;;  %1222 = vmatprep.subr.bf16.mxu0 %v1334_v0  ;;  %v1337_v3 = vld [vmem:[%s1825_s1 + $0x8] sm:$0xff]   ;;  %v1341_v7 = vld [vmem:[%s1825_s1 + $0x10] sm:$0xff]  }
   0x3   :  { %1223 = vmatpush3.bf16.msra.mxu0 %v1335_v1  ;;  %v1338_v4 = vld [vmem:[%s1825_s1 + $0xc0] sm:$0xff]   ;;  %v1342_v8 = vld [vmem:[%s1825_s1 + $0xc8] sm:$0xff]   ;;  %v1344_v10 = vld [vmem:[%s1825_s1 + $0x58] sm:$0xff]  }
   0x4   :  { %1224 = vmatprep.subr.bf16.mxu0 %v1336_v2  ;;  %v1339_v5 = vld [vmem:[%s1825_s1 + $0x80] sm:$0xff]   ;;  %1250 = vmatprep.subr.bf16.mxu1 %v1338_v4  ;;  %v1343_v9 = vld [vmem:[%s1825_s1 + $0x88] sm:$0xff]   ;;  %v1345_v11 = vld [vmem:[%s1825_s1 + $0x18] sm:$0xff]  }
   0x5   :  { %1251 = vmatpush3.bf16.msra.mxu1 %v1339_v5  ;;  %v1346_v12 = vld [vmem:[%s1825_s1 + $0xd0] sm:$0xff]   ;;  %v1348_v14 = vld [vmem:[%s1825_s1 + $0x60] sm:$0xff]   ;;  %v1350_v16 = vld [vmem:[%s1825_s1 + $0xd8] sm:$0xff]  }
   0x6   :  { %1252 = vmatprep.subr.bf16.mxu1 %v1342_v8  ;;  %v1347_v13 = vld [vmem:[%s1825_s1 + $0x90] sm:$0xff]   ;;  %v1349_v15 = vld [vmem:[%s1825_s1 + $0x20] sm:$0xff]   ;;  %v1351_v17 = vld [vmem:[%s1825_s1 + $0x98] sm:$0xff]  }
   0x7   :  { %1225 = vmatpush3.bf16.msra.mxu0 %v1337_v3  ;;  %v1352_v18 = vld [vmem:[%s1825_s1 + $0x68] sm:$0xff]   ;;  %v1354_v20 = vld [vmem:[%s1825_s1 + $0xe0] sm:$0xff]   ;;  %v1356_v22 = vld [vmem:[%s1825_s1 + $0x70] sm:$0xff]  }
   0x8   :  { %1226 = vmatprep.subr.bf16.mxu0 %v1340_v6  ;;  %v1353_v19 = vld [vmem:[%s1825_s1 + $0x28] sm:$0xff]   ;;  %v1355_v21 = vld [vmem:[%s1825_s1 + $0xa0] sm:$0xff]   ;;  %v1357_v23 = vld [vmem:[%s1825_s1 + $0x30] sm:$0xff]  }
   0x9   :  { %1253 = vmatpush3.bf16.msra.mxu1 %v1343_v9  ;;  %v1358_v24 = vld [vmem:[%s1825_s1 + $0xe8] sm:$0xff]   ;;  %v1360_v26 = vld [vmem:[%s1825_s1 + $0x78] sm:$0xff]   ;;  %v1362_v28 = vld [vmem:[%s1825_s1 + $0xf0] sm:$0xff]  }
   0xa   :  { %1254 = vmatprep.subr.bf16.mxu1 %v1346_v12  ;;  %v1359_v25 = vld [vmem:[%s1825_s1 + $0xa8] sm:$0xff]   ;;  %v1361_v27 = vld [vmem:[%s1825_s1 + $0x38] sm:$0xff]   ;;  %v1363_v29 = vld [vmem:[%s1825_s1 + $0xb0] sm:$0xff]  }
   0xb   :  { %1227 = vmatpush3.bf16.msra.mxu0 %v1341_v7  ;;  %v1364_v30 = vld [vmem:[%s1826_s0] ss:$8 sps:$4 sm:$0xff]   ;;  %v1366_v31 = vld [vmem:[%s1826_s0 + $0x4] ss:$8 sps:$4 sm:$0xff]   ;;  %v1368_v33 = vld [vmem:[%s1825_s1 + $0xf8] sm:$0xff]  }
   0xc   :  { %1228 = vmatprep.subr.bf16.mxu0 %v1344_v10  ;;  %v1367_v32 = vld [vmem:[%s1825_s1 + $0x140] sm:$0xff]   ;;  %205 = vmatprep.mubr.bf16.mxu0 %v1366_v31  ;;  %v1370_v35 = vld [vmem:[%s1825_s1 + $0xb8] sm:$0xff]   ;;  %v1371_v36 = vld [vmem:[%s1825_s1 + $0x148] sm:$0xff]  }
   0xd   :  { %1255 = vmatpush3.bf16.msra.mxu1 %v1347_v13  ;;  %v1369_v34 = vld [vmem:[%s1825_s1 + $0x100] sm:$0xff]   ;;  %v1375_v39 = vld [vmem:[%s1825_s1 + $0x108] sm:$0xff]   ;;  %v1378_v42 = vld [vmem:[%s1826_s0 + $0x14] ss:$8 sps:$4 sm:$0xff]  }
   0xe   :  { %1256 = vmatprep.subr.bf16.mxu1 %v1350_v16  ;;  %v1372_v37 = vld [vmem:[%s1826_s0 + $0x20] ss:$8 sps:$4 sm:$0xff]   ;;  %v1374_v38 = vld [vmem:[%s1826_s0 + $0x24] ss:$8 sps:$4 sm:$0xff]   ;;  %v1380_v43 = vld [vmem:[%s1826_s0 + $0x10] ss:$8 sps:$4 sm:$0xff]  }
   0xf   :  { %1229 = vmatpush3.bf16.msra.mxu0 %v1345_v11  ;;  %408 = vmatprep.mubr.bf16.mxu1 %v1374_v38  ;;  %v1376_v40 = vld [vmem:[%s1825_s1 + $0x1c0] sm:$0xff]   ;;  %v1381_v44 = vld [vmem:[%s1825_s1 + $0x150] sm:$0xff]   ;;  %v1383_v46 = vld [vmem:[%s1825_s1 + $0x1c8] sm:$0xff]  }
  0x10   :  { %1230 = vmatprep.subr.bf16.mxu0 %v1348_v14  ;;  %v1377_v41 = vld [vmem:[%s1825_s1 + $0x180] sm:$0xff]   ;;  %v1382_v45 = vld [vmem:[%s1825_s1 + $0x110] sm:$0xff]   ;;  %v1384_v47 = vld [vmem:[%s1825_s1 + $0x188] sm:$0xff]  }
  0x11   :  { %1257 = vmatpush3.bf16.msra.mxu1 %v1351_v17  ;;  %v1385_v48 = vld [vmem:[%s1825_s1 + $0x158] sm:$0xff]   ;;  %v1387_v50 = vld [vmem:[%s1825_s1 + $0x1d0] sm:$0xff]   ;;  %v1392_v54 = vld [vmem:[%s1825_s1 + $0x160] sm:$0xff]  }
  0x12   :  { %1258 = vmatprep.subr.bf16.mxu1 %v1354_v20  ;;  %v1386_v49 = vld [vmem:[%s1825_s1 + $0x118] sm:$0xff]   ;;  %v1388_v51 = vld [vmem:[%s1825_s1 + $0x190] sm:$0xff]   ;;  %v1393_v55 = vld [vmem:[%s1825_s1 + $0x120] sm:$0xff]  }
  0x13   :  { %1231 = vmatpush3.bf16.msra.mxu0 %v1349_v15  ;;  %v1389_v52 = vld [vmem:[%s1826_s0 + $0x34] ss:$8 sps:$4 sm:$0xff]   ;;  %v1391_v53 = vld [vmem:[%s1826_s0 + $0x30] ss:$8 sps:$4 sm:$0xff]   ;;  %v1396_v58 = vld [vmem:[%s1825_s1 + $0x168] sm:$0xff]  }
  0x14   :  { %1232 = vmatprep.subr.bf16.mxu0 %v1352_v18  ;;  %v1394_v56 = vld [vmem:[%s1825_s1 + $0x1d8] sm:$0xff]   ;;  %v1397_v59 = vld [vmem:[%s1825_s1 + $0x128] sm:$0xff]   ;;  %v1398_v60 = vld [vmem:[%s1825_s1 + $0x1e0] sm:$0xff]  }
  0x15   :  { %1259 = vmatpush3.bf16.msra.mxu1 %v1355_v21  ;;  %v1395_v57 = vld [vmem:[%s1825_s1 + $0x198] sm:$0xff]   ;;  %v1399_v61 = vld [vmem:[%s1825_s1 + $0x1a0] sm:$0xff]   ;;  %v1400_v62 = vld [vmem:[%s1825_s1 + $0x170] sm:$0xff]  }
  0x16   :  { %1260 = vmatprep.subr.bf16.mxu1 %v1358_v24  ;;  %v1401_v63 = vld [vmem:[%s1825_s1 + $0x130] sm:$0xff]   ;;  %v1402_v0 = vld [vmem:[%s1825_s1 + $0x1e8] sm:$0xff]   ;;  %v1404_v2 = vld [vmem:[%s1825_s1 + $0x178] sm:$0xff]  }
  0x17   :  { %1233 = vmatpush3.bf16.msra.mxu0 %v1353_v19  ;;  %v1403_v1 = vld [vmem:[%s1825_s1 + $0x1a8] sm:$0xff]   ;;  %v1405_v3 = vld [vmem:[%s1825_s1 + $0x138] sm:$0xff]   ;;  %v1406_v4 = vld [vmem:[%s1825_s1 + $0x1f0] sm:$0xff]  }
  0x18   :  { %1234 = vmatprep.subr.bf16.mxu0 %v1356_v22  ;;  %v1407_v5 = vld [vmem:[%s1825_s1 + $0x1b0] sm:$0xff]   ;;  %v1408_v6 = vld [vmem:[%s1826_s0 + $0x40] ss:$8 sps:$4 sm:$0xff]   ;;  %v1410_v7 = vld [vmem:[%s1826_s0 + $0x44] ss:$8 sps:$4 sm:$0xff]  }
  0x19   :  { %1261 = vmatpush3.bf16.msra.mxu1 %v1359_v25  ;;  %v1411_v8 = vld [vmem:[%s1825_s1 + $0x1f8] sm:$0xff]   ;;  %v1413_v10 = vld [vmem:[%s1826_s0 + $0x60] ss:$8 sps:$4 sm:$0xff]   ;;  %v1415_v11 = vld [vmem:[%s1826_s0 + $0x64] ss:$8 sps:$4 sm:$0xff]  }
  0x1a   :  { %1262 = vmatprep.subr.bf16.mxu1 %v1362_v28  ;;  %v1412_v9 = vld [vmem:[%s1825_s1 + $0x1b8] sm:$0xff]   ;;  %v1697_v18 = vld [vmem:[%s1827_s2] ss:$0 sm:$0xff] }
  0x1b   :  { %1235 = vmatpush3.bf16.msra.mxu0 %v1357_v23  ;;  %v1416_v12 = vld [vmem:[%s1826_s0 + $0x54] ss:$8 sps:$4 sm:$0xff]   ;;  %v1418_v14 = vld [vmem:[%s1826_s0 + $0x50] ss:$8 sps:$4 sm:$0xff]  }
  0x1c   :  { %1236 = vmatprep.subr.bf16.mxu0 %v1360_v26  ;;  %v1419_v13 = vld [vmem:[%s1826_s0 + $0x74] ss:$8 sps:$4 sm:$0xff]   ;;  %v1421_v15 = vld [vmem:[%s1826_s0 + $0x70] ss:$8 sps:$4 sm:$0xff]  }
  0x1d   :  { %1263 = vmatpush3.bf16.msra.mxu1 %v1363_v29 }
  0x1e   :  { %1264 = vmatprep.subr.bf16.mxu1 %v1368_v33 }
  0x1f   :  { %1237 = vmatpush3.bf16.msra.mxu0 %v1361_v27 }
  0x20   :  { %1278 = vmatprep.subr.bf16.mxu0 %v1367_v32 }
  0x21   :  { %1265 = vmatpush3.bf16.msra.mxu1 %v1370_v35 }
  0x22   :  { %206 = vmatmul.mubr.bf16.vlgmr.msra.gmra.mrb[0].mxu0 %v1364_v30  ;;  %1306 = vmatprep.subr.bf16.mxu1 %v1376_v40 }
  0x23   :  { %1279 = vmatpush3.bf16.msra.mxu0 %v1369_v34  ;;  %213 = vmatprep.mubr.bf16.mxu0 %v1378_v42 }
  0x24   :  { %1280 = vmatprep.subr.bf16.mxu0 %v1371_v36  ;;  %409 = vmatmul.mubr.bf16.vlgmr.msra.gmra.mrb[0].mxu1 %v1372_v37 }
  0x25   :  { %1307 = vmatpush3.bf16.msra.mxu1 %v1377_v41  ;;  %416 = vmatprep.mubr.bf16.mxu1 %v1389_v52 }
  0x26   :  { %1308 = vmatprep.subr.bf16.mxu1 %v1383_v46 }
  0x27   :  { %1281 = vmatpush3.bf16.msra.mxu0 %v1375_v39 }
  0x28   :  { %1282 = vmatprep.subr.bf16.mxu0 %v1381_v44 }
  0x29   :  { %1309 = vmatpush3.bf16.msra.mxu1 %v1384_v47 }
  0x2a   :  { %214 = vmatmul.mubr.bf16.gmra.mrb[4].mxu0 %v1380_v43  ;;  %1310 = vmatprep.subr.bf16.mxu1 %v1387_v50 }
  0x2b   :  { %1283 = vmatpush3.bf16.msra.mxu0 %v1382_v45  ;;  %611 = vmatprep.mubr.bf16.mxu0 %v1410_v7 }
  0x2c   :  { %1284 = vmatprep.subr.bf16.mxu0 %v1385_v48  ;;  %417 = vmatmul.mubr.bf16.gmra.mrb[4].mxu1 %v1391_v53 }
  0x2d   :  { %1311 = vmatpush3.bf16.msra.mxu1 %v1388_v51  ;;  %814 = vmatprep.mubr.bf16.mxu1 %v1415_v11 }
  0x2e   :  { %1312 = vmatprep.subr.bf16.mxu1 %v1394_v56 }
  0x2f   :  { %1285 = vmatpush3.bf16.msra.mxu0 %v1386_v49 }
  0x30   :  { %1286 = vmatprep.subr.bf16.mxu0 %v1392_v54 }
  0x31   :  { %1313 = vmatpush3.bf16.msra.mxu1 %v1395_v57 }
  0x32   :  { %1314 = vmatprep.subr.bf16.mxu1 %v1398_v60 }
  0x33   :  { %1287 = vmatpush3.bf16.msra.mxu0 %v1393_v55 }
  0x34   :  { %1288 = vmatprep.subr.bf16.mxu0 %v1396_v58 }
  0x35   :  { %1315 = vmatpush3.bf16.msra.mxu1 %v1399_v61 }
  0x36   :  { %1316 = vmatprep.subr.bf16.mxu1 %v1402_v0 }
  0x37   :  { %1289 = vmatpush3.bf16.msra.mxu0 %v1397_v59 }
  0x38   :  { %1290 = vmatprep.subr.bf16.mxu0 %v1400_v62 }
  0x39   :  { %1317 = vmatpush3.bf16.msra.mxu1 %v1403_v1 }
  0x3a   :  { %1318 = vmatprep.subr.bf16.mxu1 %v1406_v4 }
  0x3b   :  { %1291 = vmatpush3.bf16.msra.mxu0 %v1401_v63 }
  0x3c   :  { %1292 = vmatprep.subr.bf16.mxu0 %v1404_v2 }
  0x3d   :  { %1319 = vmatpush3.bf16.msra.mxu1 %v1407_v5 }
  0x3e   :  { %1320 = vmatprep.subr.bf16.mxu1 %v1411_v8 }
  0x3f   :  { %1293 = vmatpush3.bf16.msra.mxu0 %v1405_v3 }
  0x41   :  { %1321 = vmatpush3.bf16.msra.mxu1 %v1412_v9 }
  0x42   :  { %612 = vmatmul.mubr.bf16.vlgmr.msra.gmra.mrb[8].mxu0 %v1408_v6 }
  0x43   :  { %619 = vmatprep.mubr.bf16.mxu0 %v1416_v12 }
  0x44   :  { %815 = vmatmul.mubr.bf16.vlgmr.msra.gmra.mrb[8].mxu1 %v1413_v10 }
  0x45   :  { %822 = vmatprep.mubr.bf16.mxu1 %v1419_v13 }
  0x4a   :  { %620 = vmatmul.mubr.bf16.gmra.mrb[12].mxu0 %v1418_v14 }
  0x4c   :  { %823 = vmatmul.mubr.bf16.gmra.mrb[12].mxu1 %v1421_v15 }
  0xf5   :  { %v1238_v16 = vpop.f32.mrb[0].mxu0 }
  0xf6   :  { %v1239_v17 = vpop.f32.mrb[1].mxu0 }
  0xf7   :  { %v1240_v19 = vadd.f32 %v1239_v17, %v1238_v16  ;;  %v1241_v20 = vpop.f32.mrb[2].mxu0  ;;  %v1266_v25 = vpop.f32.mrb[0].mxu1 }
  0xf8   :  { %v1242_v21 = vpop.f32.mrb[3].mxu0  ;;  %v1267_v26 = vpop.f32.mrb[1].mxu1 }
  0xf9   :  { %v1700_v22 = vadd.f32 %v1240_v19, %v1697_v18  ;;  %v1243_v23 = vadd.f32 %v1242_v21, %v1241_v20  ;;  %v1268_v29 = vadd.f32 %v1267_v26, %v1266_v25  ;;  %v1269_v30 = vpop.f32.mrb[2].mxu1 }
  0xfa   :  { %v1270_v31 = vpop.f32.mrb[3].mxu1 }
  0xfb   :  { %v1703_v24 = vadd.f32 %v1243_v23, %v1697_v18  ;;  %v854_v27 = vmax.f32 %v1700_v22, 0.0  ;;  %v1271_v34 = vadd.f32 %v1270_v31, %v1269_v30  ;;  %v1715_v41 = vadd.f32 %v1268_v29, %v1697_v18 }
  0xfd   :  { %v855_v28 = vmax.f32 %v1703_v24, 0.0  ;;  %v1244_v33 = vpop.f32.mrb[4].mxu0  ;;  %v1724_v45 = vadd.f32 %v1271_v34, %v1697_v18  ;;  %v858_v48 = vmax.f32 %v1715_v41, 0.0 }
  0xfe   :  { %v1245_v35 = vpop.f32.mrb[5].mxu0 }
  0xff   :  { %v870_v32 = vadd.f32 %v855_v28, %v854_v27  ;;  %v1246_v36 = vadd.f32 %v1245_v35, %v1244_v33  ;;  %v1247_v37 = vpop.f32.mrb[6].mxu0  ;;  %v1272_v47 = vpop.f32.mrb[4].mxu1  ;;  %v859_v53 = vmax.f32 %v1724_v45, 0.0 }
 0x100   :  { %v1248_v38 = vpop.f32.mrb[7].mxu0  ;;  %v1273_v50 = vpop.f32.mrb[5].mxu1 }
 0x101   :  { %v1712_v39 = vadd.f32 %v1246_v36, %v1697_v18  ;;  %v1249_v40 = vadd.f32 %v1248_v38, %v1247_v37  ;;  %v1274_v51 = vadd.f32 %v1273_v50, %v1272_v47  ;;  %v1275_v52 = vpop.f32.mrb[6].mxu1 }
 0x102   :  { %v1276_v55 = vpop.f32.mrb[7].mxu1 }
 0x103   :  { %v856_v42 = vmax.f32 %v1712_v39, 0.0  ;;  %v1719_v43 = vadd.f32 %v1249_v40, %v1697_v18  ;;  %v1734_v56 = vadd.f32 %v1274_v51, %v1697_v18  ;;  %v1277_v57 = vadd.f32 %v1276_v55, %v1275_v52 }
 0x105   :  { %v871_v44 = vadd.f32 %v870_v32, %v856_v42  ;;  %v857_v46 = vmax.f32 %v1719_v43, 0.0  ;;  %v860_v59 = vmax.f32 %v1734_v56, 0.0  ;;  %v1740_v60 = vadd.f32 %v1277_v57, %v1697_v18 }
 0x107   :  { %v872_v49 = vadd.f32 %v871_v44, %v857_v46  ;;  %v861_v62 = vmax.f32 %v1740_v60, 0.0 }
 0x109   :  { %v873_v54 = vadd.f32 %v872_v49, %v858_v48 }
 0x10b   :  { %v874_v58 = vadd.f32 %v873_v54, %v859_v53 }
 0x10d   :  { %v875_v61 = vadd.f32 %v874_v58, %v860_v59 }
 0x10f   :  { %v876_v63 = vadd.f32 %v875_v61, %v861_v62 }
 0x115   :  { %v1294_v0 = vpop.f32.mrb[8].mxu0 }
 0x116   :  { %v1295_v1 = vpop.f32.mrb[9].mxu0 }
 0x117   :  { %v1296_v2 = vadd.f32 %v1295_v1, %v1294_v0  ;;  %v1297_v3 = vpop.f32.mrb[10].mxu0  ;;  %v1322_v7 = vpop.f32.mrb[8].mxu1 }
 0x118   :  { %v1298_v4 = vpop.f32.mrb[11].mxu0  ;;  %v1323_v10 = vpop.f32.mrb[9].mxu1 }
 0x119   :  { %v846_v5 = vadd.f32 %v1296_v2, %v1697_v18  ;;  %v1299_v6 = vadd.f32 %v1298_v4, %v1297_v3  ;;  %v1324_v11 = vadd.f32 %v1323_v10, %v1322_v7  ;;  %v1325_v12 = vpop.f32.mrb[10].mxu1 }
 0x11a   :  { %v1326_v16 = vpop.f32.mrb[11].mxu1 }
 0x11b   :  { %v862_v8 = vmax.f32 %v846_v5, 0.0  ;;  %v847_v9 = vadd.f32 %v1299_v6, %v1697_v18  ;;  %v1327_v17 = vadd.f32 %v1326_v16, %v1325_v12  ;;  %v850_v31 = vadd.f32 %v1324_v11, %v1697_v18 }
 0x11d   :  { %v877_v13 = vadd.f32 %v876_v63, %v862_v8  ;;  %v863_v14 = vmax.f32 %v847_v9, 0.0  ;;  %v1300_v15 = vpop.f32.mrb[12].mxu0  ;;  %v851_v37 = vadd.f32 %v1327_v17, %v1697_v18  ;;  %v866_v50 = vmax.f32 %v850_v31, 0.0 }
 0x11e   :  { %v1301_v19 = vpop.f32.mrb[13].mxu0 }
 0x11f   :  { %v878_v20 = vadd.f32 %v877_v13, %v863_v14  ;;  %v1302_v21 = vadd.f32 %v1301_v19, %v1300_v15  ;;  %v1303_v23 = vpop.f32.mrb[14].mxu0  ;;  %v1328_v30 = vpop.f32.mrb[12].mxu1  ;;  %v867_v52 = vmax.f32 %v851_v37, 0.0 }
 0x120   :  { %v1304_v25 = vpop.f32.mrb[15].mxu0  ;;  %v1329_v34 = vpop.f32.mrb[13].mxu1 }
 0x121   :  { %v848_v26 = vadd.f32 %v1302_v21, %v1697_v18  ;;  %v1305_v29 = vadd.f32 %v1304_v25, %v1303_v23  ;;  %v1330_v35 = vadd.f32 %v1329_v34, %v1328_v30  ;;  %v1331_v36 = vpop.f32.mrb[14].mxu1 }
 0x122   :  { %v1332_v44 = vpop.f32.mrb[15].mxu1 }
 0x123   :  { %v864_v32 = vmax.f32 %v848_v26, 0.0  ;;  %v849_v33 = vadd.f32 %v1305_v29, %v1697_v18  ;;  %v852_v47 = vadd.f32 %v1330_v35, %v1697_v18  ;;  %v1333_v49 = vadd.f32 %v1332_v44, %v1331_v36 }
 0x125   :  { %v879_v38 = vadd.f32 %v878_v20, %v864_v32  ;;  %v865_v40 = vmax.f32 %v849_v33, 0.0  ;;  %v868_v55 = vmax.f32 %v852_v47, 0.0  ;;  %v853_v57 = vadd.f32 %v1333_v49, %v1697_v18 }
 0x127   :  { %v880_v51 = vadd.f32 %v879_v38, %v865_v40  ;;  %v869_v63 = vmax.f32 %v853_v57, 0.0 }
 0x129   :  { %v881_v54 = vadd.f32 %v880_v51, %v866_v50 }
 0x12b   :  { %v882_v58 = vadd.f32 %v881_v54, %v867_v52 }
 0x12d   :  { %v883_v61 = vadd.f32 %v882_v58, %v868_v55 }
 0x12f   :  { %v884_v0 = vadd.f32 %v883_v61, %v869_v63 }
 0x131   :  { %v885_v1 = vrot.slane %v884_v0, 4 }
 0x133   :  { %v886_v2 = vadd.f32 %v885_v1, %v884_v0 }
 0x135   :  { %v887_v3 = vrot.slane %v886_v2, 2 }
 0x137   :  { %v888_v4 = vadd.f32 %v887_v3, %v886_v2 }
 0x139   :  { %v889_v5 = vrot.slane %v888_v4, 1 }
 0x13b   :  { %v890_v6 = vadd.f32 %v889_v5, %v888_v4 }
 0x13d   :  { %v892_v7 = vmul.f32 0.0078125, %v890_v6 }
 0x13f   :  { %v893_v9 = vsub.f32 %v854_v27, %v892_v7  ;;  %v894_v10 = vsub.f32 %v855_v28, %v892_v7  ;;  %v895_v18 = vsub.f32 %v856_v42, %v892_v7  ;;  %v896_v11 = vsub.f32 %v857_v46, %v892_v7 }
 0x140   :  { %v897_v12 = vsub.f32 %v858_v48, %v892_v7  ;;  %v898_v13 = vsub.f32 %v859_v53, %v892_v7  ;;  %v899_v15 = vsub.f32 %v860_v59, %v892_v7  ;;  %v900_v22 = vsub.f32 %v861_v62, %v892_v7 }
 0x141   :  { %v901_v24 = vsub.f32 %v862_v8, %v892_v7  ;;  %v902_v27 = vsub.f32 %v863_v14, %v892_v7  ;;  %v903_v28 = vsub.f32 %v864_v32, %v892_v7  ;;  %v904_v39 = vsub.f32 %v865_v40, %v892_v7 }
 0x142   :  { %v905_v42 = vsub.f32 %v866_v50, %v892_v7  ;;  %v906_v16 = vsub.f32 %v867_v52, %v892_v7  ;;  %v907_v43 = vsub.f32 %v868_v55, %v892_v7  ;;  %v908_v46 = vsub.f32 %v869_v63, %v892_v7 }
 0x143   :  { %v909_v17 = vmul.f32 %v893_v9, %v893_v9  ;;  %v910_v41 = vmul.f32 %v894_v10, %v894_v10  ;;  %v911_v48 = vmul.f32 %v895_v18, %v895_v18  ;;  %v912_v45 = vmul.f32 %v896_v11, %v896_v11 }
 0x144   :  { %v913_v20 = vmul.f32 %v897_v12, %v897_v12  ;;  %v914_v59 = vmul.f32 %v898_v13, %v898_v13  ;;  %v915_v60 = vmul.f32 %v899_v15, %v899_v15  ;;  %v916_v8 = vmul.f32 %v900_v22, %v900_v22 }
 0x145   :  { %v925_v19 = vadd.f32 %v910_v41, %v909_v17  ;;  %v917_v23 = vmul.f32 %v901_v24, %v901_v24  ;;  %v918_v26 = vmul.f32 %v902_v27, %v902_v27  ;;  %v919_v30 = vmul.f32 %v903_v28, %v903_v28  ;;  %v1220_v17 = vld [vmem:[%s1828_s3] ss:$0 sm:$0xff] }
 0x146   :  { %v920_v32 = vmul.f32 %v904_v39, %v904_v39  ;;  %v921_v34 = vmul.f32 %v905_v42, %v905_v42  ;;  %v922_v36 = vmul.f32 %v906_v16, %v906_v16  ;;  %v923_v38 = vmul.f32 %v907_v43, %v907_v43 }
 0x147   :  { %v926_v53 = vadd.f32 %v925_v19, %v911_v48  ;;  %v924_v44 = vmul.f32 %v908_v46, %v908_v46 }
 0x149   :  { %v927_v56 = vadd.f32 %v926_v53, %v912_v45 }
 0x14b   :  { %v928_v21 = vadd.f32 %v927_v56, %v913_v20 }
 0x14d   :  { %v929_v62 = vadd.f32 %v928_v21, %v914_v59  ;;  %v1221_v21 = vld [vmem:[%s1829_s4] ss:$0 sm:$0xff] }
 0x14f   :  { %v930_v14 = vadd.f32 %v929_v62, %v915_v60 }
 0x151   :  { %v931_v25 = vadd.f32 %v930_v14, %v916_v8 }
 0x153   :  { %v932_v29 = vadd.f32 %v931_v25, %v917_v23 }
 0x155   :  { %v933_v31 = vadd.f32 %v932_v29, %v918_v26 }
 0x157   :  { %v934_v33 = vadd.f32 %v933_v31, %v919_v30 }
 0x159   :  { %v935_v35 = vadd.f32 %v934_v33, %v920_v32 }
 0x15b   :  { %v936_v37 = vadd.f32 %v935_v35, %v921_v34 }
 0x15d   :  { %v937_v40 = vadd.f32 %v936_v37, %v922_v36 }
 0x15f   :  { %v938_v47 = vadd.f32 %v937_v40, %v923_v38 }
 0x161   :  { %v939_v49 = vadd.f32 %v938_v47, %v924_v44 }
 0x163   :  { %v940_v50 = vrot.slane %v939_v49, 4 }
 0x165   :  { %v941_v51 = vadd.f32 %v940_v50, %v939_v49 }
 0x167   :  { %v942_v52 = vrot.slane %v941_v51, 2 }
 0x169   :  { %v943_v54 = vadd.f32 %v942_v52, %v941_v51 }
 0x16b   :  { %v944_v55 = vrot.slane %v943_v54, 1 }
 0x16d   :  { %v945_v57 = vadd.f32 %v944_v55, %v943_v54 }
 0x16f   :  { %v946_v58 = vmul.f32 0.0078125, %v945_v57 }
 0x171   :  { %v947_v61 = vadd.f32 1e-05, %v946_v58 }
 0x173   :  { %1422 = vrsqrt.f32 %v947_v61 }
 0x17d   :  { %v1423_v63 = vpop.eup %1422 }
 0x17e   :  { %v949_v0 = vmul.f32 %v1423_v63, %v893_v9  ;;  %v950_v1 = vmul.f32 %v1423_v63, %v894_v10  ;;  %v951_v2 = vmul.f32 %v1423_v63, %v895_v18  ;;  %v952_v3 = vmul.f32 %v1423_v63, %v896_v11 }
 0x17f   :  { %v953_v4 = vmul.f32 %v1423_v63, %v897_v12  ;;  %v954_v5 = vmul.f32 %v1423_v63, %v898_v13  ;;  %v955_v6 = vmul.f32 %v1423_v63, %v899_v15  ;;  %v956_v7 = vmul.f32 %v1423_v63, %v900_v22 }
 0x180   :  { %v957_v41 = vmul.f32 %v1423_v63, %v901_v24  ;;  %v958_v48 = vmul.f32 %v1423_v63, %v902_v27  ;;  %v959_v19 = vmul.f32 %v1423_v63, %v903_v28  ;;  %v960_v45 = vmul.f32 %v1423_v63, %v904_v39 }
 0x181   :  { %v961_v53 = vmul.f32 %v1423_v63, %v905_v42  ;;  %v962_v20 = vmul.f32 %v1423_v63, %v906_v16  ;;  %v963_v56 = vmul.f32 %v1423_v63, %v907_v43  ;;  %v964_v59 = vmul.f32 %v1423_v63, %v908_v46 }
 0x182   :  { %v972_v9 = vmul.f32 %v1220_v17, %v949_v0  ;;  %v973_v10 = vmul.f32 %v1220_v17, %v950_v1  ;;  %v974_v18 = vmul.f32 %v1220_v17, %v951_v2  ;;  %v975_v11 = vmul.f32 %v1220_v17, %v952_v3 }
 0x183   :  { %v976_v12 = vmul.f32 %v1220_v17, %v953_v4  ;;  %v977_v13 = vmul.f32 %v1220_v17, %v954_v5  ;;  %v978_v15 = vmul.f32 %v1220_v17, %v955_v6  ;;  %v979_v22 = vmul.f32 %v1220_v17, %v956_v7 }
 0x184   :  { %v980_v24 = vmul.f32 %v1220_v17, %v957_v41  ;;  %v981_v27 = vmul.f32 %v1220_v17, %v958_v48  ;;  %v982_v28 = vmul.f32 %v1220_v17, %v959_v19  ;;  %v983_v39 = vmul.f32 %v1220_v17, %v960_v45 }
 0x185   :  { %v984_v42 = vmul.f32 %v1220_v17, %v961_v53  ;;  %v985_v16 = vmul.f32 %v1220_v17, %v962_v20  ;;  %v986_v43 = vmul.f32 %v1220_v17, %v963_v56  ;;  %v987_v46 = vmul.f32 %v1220_v17, %v964_v59 }
 0x186   :  { %v995_v60 = vadd.f32 %v1221_v21, %v972_v9  ;;  %v996_v62 = vadd.f32 %v1221_v21, %v973_v10  ;;  %v997_v8 = vadd.f32 %v1221_v21, %v974_v18  ;;  %v998_v14 = vadd.f32 %v1221_v21, %v975_v11 }
 0x187   :  { %v999_v23 = vadd.f32 %v1221_v21, %v976_v12  ;;  %v1000_v25 = vadd.f32 %v1221_v21, %v977_v13  ;;  %v1001_v26 = vadd.f32 %v1221_v21, %v978_v15  ;;  %v1002_v29 = vadd.f32 %v1221_v21, %v979_v22 }
 0x188   :  { %v1003_v30 = vadd.f32 %v1221_v21, %v980_v24  ;;  %v1004_v31 = vadd.f32 %v1221_v21, %v981_v27  ;;  %v1005_v32 = vadd.f32 %v1221_v21, %v982_v28  ;;  %v1006_v33 = vadd.f32 %v1221_v21, %v983_v39  ;;  %1011 = vst [vmem:[%s1830_s5] sm:$0xff] %v995_v60 }
 0x189   :  { %1012 = vst [vmem:[%s1830_s5 + $0x8] sm:$0xff] %v996_v62  ;;  %1013 = vst [vmem:[%s1830_s5 + $0x10] sm:$0xff] %v997_v8  ;;  %v1007_v34 = vadd.f32 %v1221_v21, %v984_v42  ;;  %v1008_v35 = vadd.f32 %v1221_v21, %v985_v16  ;;  %v1009_v36 = vadd.f32 %v1221_v21, %v986_v43 }
 0x18a   :  { %1014 = vst [vmem:[%s1830_s5 + $0x18] sm:$0xff] %v998_v14  ;;  %v1010_v37 = vadd.f32 %v1221_v21, %v987_v46  ;;  %1015 = vst [vmem:[%s1830_s5 + $0x20] sm:$0xff] %v999_v23 }
 0x18b   :  { %1016 = vst [vmem:[%s1830_s5 + $0x28] sm:$0xff] %v1000_v25  ;;  %1017 = vst [vmem:[%s1830_s5 + $0x30] sm:$0xff] %v1001_v26 }
 0x18c   :  { %1018 = vst [vmem:[%s1830_s5 + $0x38] sm:$0xff] %v1002_v29  ;;  %1019 = vst [vmem:[%s1830_s5 + $0x40] sm:$0xff] %v1003_v30 }
 0x18d   :  { %1020 = vst [vmem:[%s1830_s5 + $0x48] sm:$0xff] %v1004_v31  ;;  %1021 = vst [vmem:[%s1830_s5 + $0x50] sm:$0xff] %v1005_v32 }
 0x18e   :  { %1022 = vst [vmem:[%s1830_s5 + $0x58] sm:$0xff] %v1006_v33  ;;  %1023 = vst [vmem:[%s1830_s5 + $0x60] sm:$0xff] %v1007_v34 }
 0x18f   :  { %1024 = vst [vmem:[%s1830_s5 + $0x68] sm:$0xff] %v1008_v35  ;;  %1025 = vst [vmem:[%s1830_s5 + $0x70] sm:$0xff] %v1009_v36 }
 0x190   :  { %1026 = vst [vmem:[%s1830_s5 + $0x78] sm:$0xff] %v1010_v37 }

// kernel: autoencoder_forward.11
= control target key start
LH: loop header
LB: loop body
LE: loop exit
PB: predicated region body
PF: predicated region fallthrough
CT: control target
= control target key end

     0   :  { %s2790_s1 = inlined_call_operand.vmem [shape: bf16[4,128,128], index: 1, kind: input, shape index: {}]   ;;  %s2791_s3 = inlined_call_operand.vmem [shape: f32[1,128], index: 3, kind: input, shape index: {}]   ;;  %s2792_s4 = inlined_call_operand.vmem [shape: f32[1,128], index: 4, kind: input, shape index: {}]   ;;  %s2793_s0 = inlined_call_operand.vmem [shape: bf16[4,128,128], index: 0, kind: input, shape index: {}]   ;;  %s2794_s2 = inlined_call_operand.vmem [shape: f32[1,128], index: 2, kind: input, shape index: {}]   ;;  %s2795_s5 = inlined_call_operand.vmem [shape: f32[512,128], index: 5, kind: output, shape index: {}]  }
   0x1   :  { %v1867_v0 = vld [vmem:[%s2790_s1] sm:$0xff]   ;;  %v1869_v2 = vld [vmem:[%s2790_s1 + $0x8] sm:$0xff]   ;;  %v1871_v4 = vld [vmem:[%s2790_s1 + $0x10] sm:$0xff]  }
   0x2   :  { %v1868_v1 = vld [vmem:[%s2790_s1 + $0x40] sm:$0xff]   ;;  %1739 = vmatprep.subr.bf16.mxu0 %v1867_v0  ;;  %v1870_v3 = vld [vmem:[%s2790_s1 + $0x48] sm:$0xff]   ;;  %v1872_v5 = vld [vmem:[%s2790_s1 + $0x50] sm:$0xff]  }
   0x3   :  { %1771 = vmatprep.subr.bf16.mxu1 %v1868_v1  ;;  %1740 = vmatpush3.bf16.msra.mxu0 %v1867_v0  ;;  %v1873_v6 = vld [vmem:[%s2790_s1 + $0x18] sm:$0xff]   ;;  %v1875_v8 = vld [vmem:[%s2790_s1 + $0x20] sm:$0xff]   ;;  %v1877_v10 = vld [vmem:[%s2790_s1 + $0x28] sm:$0xff]  }
   0x4   :  { %1772 = vmatpush3.bf16.msra.mxu1 %v1868_v1  ;;  %1741 = vmatprep.subr.bf16.mxu0 %v1869_v2  ;;  %v1874_v7 = vld [vmem:[%s2790_s1 + $0x58] sm:$0xff]   ;;  %v1876_v9 = vld [vmem:[%s2790_s1 + $0x60] sm:$0xff]   ;;  %v1878_v11 = vld [vmem:[%s2790_s1 + $0x68] sm:$0xff]  }
   0x5   :  { %1773 = vmatprep.subr.bf16.mxu1 %v1870_v3  ;;  %v1883_v12 = vld [vmem:[%s2793_s0] sm:$0xff]   ;;  %v1879_v14 = vld [vmem:[%s2790_s1 + $0x30] sm:$0xff]   ;;  %v1881_v16 = vld [vmem:[%s2790_s1 + $0x38] sm:$0xff]  }
   0x6   :  { %v1884_v13 = vld [vmem:[%s2793_s0 + $0x40] sm:$0xff]   ;;  %1755 = vmatprep.mubr.bf16.mxu0 %v1883_v12  ;;  %v1880_v15 = vld [vmem:[%s2790_s1 + $0x70] sm:$0xff]   ;;  %v1882_v17 = vld [vmem:[%s2790_s1 + $0x78] sm:$0xff]  }
   0x7   :  { %1742 = vmatpush3.bf16.msra.mxu0 %v1869_v2  ;;  %1787 = vmatprep.mubr.bf16.mxu1 %v1884_v13  ;;  %v1885_v18 = vld [vmem:[%s2793_s0 + $0x8] sm:$0xff]   ;;  %v1887_v19 = vld [vmem:[%s2790_s1 + $0x80] sm:$0xff]   ;;  %v1891_v24 = vld [vmem:[%s2793_s0 + $0x10] sm:$0xff]  }
   0x8   :  { %1774 = vmatpush3.bf16.msra.mxu1 %v1870_v3  ;;  %1743 = vmatprep.subr.bf16.mxu0 %v1871_v4  ;;  %v1888_v20 = vld [vmem:[%s2790_s1 + $0xc0] sm:$0xff]   ;;  %v1886_v21 = vld [vmem:[%s2793_s0 + $0x48] sm:$0xff]   ;;  %v1892_v25 = vld [vmem:[%s2793_s0 + $0x50] sm:$0xff]  }
   0x9   :  { %1775 = vmatprep.subr.bf16.mxu1 %v1872_v5  ;;  %v1889_v22 = vld [vmem:[%s2790_s1 + $0x88] sm:$0xff]   ;;  %v1893_v26 = vld [vmem:[%s2793_s0 + $0x18] sm:$0xff]   ;;  %v1895_v27 = vld [vmem:[%s2790_s1 + $0x90] sm:$0xff]  }
   0xa   :  { %v1890_v23 = vld [vmem:[%s2790_s1 + $0xc8] sm:$0xff]   ;;  %v1896_v28 = vld [vmem:[%s2790_s1 + $0xd0] sm:$0xff]   ;;  %v1894_v29 = vld [vmem:[%s2793_s0 + $0x58] sm:$0xff]  }
   0xb   :  { %1744 = vmatpush3.bf16.msra.mxu0 %v1871_v4  ;;  %v1897_v30 = vld [vmem:[%s2790_s1 + $0x98] sm:$0xff]   ;;  %v1899_v32 = vld [vmem:[%s2793_s0 + $0x20] sm:$0xff]   ;;  %v1901_v34 = vld [vmem:[%s2793_s0 + $0x28] sm:$0xff]  }
   0xc   :  { %1776 = vmatpush3.bf16.msra.mxu1 %v1872_v5  ;;  %1745 = vmatprep.subr.bf16.mxu0 %v1873_v6  ;;  %v1898_v31 = vld [vmem:[%s2790_s1 + $0xd8] sm:$0xff]   ;;  %v1900_v33 = vld [vmem:[%s2793_s0 + $0x60] sm:$0xff]   ;;  %v1902_v37 = vld [vmem:[%s2793_s0 + $0x68] sm:$0xff]  }
   0xd   :  { %1777 = vmatprep.subr.bf16.mxu1 %v1874_v7  ;;  %v1903_v35 = vld [vmem:[%s2790_s1 + $0xa0] sm:$0xff]   ;;  %v1905_v38 = vld [vmem:[%s2790_s1 + $0xa8] sm:$0xff]   ;;  %v1907_v40 = vld [vmem:[%s2793_s0 + $0x30] sm:$0xff]  }
   0xe   :  { %v1904_v36 = vld [vmem:[%s2790_s1 + $0xe0] sm:$0xff]   ;;  %v1906_v39 = vld [vmem:[%s2790_s1 + $0xe8] sm:$0xff]   ;;  %v1908_v41 = vld [vmem:[%s2793_s0 + $0x70] sm:$0xff]  }
   0xf   :  { %1746 = vmatpush3.bf16.msra.mxu0 %v1873_v6  ;;  %v1909_v42 = vld [vmem:[%s2793_s0 + $0x38] sm:$0xff]   ;;  %v1911_v43 = vld [vmem:[%s2790_s1 + $0xb0] sm:$0xff]   ;;  %v1915_v48 = vld [vmem:[%s2793_s0 + $0x80] sm:$0xff]  }
  0x10   :  { %1778 = vmatpush3.bf16.msra.mxu1 %v1874_v7  ;;  %1747 = vmatprep.subr.bf16.mxu0 %v1875_v8  ;;  %v1912_v44 = vld [vmem:[%s2790_s1 + $0xf0] sm:$0xff]   ;;  %v1910_v45 = vld [vmem:[%s2793_s0 + $0x78] sm:$0xff]   ;;  %v1916_v49 = vld [vmem:[%s2793_s0 + $0xc0] sm:$0xff]  }
  0x11   :  { %1779 = vmatprep.subr.bf16.mxu1 %v1876_v9  ;;  %v1913_v46 = vld [vmem:[%s2790_s1 + $0xb8] sm:$0xff]   ;;  %v1917_v50 = vld [vmem:[%s2793_s0 + $0x88] sm:$0xff]   ;;  %v1919_v52 = vld [vmem:[%s2793_s0 + $0x90] sm:$0xff]  }
  0x12   :  { %v1914_v47 = vld [vmem:[%s2790_s1 + $0xf8] sm:$0xff]   ;;  %v1918_v51 = vld [vmem:[%s2793_s0 + $0xc8] sm:$0xff]   ;;  %v1920_v53 = vld [vmem:[%s2793_s0 + $0xd0] sm:$0xff]  }
  0x13   :  { %1748 = vmatpush3.bf16.msra.mxu0 %v1875_v8  ;;  %v1921_v54 = vld [vmem:[%s2793_s0 + $0x98] sm:$0xff]   ;;  %v1923_v56 = vld [vmem:[%s2793_s0 + $0xa0] sm:$0xff]   ;;  %v1925_v58 = vld [vmem:[%s2793_s0 + $0xa8] sm:$0xff]  }
  0x14   :  { %1780 = vmatpush3.bf16.msra.mxu1 %v1876_v9  ;;  %1749 = vmatprep.subr.bf16.mxu0 %v1877_v10  ;;  %v1922_v55 = vld [vmem:[%s2793_s0 + $0xd8] sm:$0xff]   ;;  %v1924_v57 = vld [vmem:[%s2793_s0 + $0xe0] sm:$0xff]   ;;  %v1926_v59 = vld [vmem:[%s2793_s0 + $0xe8] sm:$0xff]  }
  0x15   :  { %1781 = vmatprep.subr.bf16.mxu1 %v1878_v11  ;;  %v1927_v60 = vld [vmem:[%s2793_s0 + $0xb0] sm:$0xff]   ;;  %v1929_v62 = vld [vmem:[%s2793_s0 + $0xb8] sm:$0xff]   ;;  %v2412_v0 = vld [vmem:[%s2794_s2] ss:$0 sm:$0xff] }
  0x16   :  { %v1928_v61 = vld [vmem:[%s2793_s0 + $0xf0] sm:$0xff]   ;;  %v1930_v63 = vld [vmem:[%s2793_s0 + $0xf8] sm:$0xff]  }
  0x17   :  { %1750 = vmatpush3.bf16.msra.mxu0 %v1877_v10 }
  0x18   :  { %1782 = vmatpush3.bf16.msra.mxu1 %v1878_v11  ;;  %1751 = vmatprep.subr.bf16.mxu0 %v1879_v14 }
  0x19   :  { %1783 = vmatprep.subr.bf16.mxu1 %v1880_v15 }
  0x1b   :  { %1752 = vmatpush3.bf16.msra.mxu0 %v1879_v14 }
  0x1c   :  { %1784 = vmatpush3.bf16.msra.mxu1 %v1880_v15  ;;  %1753 = vmatprep.subr.bf16.mxu0 %v1881_v16 }
  0x1d   :  { %1785 = vmatprep.subr.bf16.mxu1 %v1882_v17 }
  0x1f   :  { %1754 = vmatpush3.bf16.msra.mxu0 %v1881_v16 }
  0x20   :  { %1786 = vmatpush3.bf16.msra.mxu1 %v1882_v17  ;;  %1803 = vmatprep.subr.bf16.mxu0 %v1887_v19 }
  0x21   :  { %1835 = vmatprep.subr.bf16.mxu1 %v1888_v20 }
  0x22   :  { %1756 = vmatmul.mubr.bf16.vlgmr.msra.gmra.mrb[0].mxu0 %v1885_v18 }
  0x23   :  { %1788 = vmatmul.mubr.bf16.vlgmr.msra.gmra.mrb[0].mxu1 %v1886_v21  ;;  %1804 = vmatpush3.bf16.msra.mxu0 %v1887_v19 }
  0x24   :  { %1836 = vmatpush3.bf16.msra.mxu1 %v1888_v20  ;;  %1805 = vmatprep.subr.bf16.mxu0 %v1889_v22 }
  0x25   :  { %1837 = vmatprep.subr.bf16.mxu1 %v1890_v23  ;;  %1759 = vmatprep.mubr.bf16.mxu0 %v1891_v24 }
  0x26   :  { %1791 = vmatprep.mubr.bf16.mxu1 %v1892_v25 }
  0x27   :  { %1806 = vmatpush3.bf16.msra.mxu0 %v1889_v22 }
  0x28   :  { %1838 = vmatpush3.bf16.msra.mxu1 %v1890_v23  ;;  %1807 = vmatprep.subr.bf16.mxu0 %v1895_v27 }
  0x29   :  { %1839 = vmatprep.subr.bf16.mxu1 %v1896_v28 }
  0x2a   :  { %1760 = vmatmul.mubr.bf16.gmra.mrb[4].mxu0 %v1893_v26 }
  0x2b   :  { %1792 = vmatmul.mubr.bf16.gmra.mrb[4].mxu1 %v1894_v29  ;;  %1808 = vmatpush3.bf16.msra.mxu0 %v1895_v27 }
  0x2c   :  { %1840 = vmatpush3.bf16.msra.mxu1 %v1896_v28  ;;  %1809 = vmatprep.subr.bf16.mxu0 %v1897_v30 }
  0x2d   :  { %1841 = vmatprep.subr.bf16.mxu1 %v1898_v31  ;;  %1763 = vmatprep.mubr.bf16.mxu0 %v1899_v32 }
  0x2e   :  { %1795 = vmatprep.mubr.bf16.mxu1 %v1900_v33 }
  0x2f   :  { %1810 = vmatpush3.bf16.msra.mxu0 %v1897_v30 }
  0x30   :  { %1842 = vmatpush3.bf16.msra.mxu1 %v1898_v31  ;;  %1811 = vmatprep.subr.bf16.mxu0 %v1903_v35 }
  0x31   :  { %1843 = vmatprep.subr.bf16.mxu1 %v1904_v36 }
  0x32   :  { %1764 = vmatmul.mubr.bf16.gmra.mrb[8].mxu0 %v1901_v34 }
  0x33   :  { %1796 = vmatmul.mubr.bf16.gmra.mrb[8].mxu1 %v1902_v37  ;;  %1812 = vmatpush3.bf16.msra.mxu0 %v1903_v35 }
  0x34   :  { %1844 = vmatpush3.bf16.msra.mxu1 %v1904_v36  ;;  %1813 = vmatprep.subr.bf16.mxu0 %v1905_v38 }
  0x35   :  { %1845 = vmatprep.subr.bf16.mxu1 %v1906_v39  ;;  %1767 = vmatprep.mubr.bf16.mxu0 %v1907_v40 }
  0x36   :  { %1799 = vmatprep.mubr.bf16.mxu1 %v1908_v41 }
  0x37   :  { %1814 = vmatpush3.bf16.msra.mxu0 %v1905_v38 }
  0x38   :  { %1846 = vmatpush3.bf16.msra.mxu1 %v1906_v39  ;;  %1815 = vmatprep.subr.bf16.mxu0 %v1911_v43 }
  0x39   :  { %1847 = vmatprep.subr.bf16.mxu1 %v1912_v44 }
  0x3a   :  { %1768 = vmatmul.mubr.bf16.gmra.mrb[12].mxu0 %v1909_v42 }
  0x3b   :  { %1800 = vmatmul.mubr.bf16.gmra.mrb[12].mxu1 %v1910_v45  ;;  %1816 = vmatpush3.bf16.msra.mxu0 %v1911_v43 }
  0x3c   :  { %1848 = vmatpush3.bf16.msra.mxu1 %v1912_v44  ;;  %1817 = vmatprep.subr.bf16.mxu0 %v1913_v46 }
  0x3d   :  { %1849 = vmatprep.subr.bf16.mxu1 %v1914_v47  ;;  %1819 = vmatprep.mubr.bf16.mxu0 %v1915_v48 }
  0x3e   :  { %1851 = vmatprep.mubr.bf16.mxu1 %v1916_v49 }
  0x3f   :  { %1818 = vmatpush3.bf16.msra.mxu0 %v1913_v46 }
  0x40   :  { %1850 = vmatpush3.bf16.msra.mxu1 %v1914_v47 }
  0x42   :  { %1820 = vmatmul.mubr.bf16.vlgmr.msra.gmra.mrb[16].mxu0 %v1917_v50 }
  0x43   :  { %1852 = vmatmul.mubr.bf16.vlgmr.msra.gmra.mrb[16].mxu1 %v1918_v51  ;;  %1823 = vmatprep.mubr.bf16.mxu0 %v1919_v52 }
  0x44   :  { %1855 = vmatprep.mubr.bf16.mxu1 %v1920_v53 }
  0x4a   :  { %1824 = vmatmul.mubr.bf16.gmra.mrb[20].mxu0 %v1921_v54 }
  0x4b   :  { %1856 = vmatmul.mubr.bf16.gmra.mrb[20].mxu1 %v1922_v55  ;;  %1827 = vmatprep.mubr.bf16.mxu0 %v1923_v56 }
  0x4c   :  { %1859 = vmatprep.mubr.bf16.mxu1 %v1924_v57 }
  0x52   :  { %1828 = vmatmul.mubr.bf16.gmra.mrb[24].mxu0 %v1925_v58 }
  0x53   :  { %1860 = vmatmul.mubr.bf16.gmra.mrb[24].mxu1 %v1926_v59  ;;  %1831 = vmatprep.mubr.bf16.mxu0 %v1927_v60 }
  0x54   :  { %1863 = vmatprep.mubr.bf16.mxu1 %v1928_v61 }
  0x5a   :  { %1832 = vmatmul.mubr.bf16.gmra.mrb[28].mxu0 %v1929_v62 }
  0x5b   :  { %1864 = vmatmul.mubr.bf16.gmra.mrb[28].mxu1 %v1930_v63 }
  0xf5   :  { %v1757_v1 = vpop.f32.mrb[0].mxu0 }
  0xf6   :  { %v936_v2 = vadd.f32 %v1757_v1, %v2412_v0  ;;  %v1789_v3 = vpop.f32.mrb[0].mxu1  ;;  %v183_v4 = vpop.f32.mrb[1].mxu0 }
  0xf7   :  { %v952_v5 = vadd.f32 %v1789_v3, %v2412_v0  ;;  %v934_v6 = vadd.f32 %v2412_v0, %v183_v4  ;;  %v410_v7 = vpop.f32.mrb[1].mxu1  ;;  %v1758_v8 = vpop.f32.mrb[2].mxu0 }
  0xf8   :  { %v1613_v9 = vmul.f32 -1.442695, %v936_v2  ;;  %v950_v10 = vadd.f32 %v2412_v0, %v410_v7  ;;  %v937_v11 = vadd.f32 %v1758_v8, %v2412_v0  ;;  %v1790_v12 = vpop.f32.mrb[2].mxu1  ;;  %v186_v13 = vpop.f32.mrb[3].mxu0 }
  0xf9   :  { %v1629_v14 = vmul.f32 -1.442695, %v952_v5  ;;  %v1611_v15 = vmul.f32 -1.442695, %v934_v6  ;;  %v953_v16 = vadd.f32 %v1790_v12, %v2412_v0  ;;  %v935_v17 = vadd.f32 %v2412_v0, %v186_v13  ;;  %v413_v18 = vpop.f32.mrb[3].mxu1 }
  0xfa   :  { %1931 = vpow2.f32 %v1613_v9  ;;  %v1627_v19 = vmul.f32 -1.442695, %v950_v10  ;;  %v1614_v20 = vmul.f32 -1.442695, %v937_v11  ;;  %v951_v21 = vadd.f32 %v2412_v0, %v413_v18 }
  0xfb   :  { %1933 = vpow2.f32 %v1629_v14  ;;  %v1630_v22 = vmul.f32 -1.442695, %v953_v16  ;;  %v1612_v23 = vmul.f32 -1.442695, %v935_v17 }
  0xfc   :  { %1935 = vpow2.f32 %v1611_v15  ;;  %v1628_v24 = vmul.f32 -1.442695, %v951_v21 }
  0xfd   :  { %1937 = vpow2.f32 %v1627_v19  ;;  %v1761_v25 = vpop.f32.mrb[4].mxu0 }
  0xfe   :  { %1939 = vpow2.f32 %v1614_v20  ;;  %v940_v26 = vadd.f32 %v1761_v25, %v2412_v0  ;;  %v1793_v27 = vpop.f32.mrb[4].mxu1  ;;  %v199_v28 = vpop.f32.mrb[5].mxu0 }
  0xff   :  { %1941 = vpow2.f32 %v1630_v22  ;;  %v956_v29 = vadd.f32 %v1793_v27, %v2412_v0  ;;  %v938_v30 = vadd.f32 %v2412_v0, %v199_v28  ;;  %v426_v31 = vpop.f32.mrb[5].mxu1  ;;  %v1762_v32 = vpop.f32.mrb[6].mxu0 }
 0x100   :  { %1943 = vpow2.f32 %v1612_v23  ;;  %v1617_v33 = vmul.f32 -1.442695, %v940_v26  ;;  %v954_v34 = vadd.f32 %v2412_v0, %v426_v31  ;;  %v941_v35 = vadd.f32 %v1762_v32, %v2412_v0  ;;  %v1794_v36 = vpop.f32.mrb[6].mxu1  ;;  %v202_v37 = vpop.f32.mrb[7].mxu0 }
 0x101   :  { %1945 = vpow2.f32 %v1628_v24  ;;  %v1633_v38 = vmul.f32 -1.442695, %v956_v29  ;;  %v1615_v39 = vmul.f32 -1.442695, %v938_v30  ;;  %v429_v40 = vpop.f32.mrb[7].mxu1  ;;  %v957_v5 = vadd.f32 %v1794_v36, %v2412_v0 }
 0x102   :  { %1947 = vpow2.f32 %v1617_v33  ;;  %v1631_v41 = vmul.f32 -1.442695, %v954_v34  ;;  %v1618_v42 = vmul.f32 -1.442695, %v941_v35  ;;  %v939_v8 = vadd.f32 %v2412_v0, %v202_v37 }
 0x103   :  { %1949 = vpow2.f32 %v1633_v38  ;;  %v955_v12 = vadd.f32 %v2412_v0, %v429_v40  ;;  %v1634_v22 = vmul.f32 -1.442695, %v957_v5 }
 0x104   :  { %v1932_v43 = vpop.eup %1931  ;;  %1951 = vpow2.f32 %v1615_v39  ;;  %v1616_v28 = vmul.f32 -1.442695, %v939_v8 }
 0x105   :  { %v1934_v44 = vpop.eup %1933  ;;  %v1192_v45 = vadd.f32 1.0, %v1932_v43  ;;  %1953 = vpow2.f32 %v1631_v41  ;;  %v1765_v46 = vpop.f32.mrb[8].mxu0  ;;  %v1632_v32 = vmul.f32 -1.442695, %v955_v12 }
 0x106   :  { %v1936_v47 = vpop.eup %1935  ;;  %v1208_v48 = vadd.f32 1.0, %v1934_v44  ;;  %1955 = vpow2.f32 %v1618_v42  ;;  %v1797_v49 = vpop.f32.mrb[8].mxu1  ;;  %v944_v17 = vadd.f32 %v1765_v46, %v2412_v0 }
 0x107   :  { %v215_v50 = vpop.f32.mrb[9].mxu0  ;;  %v1938_v51 = vpop.eup %1937  ;;  %1957 = vrcp.f32 %v1192_v45  ;;  %v1190_v52 = vadd.f32 1.0, %v1936_v47  ;;  %v960_v23 = vadd.f32 %v1797_v49, %v2412_v0 }
 0x108   :  { %v442_v53 = vpop.f32.mrb[9].mxu1  ;;  %v1766_v54 = vpop.f32.mrb[10].mxu0  ;;  %1959 = vrcp.f32 %v1208_v48  ;;  %v1206_v56 = vadd.f32 1.0, %v1938_v51  ;;  %v942_v29 = vadd.f32 %v2412_v0, %v215_v50  ;;  %v1621_v35 = vmul.f32 -1.442695, %v944_v17 }
 0x109   :  { %v1940_v55 = vpop.eup %1939  ;;  %v1798_v57 = vpop.f32.mrb[10].mxu1  ;;  %1961 = vrcp.f32 %v1190_v52  ;;  %v958_v33 = vadd.f32 %v2412_v0, %v442_v53  ;;  %v945_v36 = vadd.f32 %v1766_v54, %v2412_v0  ;;  %v1637_v38 = vmul.f32 -1.442695, %v960_v23 }
 0x10a   :  { %v2427_v58 = vpop.f32.mrb[11].mxu0  ;;  %v1942_v59 = vpop.eup %1941  ;;  %v1193_v60 = vadd.f32 1.0, %v1940_v55  ;;  %1963 = vrcp.f32 %v1206_v56  ;;  %v961_v39 = vadd.f32 %v1798_v57, %v2412_v0  ;;  %v1619_v41 = vmul.f32 -1.442695, %v942_v29 }
 0x10b   :  { %v2429_v61 = vpop.f32.mrb[11].mxu1  ;;  %v1944_v62 = vpop.eup %1943  ;;  %v1209_v63 = vadd.f32 1.0, %v1942_v59  ;;  %v943_v42 = vadd.f32 %v2412_v0, %v2427_v58  ;;  %v1635_v45 = vmul.f32 -1.442695, %v958_v33  ;;  %v1622_v50 = vmul.f32 -1.442695, %v945_v36 }
 0x10c   :  { %v1946_v1 = vpop.eup %1945  ;;  %1965 = vrcp.f32 %v1193_v60  ;;  %v1191_v2 = vadd.f32 1.0, %v1944_v62  ;;  %v959_v46 = vadd.f32 %v2412_v0, %v2429_v61  ;;  %v1638_v55 = vmul.f32 -1.442695, %v961_v39 }
 0x10d   :  { %v1948_v3 = vpop.eup %1947  ;;  %1967 = vrcp.f32 %v1209_v63  ;;  %v1207_v4 = vadd.f32 1.0, %v1946_v1  ;;  %v1769_v9 = vpop.f32.mrb[12].mxu0  ;;  %v1620_v60 = vmul.f32 -1.442695, %v943_v42 }
 0x10e   :  { %v1950_v6 = vpop.eup %1949  ;;  %1969 = vrcp.f32 %v1191_v2  ;;  %v1196_v7 = vadd.f32 1.0, %v1948_v3  ;;  %v1801_v13 = vpop.f32.mrb[12].mxu1  ;;  %v948_v51 = vadd.f32 %v1769_v9, %v2412_v0  ;;  %v1636_v63 = vmul.f32 -1.442695, %v959_v46 }
 0x10f   :  { %v1952_v10 = vpop.eup %1951  ;;  %1971 = vrcp.f32 %v1207_v4  ;;  %v1212_v11 = vadd.f32 1.0, %v1950_v6  ;;  %v2434_v14 = vpop.f32.mrb[13].mxu0  ;;  %v964_v56 = vadd.f32 %v1801_v13, %v2412_v0 }
 0x110   :  { %v1954_v15 = vpop.eup %1953  ;;  %1973 = vrcp.f32 %v1196_v7  ;;  %v1194_v16 = vadd.f32 1.0, %v1952_v10  ;;  %v2437_v18 = vpop.f32.mrb[13].mxu1  ;;  %v1625_v3 = vmul.f32 -1.442695, %v948_v51 }
 0x111   :  { %v2439_v19 = vpop.f32.mrb[14].mxu0  ;;  %v1956_v20 = vpop.eup %1955  ;;  %1975 = vrcp.f32 %v1212_v11  ;;  %v1210_v21 = vadd.f32 1.0, %v1954_v15  ;;  %v1641_v6 = vmul.f32 -1.442695, %v964_v56  ;;  %v962_v33 = vadd.f32 %v2412_v0, %v2437_v18 }
 0x112   :  { %v2442_v24 = vpop.f32.mrb[14].mxu1  ;;  %v2444_v25 = vpop.f32.mrb[15].mxu0  ;;  %1977 = vrcp.f32 %v1194_v16  ;;  %v1197_v27 = vadd.f32 1.0, %v1956_v20 }
 0x113   :  { %v1958_v26 = vpop.eup %1957  ;;  %v2447_v30 = vpop.f32.mrb[15].mxu1  ;;  %1979 = vrcp.f32 %v1210_v21 }
 0x114   :  { %v1960_v31 = vpop.eup %1959  ;;  %1384 = vst [vmem:[%s2795_s5 + $0x10] sm:$0xff] %v1958_v26  ;;  %1981 = vrcp.f32 %v1197_v27 }
 0x115   :  { %v1962_v34 = vpop.eup %1961  ;;  %1400 = vst [vmem:[%s2795_s5 + $0x90] sm:$0xff] %v1960_v31  ;;  %1983 = vpow2.f32 %v1634_v22  ;;  %v2466_v43 = vpop.f32.mrb[16].mxu0 }
 0x116   :  { %v1964_v37 = vpop.eup %1963  ;;  %1382 = vst [vmem:[%s2795_s5] sm:$0xff] %v1962_v34  ;;  %1985 = vpow2.f32 %v1616_v28  ;;  %v2473_v47 = vpop.f32.mrb[16].mxu1 }
 0x117   :  { %v1966_v40 = vpop.eup %1965  ;;  %1398 = vst [vmem:[%s2795_s5 + $0x80] sm:$0xff] %v1964_v37  ;;  %1987 = vpow2.f32 %v1632_v32  ;;  %v2475_v48 = vpop.f32.mrb[17].mxu0  ;;  %v946_v32 = vadd.f32 %v2412_v0, %v2434_v14 }
 0x118   :  { %v1968_v44 = vpop.eup %1967  ;;  %1385 = vst [vmem:[%s2795_s5 + $0x18] sm:$0xff] %v1966_v40  ;;  %1989 = vpow2.f32 %v1621_v35  ;;  %v2481_v52 = vpop.f32.mrb[17].mxu1 }
 0x119   :  { %v1970_v49 = vpop.eup %1969  ;;  %1401 = vst [vmem:[%s2795_s5 + $0x98] sm:$0xff] %v1968_v44  ;;  %v2483_v53 = vpop.f32.mrb[18].mxu0  ;;  %1991 = vpow2.f32 %v1637_v38  ;;  %v1623_v46 = vmul.f32 -1.442695, %v946_v32 }
 0x11a   :  { %v1972_v54 = vpop.eup %1971  ;;  %1383 = vst [vmem:[%s2795_s5 + $0x8] sm:$0xff] %v1970_v49  ;;  %v2489_v57 = vpop.f32.mrb[18].mxu1  ;;  %1993 = vpow2.f32 %v1619_v41  ;;  %v1639_v49 = vmul.f32 -1.442695, %v962_v33 }
 0x11b   :  { %v640_v58 = vpop.f32.mrb[19].mxu0  ;;  %v1974_v59 = vpop.eup %1973  ;;  %1399 = vst [vmem:[%s2795_s5 + $0x88] sm:$0xff] %v1972_v54  ;;  %1995 = vpow2.f32 %v1635_v45 }
 0x11c   :  { %v867_v61 = vpop.f32.mrb[19].mxu1  ;;  %v1976_v62 = vpop.eup %1975  ;;  %1388 = vst [vmem:[%s2795_s5 + $0x30] sm:$0xff] %v1974_v59  ;;  %v2498_v1 = vadd.f32 %v2412_v0, %v640_v58  ;;  %1997 = vpow2.f32 %v1622_v50 }
 0x11d   :  { %v1978_v2 = vpop.eup %1977  ;;  %1404 = vst [vmem:[%s2795_s5 + $0xb0] sm:$0xff] %v1976_v62  ;;  %v2504_v4 = vadd.f32 %v2412_v0, %v867_v61  ;;  %1999 = vpow2.f32 %v1638_v55  ;;  %v1825_v8 = vpop.f32.mrb[20].mxu0  ;;  %v949_v55 = vadd.f32 %v2439_v19, %v2412_v0  ;;  %v965_v19 = vadd.f32 %v2442_v24, %v2412_v0 }
 0x11e   :  { %v1980_v5 = vpop.eup %1979  ;;  %1386 = vst [vmem:[%s2795_s5 + $0x20] sm:$0xff] %v1978_v2  ;;  %2001 = vpow2.f32 %v1620_v60  ;;  %v2516_v10 = vadd.f32 %v1825_v8, %v2412_v0  ;;  %v1857_v11 = vpop.f32.mrb[20].mxu1  ;;  %v968_v24 = vadd.f32 %v2466_v43, %v2412_v0 }
 0x11f   :  { %v1982_v7 = vpop.eup %1981  ;;  %1402 = vst [vmem:[%s2795_s5 + $0xa0] sm:$0xff] %v1980_v5  ;;  %2003 = vpow2.f32 %v1636_v63  ;;  %v653_v12 = vpop.f32.mrb[21].mxu0  ;;  %v2519_v16 = vadd.f32 %v1857_v11, %v2412_v0  ;;  %v1642_v43 = vmul.f32 -1.442695, %v965_v19 }
 0x120   :  { %v1984_v9 = vpop.eup %1983  ;;  %1389 = vst [vmem:[%s2795_s5 + $0x38] sm:$0xff] %v1982_v7  ;;  %2005 = vpow2.f32 %v1625_v3  ;;  %v2522_v17 = vadd.f32 %v2412_v0, %v653_v12  ;;  %v880_v20 = vpop.f32.mrb[21].mxu1 }
 0x121   :  { %v1986_v13 = vpop.eup %1985  ;;  %v1213_v15 = vadd.f32 1.0, %v1984_v9  ;;  %v1826_v21 = vpop.f32.mrb[22].mxu0  ;;  %2007 = vpow2.f32 %v1641_v6  ;;  %v2525_v26 = vadd.f32 %v2412_v0, %v880_v20 }
 0x122   :  { %v1988_v22 = vpop.eup %1987  ;;  %v1195_v23 = vadd.f32 1.0, %v1986_v13  ;;  %v1858_v27 = vpop.f32.mrb[22].mxu1  ;;  %v2532_v37 = vadd.f32 %v1826_v21, %v2412_v0  ;;  %v947_v13 = vadd.f32 %v2412_v0, %v2444_v25 }
 0x123   :  { %v656_v28 = vpop.f32.mrb[23].mxu0  ;;  %v1990_v29 = vpop.eup %1989  ;;  %2009 = vrcp.f32 %v1213_v15  ;;  %v1211_v31 = vadd.f32 1.0, %v1988_v22  ;;  %v2535_v40 = vadd.f32 %v1858_v27, %v2412_v0  ;;  %v963_v15 = vadd.f32 %v2412_v0, %v2447_v30 }
 0x124   :  { %v883_v34 = vpop.f32.mrb[23].mxu1  ;;  %v1992_v35 = vpop.eup %1991  ;;  %2011 = vrcp.f32 %v1195_v23  ;;  %v1200_v36 = vadd.f32 1.0, %v1990_v29  ;;  %v2538_v41 = vadd.f32 %v2412_v0, %v656_v28 }
 0x125   :  { %v1994_v38 = vpop.eup %1993  ;;  %2013 = vrcp.f32 %v1211_v31  ;;  %v1216_v39 = vadd.f32 1.0, %v1992_v35  ;;  %v2541_v18 = vadd.f32 %v2412_v0, %v883_v34  ;;  %v1829_v50 = vpop.f32.mrb[24].mxu0  ;;  %v1626_v31 = vmul.f32 -1.442695, %v949_v55 }
 0x126   :  { %v1996_v14 = vpop.eup %1995  ;;  %2015 = vrcp.f32 %v1200_v36  ;;  %v1198_v42 = vadd.f32 1.0, %v1994_v38  ;;  %v2546_v56 = vadd.f32 %v1829_v50, %v2412_v0  ;;  %v1861_v58 = vpop.f32.mrb[24].mxu1  ;;  %v1624_v34 = vmul.f32 -1.442695, %v947_v13 }
 0x127   :  { %v1998_v44 = vpop.eup %1997  ;;  %2017 = vrcp.f32 %v1216_v39  ;;  %v1214_v45 = vadd.f32 1.0, %v1996_v14  ;;  %v669_v59 = vpop.f32.mrb[25].mxu0  ;;  %v2549_v62 = vadd.f32 %v1861_v58, %v2412_v0  ;;  %v1640_v35 = vmul.f32 -1.442695, %v963_v15 }
 0x128   :  { %v2000_v51 = vpop.eup %1999  ;;  %2019 = vrcp.f32 %v1198_v42  ;;  %v1201_v54 = vadd.f32 1.0, %v1998_v44  ;;  %v2552_v63 = vadd.f32 %v2412_v0, %v669_v59  ;;  %v896_v2 = vpop.f32.mrb[25].mxu1  ;;  %v984_v36 = vadd.f32 %v2473_v47, %v2412_v0 }
 0x129   :  { %v2002_v60 = vpop.eup %2001  ;;  %2021 = vrcp.f32 %v1214_v45  ;;  %v1217_v61 = vadd.f32 1.0, %v2000_v51  ;;  %v1830_v3 = vpop.f32.mrb[26].mxu0  ;;  %v2557_v7 = vadd.f32 %v2412_v0, %v896_v2  ;;  %v1645_v14 = vmul.f32 -1.442695, %v968_v24 }
 0x12a   :  { %v2004_v5 = vpop.eup %2003  ;;  %2023 = vrcp.f32 %v1201_v54  ;;  %v1199_v6 = vadd.f32 1.0, %v2002_v60  ;;  %v1862_v8 = vpop.f32.mrb[26].mxu1  ;;  %v2566_v23 = vadd.f32 %v1830_v3, %v2412_v0  ;;  %v966_v42 = vadd.f32 %v2412_v0, %v2475_v48 }
 0x12b   :  { %v672_v9 = vpop.f32.mrb[27].mxu0  ;;  %v2006_v11 = vpop.eup %2005  ;;  %2025 = vrcp.f32 %v1217_v61  ;;  %v1215_v12 = vadd.f32 1.0, %v2004_v5  ;;  %v2569_v29 = vadd.f32 %v1862_v8, %v2412_v0  ;;  %v982_v47 = vadd.f32 %v2412_v0, %v2481_v52 }
 0x12c   :  { %v899_v20 = vpop.f32.mrb[27].mxu1  ;;  %v2008_v21 = vpop.eup %2007  ;;  %2027 = vrcp.f32 %v1199_v6  ;;  %v1204_v22 = vadd.f32 1.0, %v2006_v11  ;;  %v2572_v25 = vadd.f32 %v2412_v0, %v672_v9  ;;  %v1661_v3 = vmul.f32 -1.442695, %v984_v36 }
 0x12d   :  { %v2010_v27 = vpop.eup %2009  ;;  %2029 = vrcp.f32 %v1215_v12  ;;  %v1220_v28 = vadd.f32 1.0, %v2008_v21  ;;  %v2578_v32 = vadd.f32 %v2412_v0, %v899_v20  ;;  %v1833_v38 = vpop.f32.mrb[28].mxu0  ;;  %v985_v5 = vadd.f32 %v2489_v57, %v2412_v0 }
 0x12e   :  { %v2012_v30 = vpop.eup %2011  ;;  %1405 = vst [vmem:[%s2795_s5 + $0xb8] sm:$0xff] %v2010_v27  ;;  %2031 = vrcp.f32 %v1204_v22  ;;  %v2591_v44 = vadd.f32 %v1833_v38, %v2412_v0  ;;  %v1865_v45 = vpop.f32.mrb[28].mxu1  ;;  %v1643_v8 = vmul.f32 -1.442695, %v966_v42  ;;  %v1659_v57 = vmul.f32 -1.442695, %v982_v47 }
 0x12f   :  { %v2014_v33 = vpop.eup %2013  ;;  %1387 = vst [vmem:[%s2795_s5 + $0x28] sm:$0xff] %v2012_v30  ;;  %2033 = vrcp.f32 %v1220_v28  ;;  %v685_v50 = vpop.f32.mrb[29].mxu0  ;;  %v1662_v21 = vmul.f32 -1.442695, %v985_v5 }
 0x130   :  { %v2016_v39 = vpop.eup %2015  ;;  %1403 = vst [vmem:[%s2795_s5 + $0xa8] sm:$0xff] %v2014_v33  ;;  %2035 = vpow2.f32 %v1623_v46  ;;  %v2599_v46 = vadd.f32 %v1865_v45, %v2412_v0  ;;  %v2602_v54 = vadd.f32 %v2412_v0, %v685_v50  ;;  %v912_v48 = vpop.f32.mrb[29].mxu1 }
 0x131   :  { %v2018_v51 = vpop.eup %2017  ;;  %1392 = vst [vmem:[%s2795_s5 + $0x50] sm:$0xff] %v2016_v39  ;;  %2037 = vpow2.f32 %v1639_v49  ;;  %v1834_v55 = vpop.f32.mrb[30].mxu0  ;;  %v969_v49 = vadd.f32 %v2483_v53, %v2412_v0  ;;  %v2610_v59 = vadd.f32 %v2412_v0, %v912_v48 }
 0x132   :  { %v2020_v58 = vpop.eup %2019  ;;  %1408 = vst [vmem:[%s2795_s5 + $0xd0] sm:$0xff] %v2018_v51  ;;  %2039 = vpow2.f32 %v1626_v31  ;;  %v2613_v52 = vadd.f32 %v1834_v55, %v2412_v0  ;;  %v1866_v60 = vpop.f32.mrb[30].mxu1 }
 0x133   :  { %v688_v61 = vpop.f32.mrb[31].mxu0  ;;  %v2022_v2 = vpop.eup %2021  ;;  %1390 = vst [vmem:[%s2795_s5 + $0x40] sm:$0xff] %v2020_v58  ;;  %2041 = vpow2.f32 %v1642_v43  ;;  %v2621_v53 = vadd.f32 %v1866_v60, %v2412_v0  ;;  %v1646_v15 = vmul.f32 -1.442695, %v969_v49 }
 0x134   :  { %v915_v6 = vpop.f32.mrb[31].mxu1  ;;  %v2024_v19 = vpop.eup %2023  ;;  %1406 = vst [vmem:[%s2795_s5 + $0xc0] sm:$0xff] %v2022_v2  ;;  %2043 = vpow2.f32 %v1624_v34  ;;  %v2627_v9 = vadd.f32 %v2412_v0, %v688_v61 }
 0x135   :  { %v2026_v11 = vpop.eup %2025  ;;  %1393 = vst [vmem:[%s2795_s5 + $0x58] sm:$0xff] %v2024_v19  ;;  %2045 = vpow2.f32 %v1640_v35  ;;  %v2633_v12 = vadd.f32 %v2412_v0, %v915_v6  ;;  %v1644_v0 = vmul.f32 -1.442695, %v2498_v1  ;;  %v1649_v19 = vmul.f32 -1.442695, %v2516_v10 }
 0x136   :  { %v2028_v13 = vpop.eup %2027  ;;  %1409 = vst [vmem:[%s2795_s5 + $0xd8] sm:$0xff] %v2026_v11  ;;  %2047 = vpow2.f32 %v1645_v14  ;;  %v1665_v11 = vmul.f32 -1.442695, %v2519_v16  ;;  %v1663_v10 = vmul.f32 -1.442695, %v2525_v26 }
 0x137   :  { %v2030_v20 = vpop.eup %2029  ;;  %1391 = vst [vmem:[%s2795_s5 + $0x48] sm:$0xff] %v2028_v13  ;;  %2049 = vpow2.f32 %v1661_v3  ;;  %v1660_v3 = vmul.f32 -1.442695, %v2504_v4  ;;  %v1647_v4 = vmul.f32 -1.442695, %v2522_v17 }
 0x138   :  { %v2032_v22 = vpop.eup %2031  ;;  %1407 = vst [vmem:[%s2795_s5 + $0xc8] sm:$0xff] %v2030_v20  ;;  %2051 = vpow2.f32 %v1643_v8  ;;  %v1650_v16 = vmul.f32 -1.442695, %v2532_v37  ;;  %v1666_v17 = vmul.f32 -1.442695, %v2535_v40 }
 0x139   :  { %v2034_v24 = vpop.eup %2033  ;;  %1396 = vst [vmem:[%s2795_s5 + $0x70] sm:$0xff] %v2032_v22  ;;  %2053 = vpow2.f32 %v1659_v57  ;;  %v1648_v26 = vmul.f32 -1.442695, %v2538_v41  ;;  %v1664_v37 = vmul.f32 -1.442695, %v2541_v18 }
 0x13a   :  { %v2036_v27 = vpop.eup %2035  ;;  %1412 = vst [vmem:[%s2795_s5 + $0xf0] sm:$0xff] %v2034_v24  ;;  %2055 = vpow2.f32 %v1646_v15  ;;  %v1653_v40 = vmul.f32 -1.442695, %v2546_v56  ;;  %v1669_v41 = vmul.f32 -1.442695, %v2549_v62 }
 0x13b   :  { %v2038_v28 = vpop.eup %2037  ;;  %v1202_v30 = vadd.f32 1.0, %v2036_v27  ;;  %2057 = vpow2.f32 %v1662_v21  ;;  %v1651_v18 = vmul.f32 -1.442695, %v2552_v63  ;;  %v1667_v56 = vmul.f32 -1.442695, %v2557_v7 }
 0x13c   :  { %v2040_v31 = vpop.eup %2039  ;;  %v1218_v43 = vadd.f32 1.0, %v2038_v28  ;;  %2059 = vpow2.f32 %v1644_v0 }
 0x13d   :  { %v2042_v33 = vpop.eup %2041  ;;  %2061 = vrcp.f32 %v1202_v30  ;;  %v1205_v1 = vadd.f32 1.0, %v2040_v31 }
 0x13e   :  { %v2044_v34 = vpop.eup %2043  ;;  %2063 = vrcp.f32 %v1218_v43  ;;  %v1221_v35 = vadd.f32 1.0, %v2042_v33 }
 0x13f   :  { %v2046_v36 = vpop.eup %2045  ;;  %2065 = vrcp.f32 %v1205_v1  ;;  %v1203_v38 = vadd.f32 1.0, %v2044_v34 }
 0x140   :  { %v2048_v39 = vpop.eup %2047  ;;  %2067 = vrcp.f32 %v1221_v35  ;;  %v1219_v14 = vadd.f32 1.0, %v2046_v36 }
 0x141   :  { %v2050_v42 = vpop.eup %2049  ;;  %2069 = vrcp.f32 %v1203_v38  ;;  %v1224_v45 = vadd.f32 1.0, %v2048_v39 }
 0x142   :  { %v2052_v50 = vpop.eup %2051  ;;  %2071 = vrcp.f32 %v1219_v14  ;;  %v1240_v51 = vadd.f32 1.0, %v2050_v42 }
 0x143   :  { %v2054_v47 = vpop.eup %2053  ;;  %2073 = vrcp.f32 %v1224_v45  ;;  %v1222_v48 = vadd.f32 1.0, %v2052_v50 }
 0x144   :  { %v2056_v55 = vpop.eup %2055  ;;  %2075 = vrcp.f32 %v1240_v51  ;;  %v1238_v58 = vadd.f32 1.0, %v2054_v47 }
 0x145   :  { %v2058_v49 = vpop.eup %2057  ;;  %2077 = vrcp.f32 %v1222_v48  ;;  %v1225_v60 = vadd.f32 1.0, %v2056_v55 }
 0x146   :  { %v2060_v61 = vpop.eup %2059  ;;  %2079 = vrcp.f32 %v1238_v58  ;;  %v1241_v2 = vadd.f32 1.0, %v2058_v49 }
 0x147   :  { %v2062_v5 = vpop.eup %2061  ;;  %2081 = vrcp.f32 %v1225_v60  ;;  %v1223_v6 = vadd.f32 1.0, %v2060_v61 }
 0x148   :  { %v2064_v8 = vpop.eup %2063  ;;  %1394 = vst [vmem:[%s2795_s5 + $0x60] sm:$0xff] %v2062_v5  ;;  %2083 = vrcp.f32 %v1241_v2 }
 0x149   :  { %v2066_v57 = vpop.eup %2065  ;;  %1410 = vst [vmem:[%s2795_s5 + $0xe0] sm:$0xff] %v2064_v8  ;;  %2085 = vrcp.f32 %v1223_v6 }
 0x14a   :  { %v2068_v13 = vpop.eup %2067  ;;  %1397 = vst [vmem:[%s2795_s5 + $0x78] sm:$0xff] %v2066_v57  ;;  %2087 = vpow2.f32 %v1660_v3  ;;  %v1654_v3 = vmul.f32 -1.442695, %v2566_v23  ;;  %v1668_v23 = vmul.f32 -1.442695, %v2578_v32 }
 0x14b   :  { %v2070_v15 = vpop.eup %2069  ;;  %1413 = vst [vmem:[%s2795_s5 + $0xf8] sm:$0xff] %v2068_v13  ;;  %2089 = vpow2.f32 %v1649_v19  ;;  %v1670_v19 = vmul.f32 -1.442695, %v2569_v29  ;;  %v1657_v29 = vmul.f32 -1.442695, %v2591_v44 }
 0x14c   :  { %v2072_v20 = vpop.eup %2071  ;;  %1395 = vst [vmem:[%s2795_s5 + $0x68] sm:$0xff] %v2070_v15  ;;  %2091 = vpow2.f32 %v1665_v11  ;;  %v1652_v11 = vmul.f32 -1.442695, %v2572_v25  ;;  %v1673_v25 = vmul.f32 -1.442695, %v2599_v46 }
 0x14d   :  { %v2074_v21 = vpop.eup %2073  ;;  %1411 = vst [vmem:[%s2795_s5 + $0xe8] sm:$0xff] %v2072_v20  ;;  %2093 = vpow2.f32 %v1647_v4  ;;  %v1655_v32 = vmul.f32 -1.442695, %v2602_v54  ;;  %v1671_v44 = vmul.f32 -1.442695, %v2610_v59 }
 0x14e   :  { %v2076_v22 = vpop.eup %2075  ;;  %1416 = vst [vmem:[%s2795_s5 + $0x110] sm:$0xff] %v2074_v21  ;;  %2095 = vpow2.f32 %v1663_v10  ;;  %v1658_v46 = vmul.f32 -1.442695, %v2613_v52  ;;  %v1674_v54 = vmul.f32 -1.442695, %v2621_v53 }
 0x14f   :  { %v2078_v0 = vpop.eup %2077  ;;  %1432 = vst [vmem:[%s2795_s5 + $0x190] sm:$0xff] %v2076_v22  ;;  %2097 = vpow2.f32 %v1650_v16  ;;  %v1656_v59 = vmul.f32 -1.442695, %v2627_v9  ;;  %v1672_v52 = vmul.f32 -1.442695, %v2633_v12 }
 0x150   :  { %v2080_v24 = vpop.eup %2079  ;;  %1414 = vst [vmem:[%s2795_s5 + $0x100] sm:$0xff] %v2078_v0  ;;  %2099 = vpow2.f32 %v1666_v17 }
 0x151   :  { %v2082_v27 = vpop.eup %2081  ;;  %1430 = vst [vmem:[%s2795_s5 + $0x180] sm:$0xff] %v2080_v24  ;;  %2101 = vpow2.f32 %v1648_v26 }
 0x152   :  { %v2084_v28 = vpop.eup %2083  ;;  %1417 = vst [vmem:[%s2795_s5 + $0x118] sm:$0xff] %v2082_v27  ;;  %2103 = vpow2.f32 %v1664_v37 }
 0x153   :  { %v2086_v30 = vpop.eup %2085  ;;  %1433 = vst [vmem:[%s2795_s5 + $0x198] sm:$0xff] %v2084_v28  ;;  %2105 = vpow2.f32 %v1653_v40 }
 0x154   :  { %v2088_v62 = vpop.eup %2087  ;;  %1415 = vst [vmem:[%s2795_s5 + $0x108] sm:$0xff] %v2086_v30  ;;  %2107 = vpow2.f32 %v1669_v41 }
 0x155   :  { %v2090_v63 = vpop.eup %2089  ;;  %v1239_v31 = vadd.f32 1.0, %v2088_v62  ;;  %2109 = vpow2.f32 %v1651_v18 }
 0x156   :  { %v2092_v43 = vpop.eup %2091  ;;  %v1228_v33 = vadd.f32 1.0, %v2090_v63  ;;  %2111 = vpow2.f32 %v1667_v56 }
 0x157   :  { %v2094_v1 = vpop.eup %2093  ;;  %2113 = vrcp.f32 %v1239_v31  ;;  %v1244_v7 = vadd.f32 1.0, %v2092_v43 }
 0x158   :  { %v2096_v34 = vpop.eup %2095  ;;  %2115 = vrcp.f32 %v1228_v33  ;;  %v1226_v35 = vadd.f32 1.0, %v2094_v1 }
 0x159   :  { %v2098_v36 = vpop.eup %2097  ;;  %2117 = vrcp.f32 %v1244_v7  ;;  %v1242_v38 = vadd.f32 1.0, %v2096_v34 }
 0x15a   :  { %v2100_v39 = vpop.eup %2099  ;;  %2119 = vrcp.f32 %v1226_v35  ;;  %v1229_v14 = vadd.f32 1.0, %v2098_v36 }
 0x15b   :  { %v2102_v42 = vpop.eup %2101  ;;  %2121 = vrcp.f32 %v1242_v38  ;;  %v1245_v45 = vadd.f32 1.0, %v2100_v39 }
 0x15c   :  { %v2104_v50 = vpop.eup %2103  ;;  %2123 = vrcp.f32 %v1229_v14  ;;  %v1227_v51 = vadd.f32 1.0, %v2102_v42 }
 0x15d   :  { %v2106_v47 = vpop.eup %2105  ;;  %2125 = vrcp.f32 %v1245_v45  ;;  %v1243_v48 = vadd.f32 1.0, %v2104_v50 }
 0x15e   :  { %v2108_v55 = vpop.eup %2107  ;;  %2127 = vrcp.f32 %v1227_v51  ;;  %v1232_v58 = vadd.f32 1.0, %v2106_v47 }
 0x15f   :  { %v2110_v49 = vpop.eup %2109  ;;  %2129 = vrcp.f32 %v1243_v48  ;;  %v1248_v60 = vadd.f32 1.0, %v2108_v55 }
 0x160   :  { %v2112_v61 = vpop.eup %2111  ;;  %2131 = vrcp.f32 %v1232_v58  ;;  %v1230_v2 = vadd.f32 1.0, %v2110_v49 }
 0x161   :  { %v2114_v5 = vpop.eup %2113  ;;  %2133 = vrcp.f32 %v1248_v60  ;;  %v1246_v6 = vadd.f32 1.0, %v2112_v61 }
 0x162   :  { %v2116_v8 = vpop.eup %2115  ;;  %1431 = vst [vmem:[%s2795_s5 + $0x188] sm:$0xff] %v2114_v5  ;;  %2135 = vrcp.f32 %v1230_v2 }
 0x163   :  { %v2118_v57 = vpop.eup %2117  ;;  %1420 = vst [vmem:[%s2795_s5 + $0x130] sm:$0xff] %v2116_v8  ;;  %2137 = vrcp.f32 %v1246_v6 }
 0x164   :  { %v2120_v4 = vpop.eup %2119  ;;  %1436 = vst [vmem:[%s2795_s5 + $0x1b0] sm:$0xff] %v2118_v57  ;;  %2139 = vpow2.f32 %v1654_v3 }
 0x165   :  { %v2122_v13 = vpop.eup %2121  ;;  %1418 = vst [vmem:[%s2795_s5 + $0x120] sm:$0xff] %v2120_v4  ;;  %2141 = vpow2.f32 %v1670_v19 }
 0x166   :  { %v2124_v10 = vpop.eup %2123  ;;  %1434 = vst [vmem:[%s2795_s5 + $0x1a0] sm:$0xff] %v2122_v13  ;;  %2143 = vpow2.f32 %v1652_v11 }
 0x167   :  { %v2126_v15 = vpop.eup %2125  ;;  %1421 = vst [vmem:[%s2795_s5 + $0x138] sm:$0xff] %v2124_v10  ;;  %2145 = vpow2.f32 %v1668_v23 }
 0x168   :  { %v2128_v16 = vpop.eup %2127  ;;  %1437 = vst [vmem:[%s2795_s5 + $0x1b8] sm:$0xff] %v2126_v15  ;;  %2147 = vpow2.f32 %v1657_v29 }
 0x169   :  { %v2130_v20 = vpop.eup %2129  ;;  %1419 = vst [vmem:[%s2795_s5 + $0x128] sm:$0xff] %v2128_v16  ;;  %2149 = vpow2.f32 %v1673_v25 }
 0x16a   :  { %v2132_v17 = vpop.eup %2131  ;;  %1435 = vst [vmem:[%s2795_s5 + $0x1a8] sm:$0xff] %v2130_v20  ;;  %2151 = vpow2.f32 %v1655_v32 }
 0x16b   :  { %v2134_v21 = vpop.eup %2133  ;;  %1424 = vst [vmem:[%s2795_s5 + $0x150] sm:$0xff] %v2132_v17  ;;  %2153 = vpow2.f32 %v1671_v44 }
 0x16c   :  { %v2136_v26 = vpop.eup %2135  ;;  %1440 = vst [vmem:[%s2795_s5 + $0x1d0] sm:$0xff] %v2134_v21  ;;  %2155 = vpow2.f32 %v1658_v46 }
 0x16d   :  { %v2138_v53 = vpop.eup %2137  ;;  %1422 = vst [vmem:[%s2795_s5 + $0x140] sm:$0xff] %v2136_v26  ;;  %2157 = vpow2.f32 %v1674_v54 }
 0x16e   :  { %v2140_v9 = vpop.eup %2139  ;;  %1438 = vst [vmem:[%s2795_s5 + $0x1c0] sm:$0xff] %v2138_v53  ;;  %2159 = vpow2.f32 %v1656_v59 }
 0x16f   :  { %v2142_v22 = vpop.eup %2141  ;;  %v1233_v12 = vadd.f32 1.0, %v2140_v9  ;;  %2161 = vpow2.f32 %v1672_v52 }
 0x170   :  { %v2144_v37 = vpop.eup %2143  ;;  %v1249_v0 = vadd.f32 1.0, %v2142_v22 }
 0x171   :  { %v2146_v40 = vpop.eup %2145  ;;  %2163 = vrcp.f32 %v1233_v12  ;;  %v1231_v24 = vadd.f32 1.0, %v2144_v37 }
 0x172   :  { %v2148_v41 = vpop.eup %2147  ;;  %2165 = vrcp.f32 %v1249_v0  ;;  %v1247_v27 = vadd.f32 1.0, %v2146_v40 }
 0x173   :  { %v2150_v18 = vpop.eup %2149  ;;  %2167 = vrcp.f32 %v1231_v24  ;;  %v1236_v28 = vadd.f32 1.0, %v2148_v41 }
 0x174   :  { %v2152_v56 = vpop.eup %2151  ;;  %2169 = vrcp.f32 %v1247_v27  ;;  %v1252_v30 = vadd.f32 1.0, %v2150_v18 }
 0x175   :  { %v2154_v62 = vpop.eup %2153  ;;  %2171 = vrcp.f32 %v1236_v28  ;;  %v1234_v63 = vadd.f32 1.0, %v2152_v56 }
 0x176   :  { %v2156_v31 = vpop.eup %2155  ;;  %2173 = vrcp.f32 %v1252_v30  ;;  %v1250_v43 = vadd.f32 1.0, %v2154_v62 }
 0x177   :  { %v2158_v33 = vpop.eup %2157  ;;  %2175 = vrcp.f32 %v1234_v63  ;;  %v1237_v1 = vadd.f32 1.0, %v2156_v31 }
 0x178   :  { %v2160_v7 = vpop.eup %2159  ;;  %2177 = vrcp.f32 %v1250_v43  ;;  %v1253_v34 = vadd.f32 1.0, %v2158_v33 }
 0x179   :  { %v2162_v35 = vpop.eup %2161  ;;  %2179 = vrcp.f32 %v1237_v1  ;;  %v1235_v36 = vadd.f32 1.0, %v2160_v7 }
 0x17a   :  { %2181 = vrcp.f32 %v1253_v34  ;;  %v1251_v38 = vadd.f32 1.0, %v2162_v35 }
 0x17b   :  { %v2164_v39 = vpop.eup %2163  ;;  %2183 = vrcp.f32 %v1235_v36 }
 0x17c   :  { %v2166_v14 = vpop.eup %2165  ;;  %1425 = vst [vmem:[%s2795_s5 + $0x158] sm:$0xff] %v2164_v39  ;;  %2185 = vrcp.f32 %v1251_v38 }
 0x17d   :  { %v2168_v42 = vpop.eup %2167  ;;  %1441 = vst [vmem:[%s2795_s5 + $0x1d8] sm:$0xff] %v2166_v14 }
 0x17e   :  { %v2170_v45 = vpop.eup %2169  ;;  %1423 = vst [vmem:[%s2795_s5 + $0x148] sm:$0xff] %v2168_v42 }
 0x17f   :  { %v2172_v50 = vpop.eup %2171  ;;  %1439 = vst [vmem:[%s2795_s5 + $0x1c8] sm:$0xff] %v2170_v45 }
 0x180   :  { %v2174_v51 = vpop.eup %2173  ;;  %1428 = vst [vmem:[%s2795_s5 + $0x170] sm:$0xff] %v2172_v50 }
 0x181   :  { %v2176_v47 = vpop.eup %2175  ;;  %1444 = vst [vmem:[%s2795_s5 + $0x1f0] sm:$0xff] %v2174_v51 }
 0x182   :  { %v2178_v48 = vpop.eup %2177  ;;  %1426 = vst [vmem:[%s2795_s5 + $0x160] sm:$0xff] %v2176_v47 }
 0x183   :  { %v2180_v55 = vpop.eup %2179  ;;  %1442 = vst [vmem:[%s2795_s5 + $0x1e0] sm:$0xff] %v2178_v48 }
 0x184   :  { %v2182_v58 = vpop.eup %2181  ;;  %1429 = vst [vmem:[%s2795_s5 + $0x178] sm:$0xff] %v2180_v55 }
 0x185   :  { %v2184_v49 = vpop.eup %2183  ;;  %1445 = vst [vmem:[%s2795_s5 + $0x1f8] sm:$0xff] %v2182_v58 }
 0x186   :  { %v2186_v60 = vpop.eup %2185  ;;  %1427 = vst [vmem:[%s2795_s5 + $0x168] sm:$0xff] %v2184_v49 }
 0x187   :  { %1443 = vst [vmem:[%s2795_s5 + $0x1e8] sm:$0xff] %v2186_v60 }

</bundles_post_ra>
